<compile_context>
chip_gen: v7x
topology: tpu7x:2x2x1
jax: 0.10.0
libtpu: 0.0.40
codegen_flags: <defaults>
</compile_context>

<pallas_src>
import numpy as np
import jax
import jax.numpy as jnp
from jax import lax
from jax.experimental import pallas as pl
from jax.experimental.pallas import tpu as pltpu

_EPS = 1e-5


# ------------------------- host-side static operators ---------------------- #

def _dw_gather_operator(h, w):
    """Column-concatenated 0/1 gather operator for depthwise 3x3, stride 2,
    padding 1.  Returns (g_cat, ho, wo), g_cat of shape (h*w, 9*ho*wo) with
      g_cat[si, t*ho*wo + so] = 1  iff input flat index si is tap t's source
    for output flat index so (out-of-bounds taps = all-zero columns = zero
    padding).  Values are 0/1, so the operator is exact in bfloat16."""
    ho = (h - 1) // 2 + 1
    wo = (w - 1) // 2 + 1
    so_n = ho * wo
    g = np.zeros((h * w, 9 * so_n), np.float32)
    for oi in range(ho):
        for oj in range(wo):
            so = oi * wo + oj
            for di in range(3):
                for dj in range(3):
                    ii = oi * 2 + di - 1
                    jj = oj * 2 + dj - 1
                    if 0 <= ii < h and 0 <= jj < w:
                        g[ii * w + jj, (di * 3 + dj) * so_n + so] = 1.0
    return g, ho, wo


def _interp_matrix(out_size, in_size):
    """Bilinear, align_corners=True interpolation matrix (out_size, in_size)."""
    m = np.zeros((out_size, in_size), np.float32)
    if in_size == 1:
        m[:, 0] = 1.0
        return m
    scale = (in_size - 1) / (out_size - 1) if out_size > 1 else 0.0
    for i in range(out_size):
        src = i * scale
        i0 = min(int(np.floor(src)), in_size - 1)
        i1 = min(i0 + 1, in_size - 1)
        f = src - i0
        m[i, i0] += 1.0 - f
        m[i, i1] += f
    return m


def _pad2(a, rows, cols):
    out = np.zeros((rows, cols), np.float32)
    a = np.asarray(a, np.float32)
    out[:a.shape[0], :a.shape[1]] = a
    return out


# ------------------------------- forward wrapper ---------------------------- #

def dualgcn_forward(feat, params):
    """DualGCN forward.  feat: (N, C, H, W) float32."""
    n, c, h, w = feat.shape
    s = h * w
    ci = int(params['sgcn']['k_w'].shape[0])          # inter_plane = C // 2
    cp = int(params['theta_w'].shape[0])              # planes // ratio
    cip = -(-ci // 8) * 8                              # ci padded to sublane tile

    # --- static spatial operators (bf16: values are exactly 0/1) ---
    g_cats, s_outs = [], []
    hh, ww = h, w
    for _ in range(3):
        g_cat, hh, ww = _dw_gather_operator(hh, ww)
        g_cats.append(jnp.asarray(g_cat, jnp.bfloat16))
        s_outs.append(hh * ww)
    s_outs = tuple(s_outs)
    ssm = s_outs[-1]

    # batch-block-diagonal bilinear upsample operator: (N*Ssm, N*S), f32
    kt = np.kron(_interp_matrix(h, hh), _interp_matrix(w, ww)).T   # (Ssm, S)
    ktn = jnp.asarray(np.kron(np.eye(n, dtype=np.float32), kt), jnp.float32)

    # --- fuse / pad the small weights and pack them into ONE f32 slab ---
    sg = params['sgcn']
    kvq_w = np.zeros((3 * cip, c), np.float32)
    kvq_b = np.zeros((3 * cip, 1), np.float32)
    for idx, (wn, bn_) in enumerate((('k_w', 'k_b'), ('v_w', 'v_b'),
                                     ('q_w', 'q_b'))):
        kvq_w[idx * cip: idx * cip + ci] = np.asarray(sg[wn], np.float32)
        kvq_b[idx * cip: idx * cip + ci, 0] = np.asarray(sg[bn_], np.float32)

    fw = np.asarray(params['final_w'], np.float32)
    entries = []
    for lvl in range(3):                               # depthwise taps, batch-tiled
        wl = np.asarray(params['local_w'][lvl], np.float32).reshape(c, 9)
        entries.append(('dw%d' % lvl, np.tile(wl, (n, 1))))        # (N*C, 9)
    entries += [
        ('kvq_w', kvq_w), ('kvq_b', kvq_b),
        ('wg', _pad2(sg['wg_w'], cip, cip)),
        ('out_w', _pad2(sg['out_w'], c, cip)),
        ('out_b', np.asarray(sg['out_b'], np.float32).reshape(c, 1)),
        ('phi', np.asarray(params['phi_w'], np.float32)),
        ('theta', np.asarray(params['theta_w'], np.float32)),
        ('adj', np.asarray(params['adj_w'], np.float32)),
        ('gwg', np.asarray(params['wg_w'], np.float32)),
        ('conv3', np.asarray(params['conv3_w'], np.float32)),
        ('fw1', fw[:, :c]), ('fw2', fw[:, c:]),
    ]
    wcol = max(a.shape[1] for _, a in entries)
    blocks, offs, row = [], {}, 0
    for name, a in entries:
        rows = -(-a.shape[0] // 8) * 8                 # 8-aligned block starts
        blocks.append(_pad2(a, rows, wcol))
        offs[name] = (row, a.shape)
        row += rows
    wslab = jnp.asarray(np.concatenate(blocks, axis=0))

    x = jnp.asarray(feat, jnp.float32).reshape(n, c, s)
    operands = (x, g_cats[0], g_cats[1], g_cats[2], ktn, wslab)

    # VMEM budget from actual buffer sizes (review: don't hardcode 32 MiB;
    # v7x physical VMEM is 64 MiB — current footprint is < 1 MiB).
    out_bytes = n * c * s * 4
    io_bytes = out_bytes + sum(int(np.prod(a.shape)) * a.dtype.itemsize
                               for a in operands)
    vmem_limit = int(min(64 * 1024 * 1024, 4 * io_bytes + 4 * 1024 * 1024))

    # -------------------------------- kernel -------------------------------- #
    def kernel(x_ref, g1_ref, g2_ref, g3_ref, ktn_ref, w_ref, o_ref):
        f32 = jnp.float32

        def dot(a, b):                     # a @ b
            return jnp.dot(a, b, preferred_element_type=f32)

        def dot_nt(a, b):                  # a @ b.T
            return lax.dot_general(a, b, (((1,), (1,)), ((), ())),
                                   preferred_element_type=f32)

        def dot_tn(a, b):                  # a.T @ b
            return lax.dot_general(a, b, (((0,), (0,)), ((), ())),
                                   preferred_element_type=f32)

        W = w_ref[...]                     # packed weight slab (one load)

        def get(name):
            r0, shp = offs[name]
            return W[r0:r0 + shp[0], 0:shp[1]]

        def bn_cols(v):
            # per-row (channel) stats over all N*L columns, single pass
            cnt = v.shape[1]
            mean = jnp.sum(v, axis=1, keepdims=True) / cnt
            var = jnp.maximum(jnp.sum(v * v, axis=1, keepdims=True) / cnt
                              - mean * mean, 0.0)
            return (v - mean) * lax.rsqrt(var + _EPS)

        def bn_groups(v):
            # v: (N*C, L) — per-channel stats over the N batch row-groups + lanes
            cnt = n * v.shape[1]
            s1 = sum(jnp.sum(v[i * c:(i + 1) * c], axis=1, keepdims=True)
                     for i in range(n))
            s2 = sum(jnp.sum(v[i * c:(i + 1) * c] * v[i * c:(i + 1) * c],
                             axis=1, keepdims=True) for i in range(n))
            mean = s1 / cnt
            var = jnp.maximum(s2 / cnt - mean * mean, 0.0)
            scale = lax.rsqrt(var + _EPS)
            shift = -mean * scale
            return (v * jnp.concatenate([scale] * n, axis=0)
                    + jnp.concatenate([shift] * n, axis=0))

        def bn_list(xs, axis):
            # per-item tiny matrices; stats over (items, axis)
            cnt = len(xs) * xs[0].shape[axis]
            s1 = sum(jnp.sum(v, axis=axis, keepdims=True) for v in xs)
            s2 = sum(jnp.sum(v * v, axis=axis, keepdims=True) for v in xs)
            mean = s1 / cnt
            var = jnp.maximum(s2 / cnt - mean * mean, 0.0)
            rstd = lax.rsqrt(var + _EPS)
            return [(v - mean) * rstd for v in xs]

        # input in both folded layouts (built from per-item loads, tiny)
        x_items = [x_ref[i] for i in range(n)]          # each (C, S)
        x_nc = jnp.concatenate(x_items, axis=0)         # (N*C, S)   local branch
        x_cn = jnp.concatenate(x_items, axis=1)         # (C, N*S)   1x1-conv branch

        # -------- local branch: depthwise stride-2 pyramid (batch-folded) ----
        cur = x_nc
        g_refs = (g1_ref, g2_ref, g3_ref)
        for lvl in range(3):
            g_cat = g_refs[lvl][...].astype(f32)        # bf16 -> f32 (exact 0/1)
            p = dot(cur, g_cat)                         # ONE matmul per level
            so = s_outs[lvl]
            dw = get('dw%d' % lvl)                      # (N*C, 9)
            acc = dw[:, 0:1] * p[:, 0:so]
            for t in range(1, 9):
                acc = acc + dw[:, t:t + 1] * p[:, t * so:(t + 1) * so]
            cur = bn_groups(acc)                        # BatchNorm2d

        # coarse map to channel-major layout: (C, N*Ssm)
        coarse = jnp.concatenate([cur[i * c:(i + 1) * c] for i in range(n)],
                                 axis=1)

        # ------------------------------ SpatialGCN ---------------------------
        kvq = dot(get('kvq_w'), coarse) + get('kvq_b')  # fused k|v|q (8-padded)
        nk = kvq[0:cip]
        nv = kvq[cip:2 * cip]
        nq = kvq[2 * cip:3 * cip]
        col_mask = lax.broadcasted_iota(jnp.int32, (cip, cip), 1) < ci
        av_items = []
        for i in range(n):
            lo, hi = i * ssm, (i + 1) * ssm
            a = dot_nt(nq[:, lo:hi], nv[:, lo:hi])      # q @ v^T   (cip, cip)
            a = jnp.where(col_mask, a, -1e30)           # mask padded v-columns
            a = a - jnp.max(a, axis=-1, keepdims=True)
            e = jnp.exp(a)
            a = e / jnp.sum(e, axis=-1, keepdims=True)  # exact softmax
            av_items.append(dot_tn(a, nk[:, lo:hi]))    # A^T @ k   (cip, Ssm)
        av = jnp.concatenate(av_items, axis=1)          # (cip, N*Ssm)
        avw = bn_cols(dot(get('wg'), av))               # conv_wg + bn_wg
        sg_out = bn_cols(dot(get('out_w'), avw) + get('out_b'))   # out conv+BN
        local_cn = jnp.maximum(sg_out + coarse, 0.0)    # relu(out + x)

        # ---- bilinear upsample (block-diag Kronecker matmul) + x*local + x --
        up = dot(local_cn, ktn_ref[...])                # (C, N*S)
        slf = x_cn * up + x_cn

        # ------------------------------ graph branch -------------------------
        x_sqz = bn_cols(dot(get('phi'), x_cn))          # phi + bn_phi   (2Cp, N*S)
        bmat = bn_cols(dot(get('theta'), x_cn))         # theta + bn_theta (Cp, N*S)
        adj_w = get('adj')
        gwg_w = get('gwg')
        z_idt = []
        for i in range(n):
            lo, hi = i * s, (i + 1) * s
            z_idt.append(dot_nt(x_sqz[:, lo:hi], bmat[:, lo:hi]))   # (2Cp, Cp)
        z = [dot_nt(zi, adj_w) for zi in z_idt]         # conv_adj (transposed frame)
        z = bn_list(z, axis=0)                          # bn_adj: per Cp over (N, 2Cp)
        z = [za + zi for za, zi in zip(z, z_idt)]       # z += z_idt
        z = bn_list([dot(gwg_w, zi) for zi in z], axis=1)   # conv_wg + bn_wg
        y = jnp.concatenate(
            [dot(zi, bmat[:, i * s:(i + 1) * s]) for i, zi in enumerate(z)],
            axis=1)                                     # (2Cp, N*S)
        y = bn_cols(dot(get('conv3'), y))               # conv3 + bn3
        g_out = jnp.maximum(x_cn + y, 0.0)

        # ------------------------------ fusion head --------------------------
        # concat never materialized: split final weight, accumulate two matmuls
        fin = bn_cols(dot(get('fw1'), slf) + dot(get('fw2'), g_out))
        for i in range(n):
            o_ref[i] = fin[:, i * s:(i + 1) * s].astype(o_ref.dtype)

    out = pl.pallas_call(
        kernel,
        out_shape=jax.ShapeDtypeStruct((n, c, s), jnp.float32),
        compiler_params=pltpu.CompilerParams(vmem_limit_bytes=vmem_limit),
    )(*operands)
    return out.reshape(n, c, h, w)


# --------------------------------- parameters -------------------------------- #

def init_params(key, planes, ratio=4):
    cp = planes // ratio
    ci = planes // 2
    ks = jax.random.split(key, 18)

    def w(k, shape, scale=0.1):
        return scale * jax.random.normal(k, shape, jnp.float32)

    return {
        'local_w': [w(ks[i], (planes, 1, 3, 3)) for i in range(3)],
        'sgcn': {
            'k_w': w(ks[3], (ci, planes)), 'k_b': w(ks[4], (ci,)),
            'v_w': w(ks[5], (ci, planes)), 'v_b': w(ks[6], (ci,)),
            'q_w': w(ks[7], (ci, planes)), 'q_b': w(ks[8], (ci,)),
            'wg_w': w(ks[9], (ci, ci)),
            'out_w': w(ks[10], (planes, ci)), 'out_b': w(ks[11], (planes,)),
        },
        'phi_w': w(ks[12], (2 * cp, planes)),
        'theta_w': w(ks[13], (cp, planes)),
        'adj_w': w(ks[14], (cp, cp)),
        'wg_w': w(ks[15], (2 * cp, 2 * cp)),
        'conv3_w': w(ks[16], (planes, 2 * cp)),
        'final_w': w(ks[17], (planes, 2 * planes)),
    }


# ----------------------------------- main ------------------------------------ #

if __name__ == "__main__":
    key = jax.random.PRNGKey(0)
    k_in, k_par = jax.random.split(key)

    N, C, H, W = 2, 8, 16, 16      # planes=8, ratio=4
    feat = jax.random.normal(k_in, (N, C, H, W), jnp.float32)
    params = init_params(k_par, C, ratio=4)

    out = dualgcn_forward(feat, params)
    jax.block_until_ready(out)
    assert out.shape == (N, C, H, W)
    assert bool(jnp.all(jnp.isfinite(out)))
    print("KERNEL_OK")
</pallas_src>

<mosaic_0001>
module attributes {stable_mosaic.version = 11 : i64} {
  func.func @kernel(%arg0: memref<2x8x256xf32, #tpu.memory_space<vmem>>, %arg1: memref<256x576xbf16, #tpu.memory_space<vmem>>, %arg2: memref<64x144xbf16, #tpu.memory_space<vmem>>, %arg3: memref<16x36xbf16, #tpu.memory_space<vmem>>, %arg4: memref<8x512xf32, #tpu.memory_space<vmem>>, %arg5: memref<176x9xf32, #tpu.memory_space<vmem>>, %arg6: memref<2x8x256xf32, #tpu.memory_space<vmem>>) attributes {dimension_semantics = [], scalar_prefetch = 0 : i64, scratch_operands = 0 : i64, tpu.core_type = #tpu.core_type<tc>} {
    %c0 = arith.constant 0 : index
    %c0_0 = arith.constant 0 : index
    %0 = vector.load %arg5[%c0, %c0_0] : memref<176x9xf32, #tpu.memory_space<vmem>>, vector<176x9xf32>
    %c0_1 = arith.constant 0 : index
    %c0_2 = arith.constant 0 : index
    %c0_3 = arith.constant 0 : index
    %1 = vector.load %arg0[%c0_1, %c0_2, %c0_3] : memref<2x8x256xf32, #tpu.memory_space<vmem>>, vector<1x8x256xf32>
    %2 = vector.shape_cast %1 : vector<1x8x256xf32> to vector<8x256xf32>
    %c1 = arith.constant 1 : index
    %c0_4 = arith.constant 0 : index
    %c0_5 = arith.constant 0 : index
    %3 = vector.load %arg0[%c1, %c0_4, %c0_5] : memref<2x8x256xf32, #tpu.memory_space<vmem>>, vector<1x8x256xf32>
    %4 = vector.shape_cast %3 : vector<1x8x256xf32> to vector<8x256xf32>
    %5 = tpu.concatenate %2, %4 in 0 : vector<8x256xf32>, vector<8x256xf32> -> vector<16x256xf32>
    %6 = tpu.concatenate %2, %4 in 1 : vector<8x256xf32>, vector<8x256xf32> -> vector<8x512xf32>
    %c0_6 = arith.constant 0 : index
    %c0_7 = arith.constant 0 : index
    %7 = vector.load %arg1[%c0_6, %c0_7] : memref<256x576xbf16, #tpu.memory_space<vmem>>, vector<256x576xbf16>
    %8 = arith.extf %7 : vector<256x576xbf16> to vector<256x576xf32>
    %cst = arith.constant dense<0.000000e+00> : vector<16x576xf32>
    %9 = tpu.matmul %5, %8, %cst {dimension_numbers = #tpu.dot_dimension_numbers<[1], [0], [0], [1], [0, 0, 1, 1], [], []>} : vector<16x256xf32>, vector<256x576xf32>, vector<16x576xf32> -> vector<16x576xf32>
    %10 = vector.extract_strided_slice %0 {offsets = [0, 0], sizes = [16, 9], strides = [1, 1]} : vector<176x9xf32> to vector<16x9xf32>
    %11 = vector.extract_strided_slice %10 {offsets = [0, 0], sizes = [16, 1], strides = [1, 1]} : vector<16x9xf32> to vector<16x1xf32>
    %12 = vector.extract_strided_slice %9 {offsets = [0, 0], sizes = [16, 64], strides = [1, 1]} : vector<16x576xf32> to vector<16x64xf32>
    %13 = vector.broadcast %11 : vector<16x1xf32> to vector<16x64xf32>
    %14 = arith.mulf %13, %12 : vector<16x64xf32>
    %15 = vector.extract_strided_slice %10 {offsets = [0, 1], sizes = [16, 1], strides = [1, 1]} : vector<16x9xf32> to vector<16x1xf32>
    %16 = vector.extract_strided_slice %9 {offsets = [0, 64], sizes = [16, 64], strides = [1, 1]} : vector<16x576xf32> to vector<16x64xf32>
    %17 = vector.broadcast %15 : vector<16x1xf32> to vector<16x64xf32>
    %18 = arith.mulf %17, %16 : vector<16x64xf32>
    %19 = arith.addf %14, %18 : vector<16x64xf32>
    %20 = vector.extract_strided_slice %10 {offsets = [0, 2], sizes = [16, 1], strides = [1, 1]} : vector<16x9xf32> to vector<16x1xf32>
    %21 = vector.extract_strided_slice %9 {offsets = [0, 128], sizes = [16, 64], strides = [1, 1]} : vector<16x576xf32> to vector<16x64xf32>
    %22 = vector.broadcast %20 : vector<16x1xf32> to vector<16x64xf32>
    %23 = arith.mulf %22, %21 : vector<16x64xf32>
    %24 = arith.addf %19, %23 : vector<16x64xf32>
    %25 = vector.extract_strided_slice %10 {offsets = [0, 3], sizes = [16, 1], strides = [1, 1]} : vector<16x9xf32> to vector<16x1xf32>
    %26 = vector.extract_strided_slice %9 {offsets = [0, 192], sizes = [16, 64], strides = [1, 1]} : vector<16x576xf32> to vector<16x64xf32>
    %27 = vector.broadcast %25 : vector<16x1xf32> to vector<16x64xf32>
    %28 = arith.mulf %27, %26 : vector<16x64xf32>
    %29 = arith.addf %24, %28 : vector<16x64xf32>
    %30 = vector.extract_strided_slice %10 {offsets = [0, 4], sizes = [16, 1], strides = [1, 1]} : vector<16x9xf32> to vector<16x1xf32>
    %31 = vector.extract_strided_slice %9 {offsets = [0, 256], sizes = [16, 64], strides = [1, 1]} : vector<16x576xf32> to vector<16x64xf32>
    %32 = vector.broadcast %30 : vector<16x1xf32> to vector<16x64xf32>
    %33 = arith.mulf %32, %31 : vector<16x64xf32>
    %34 = arith.addf %29, %33 : vector<16x64xf32>
    %35 = vector.extract_strided_slice %10 {offsets = [0, 5], sizes = [16, 1], strides = [1, 1]} : vector<16x9xf32> to vector<16x1xf32>
    %36 = vector.extract_strided_slice %9 {offsets = [0, 320], sizes = [16, 64], strides = [1, 1]} : vector<16x576xf32> to vector<16x64xf32>
    %37 = vector.broadcast %35 : vector<16x1xf32> to vector<16x64xf32>
    %38 = arith.mulf %37, %36 : vector<16x64xf32>
    %39 = arith.addf %34, %38 : vector<16x64xf32>
    %40 = vector.extract_strided_slice %10 {offsets = [0, 6], sizes = [16, 1], strides = [1, 1]} : vector<16x9xf32> to vector<16x1xf32>
    %41 = vector.extract_strided_slice %9 {offsets = [0, 384], sizes = [16, 64], strides = [1, 1]} : vector<16x576xf32> to vector<16x64xf32>
    %42 = vector.broadcast %40 : vector<16x1xf32> to vector<16x64xf32>
    %43 = arith.mulf %42, %41 : vector<16x64xf32>
    %44 = arith.addf %39, %43 : vector<16x64xf32>
    %45 = vector.extract_strided_slice %10 {offsets = [0, 7], sizes = [16, 1], strides = [1, 1]} : vector<16x9xf32> to vector<16x1xf32>
    %46 = vector.extract_strided_slice %9 {offsets = [0, 448], sizes = [16, 64], strides = [1, 1]} : vector<16x576xf32> to vector<16x64xf32>
    %47 = vector.broadcast %45 : vector<16x1xf32> to vector<16x64xf32>
    %48 = arith.mulf %47, %46 : vector<16x64xf32>
    %49 = arith.addf %44, %48 : vector<16x64xf32>
    %50 = vector.extract_strided_slice %10 {offsets = [0, 8], sizes = [16, 1], strides = [1, 1]} : vector<16x9xf32> to vector<16x1xf32>
    %51 = vector.extract_strided_slice %9 {offsets = [0, 512], sizes = [16, 64], strides = [1, 1]} : vector<16x576xf32> to vector<16x64xf32>
    %52 = vector.broadcast %50 : vector<16x1xf32> to vector<16x64xf32>
    %53 = arith.mulf %52, %51 : vector<16x64xf32>
    %54 = arith.addf %49, %53 : vector<16x64xf32>
    %55 = vector.extract_strided_slice %54 {offsets = [0, 0], sizes = [8, 64], strides = [1, 1]} : vector<16x64xf32> to vector<8x64xf32>
    %cst_8 = arith.constant dense<0.000000e+00> : vector<8xf32>
    %56 = vector.multi_reduction <add>, %55, %cst_8 [1] : vector<8x64xf32> to vector<8xf32>
    %57 = vector.shape_cast %56 : vector<8xf32> to vector<8x1xf32>
    %cst_9 = arith.constant 0.000000e+00 : f32
    %58 = vector.broadcast %cst_9 : f32 to vector<8x1xf32>
    %59 = arith.addf %58, %57 : vector<8x1xf32>
    %60 = vector.extract_strided_slice %54 {offsets = [8, 0], sizes = [8, 64], strides = [1, 1]} : vector<16x64xf32> to vector<8x64xf32>
    %cst_10 = arith.constant dense<0.000000e+00> : vector<8xf32>
    %61 = vector.multi_reduction <add>, %60, %cst_10 [1] : vector<8x64xf32> to vector<8xf32>
    %62 = vector.shape_cast %61 : vector<8xf32> to vector<8x1xf32>
    %63 = arith.addf %59, %62 : vector<8x1xf32>
    %64 = vector.extract_strided_slice %54 {offsets = [0, 0], sizes = [8, 64], strides = [1, 1]} : vector<16x64xf32> to vector<8x64xf32>
    %65 = vector.extract_strided_slice %54 {offsets = [0, 0], sizes = [8, 64], strides = [1, 1]} : vector<16x64xf32> to vector<8x64xf32>
    %66 = arith.mulf %64, %65 : vector<8x64xf32>
    %cst_11 = arith.constant dense<0.000000e+00> : vector<8xf32>
    %67 = vector.multi_reduction <add>, %66, %cst_11 [1] : vector<8x64xf32> to vector<8xf32>
    %68 = vector.shape_cast %67 : vector<8xf32> to vector<8x1xf32>
    %cst_12 = arith.constant 0.000000e+00 : f32
    %69 = vector.broadcast %cst_12 : f32 to vector<8x1xf32>
    %70 = arith.addf %69, %68 : vector<8x1xf32>
    %71 = vector.extract_strided_slice %54 {offsets = [8, 0], sizes = [8, 64], strides = [1, 1]} : vector<16x64xf32> to vector<8x64xf32>
    %72 = vector.extract_strided_slice %54 {offsets = [8, 0], sizes = [8, 64], strides = [1, 1]} : vector<16x64xf32> to vector<8x64xf32>
    %73 = arith.mulf %71, %72 : vector<8x64xf32>
    %cst_13 = arith.constant dense<0.000000e+00> : vector<8xf32>
    %74 = vector.multi_reduction <add>, %73, %cst_13 [1] : vector<8x64xf32> to vector<8xf32>
    %75 = vector.shape_cast %74 : vector<8xf32> to vector<8x1xf32>
    %76 = arith.addf %70, %75 : vector<8x1xf32>
    %cst_14 = arith.constant 1.280000e+02 : f32
    %77 = vector.broadcast %cst_14 : f32 to vector<8x1xf32>
    %78 = arith.divf %63, %77 : vector<8x1xf32>
    %cst_15 = arith.constant 1.280000e+02 : f32
    %79 = vector.broadcast %cst_15 : f32 to vector<8x1xf32>
    %80 = arith.divf %76, %79 : vector<8x1xf32>
    %81 = arith.mulf %78, %78 : vector<8x1xf32>
    %82 = arith.subf %80, %81 : vector<8x1xf32>
    %cst_16 = arith.constant 0.000000e+00 : f32
    %83 = vector.broadcast %cst_16 : f32 to vector<8x1xf32>
    %84 = arith.maximumf %82, %83 : vector<8x1xf32>
    %cst_17 = arith.constant 9.99999974E-6 : f32
    %85 = vector.broadcast %cst_17 : f32 to vector<8x1xf32>
    %86 = arith.addf %84, %85 : vector<8x1xf32>
    %87 = math.rsqrt %86 : vector<8x1xf32>
    %cst_18 = arith.constant 0.000000e+00 : f32
    %88 = vector.broadcast %cst_18 : f32 to vector<8x1xf32>
    %89 = arith.subf %88, %78 : vector<8x1xf32>
    %90 = arith.mulf %89, %87 : vector<8x1xf32>
    %91 = tpu.concatenate %87, %87 in 0 : vector<8x1xf32>, vector<8x1xf32> -> vector<16x1xf32>
    %92 = vector.broadcast %91 : vector<16x1xf32> to vector<16x64xf32>
    %93 = arith.mulf %54, %92 : vector<16x64xf32>
    %94 = tpu.concatenate %90, %90 in 0 : vector<8x1xf32>, vector<8x1xf32> -> vector<16x1xf32>
    %95 = vector.broadcast %94 : vector<16x1xf32> to vector<16x64xf32>
    %96 = arith.addf %93, %95 : vector<16x64xf32>
    %c0_19 = arith.constant 0 : index
    %c0_20 = arith.constant 0 : index
    %97 = vector.load %arg2[%c0_19, %c0_20] : memref<64x144xbf16, #tpu.memory_space<vmem>>, vector<64x144xbf16>
    %98 = arith.extf %97 : vector<64x144xbf16> to vector<64x144xf32>
    %cst_21 = arith.constant dense<0.000000e+00> : vector<16x144xf32>
    %99 = tpu.matmul %96, %98, %cst_21 {dimension_numbers = #tpu.dot_dimension_numbers<[1], [0], [0], [1], [0, 0, 1, 1], [], []>} : vector<16x64xf32>, vector<64x144xf32>, vector<16x144xf32> -> vector<16x144xf32>
    %100 = vector.extract_strided_slice %0 {offsets = [16, 0], sizes = [16, 9], strides = [1, 1]} : vector<176x9xf32> to vector<16x9xf32>
    %101 = vector.extract_strided_slice %100 {offsets = [0, 0], sizes = [16, 1], strides = [1, 1]} : vector<16x9xf32> to vector<16x1xf32>
    %102 = vector.extract_strided_slice %99 {offsets = [0, 0], sizes = [16, 16], strides = [1, 1]} : vector<16x144xf32> to vector<16x16xf32>
    %103 = vector.broadcast %101 : vector<16x1xf32> to vector<16x16xf32>
    %104 = arith.mulf %103, %102 : vector<16x16xf32>
    %105 = vector.extract_strided_slice %100 {offsets = [0, 1], sizes = [16, 1], strides = [1, 1]} : vector<16x9xf32> to vector<16x1xf32>
    %106 = vector.extract_strided_slice %99 {offsets = [0, 16], sizes = [16, 16], strides = [1, 1]} : vector<16x144xf32> to vector<16x16xf32>
    %107 = vector.broadcast %105 : vector<16x1xf32> to vector<16x16xf32>
    %108 = arith.mulf %107, %106 : vector<16x16xf32>
    %109 = arith.addf %104, %108 : vector<16x16xf32>
    %110 = vector.extract_strided_slice %100 {offsets = [0, 2], sizes = [16, 1], strides = [1, 1]} : vector<16x9xf32> to vector<16x1xf32>
    %111 = vector.extract_strided_slice %99 {offsets = [0, 32], sizes = [16, 16], strides = [1, 1]} : vector<16x144xf32> to vector<16x16xf32>
    %112 = vector.broadcast %110 : vector<16x1xf32> to vector<16x16xf32>
    %113 = arith.mulf %112, %111 : vector<16x16xf32>
    %114 = arith.addf %109, %113 : vector<16x16xf32>
    %115 = vector.extract_strided_slice %100 {offsets = [0, 3], sizes = [16, 1], strides = [1, 1]} : vector<16x9xf32> to vector<16x1xf32>
    %116 = vector.extract_strided_slice %99 {offsets = [0, 48], sizes = [16, 16], strides = [1, 1]} : vector<16x144xf32> to vector<16x16xf32>
    %117 = vector.broadcast %115 : vector<16x1xf32> to vector<16x16xf32>
    %118 = arith.mulf %117, %116 : vector<16x16xf32>
    %119 = arith.addf %114, %118 : vector<16x16xf32>
    %120 = vector.extract_strided_slice %100 {offsets = [0, 4], sizes = [16, 1], strides = [1, 1]} : vector<16x9xf32> to vector<16x1xf32>
    %121 = vector.extract_strided_slice %99 {offsets = [0, 64], sizes = [16, 16], strides = [1, 1]} : vector<16x144xf32> to vector<16x16xf32>
    %122 = vector.broadcast %120 : vector<16x1xf32> to vector<16x16xf32>
    %123 = arith.mulf %122, %121 : vector<16x16xf32>
    %124 = arith.addf %119, %123 : vector<16x16xf32>
    %125 = vector.extract_strided_slice %100 {offsets = [0, 5], sizes = [16, 1], strides = [1, 1]} : vector<16x9xf32> to vector<16x1xf32>
    %126 = vector.extract_strided_slice %99 {offsets = [0, 80], sizes = [16, 16], strides = [1, 1]} : vector<16x144xf32> to vector<16x16xf32>
    %127 = vector.broadcast %125 : vector<16x1xf32> to vector<16x16xf32>
    %128 = arith.mulf %127, %126 : vector<16x16xf32>
    %129 = arith.addf %124, %128 : vector<16x16xf32>
    %130 = vector.extract_strided_slice %100 {offsets = [0, 6], sizes = [16, 1], strides = [1, 1]} : vector<16x9xf32> to vector<16x1xf32>
    %131 = vector.extract_strided_slice %99 {offsets = [0, 96], sizes = [16, 16], strides = [1, 1]} : vector<16x144xf32> to vector<16x16xf32>
    %132 = vector.broadcast %130 : vector<16x1xf32> to vector<16x16xf32>
    %133 = arith.mulf %132, %131 : vector<16x16xf32>
    %134 = arith.addf %129, %133 : vector<16x16xf32>
    %135 = vector.extract_strided_slice %100 {offsets = [0, 7], sizes = [16, 1], strides = [1, 1]} : vector<16x9xf32> to vector<16x1xf32>
    %136 = vector.extract_strided_slice %99 {offsets = [0, 112], sizes = [16, 16], strides = [1, 1]} : vector<16x144xf32> to vector<16x16xf32>
    %137 = vector.broadcast %135 : vector<16x1xf32> to vector<16x16xf32>
    %138 = arith.mulf %137, %136 : vector<16x16xf32>
    %139 = arith.addf %134, %138 : vector<16x16xf32>
    %140 = vector.extract_strided_slice %100 {offsets = [0, 8], sizes = [16, 1], strides = [1, 1]} : vector<16x9xf32> to vector<16x1xf32>
    %141 = vector.extract_strided_slice %99 {offsets = [0, 128], sizes = [16, 16], strides = [1, 1]} : vector<16x144xf32> to vector<16x16xf32>
    %142 = vector.broadcast %140 : vector<16x1xf32> to vector<16x16xf32>
    %143 = arith.mulf %142, %141 : vector<16x16xf32>
    %144 = arith.addf %139, %143 : vector<16x16xf32>
    %145 = vector.extract_strided_slice %144 {offsets = [0, 0], sizes = [8, 16], strides = [1, 1]} : vector<16x16xf32> to vector<8x16xf32>
    %cst_22 = arith.constant dense<0.000000e+00> : vector<8xf32>
    %146 = vector.multi_reduction <add>, %145, %cst_22 [1] : vector<8x16xf32> to vector<8xf32>
    %147 = vector.shape_cast %146 : vector<8xf32> to vector<8x1xf32>
    %cst_23 = arith.constant 0.000000e+00 : f32
    %148 = vector.broadcast %cst_23 : f32 to vector<8x1xf32>
    %149 = arith.addf %148, %147 : vector<8x1xf32>
    %150 = vector.extract_strided_slice %144 {offsets = [8, 0], sizes = [8, 16], strides = [1, 1]} : vector<16x16xf32> to vector<8x16xf32>
    %cst_24 = arith.constant dense<0.000000e+00> : vector<8xf32>
    %151 = vector.multi_reduction <add>, %150, %cst_24 [1] : vector<8x16xf32> to vector<8xf32>
    %152 = vector.shape_cast %151 : vector<8xf32> to vector<8x1xf32>
    %153 = arith.addf %149, %152 : vector<8x1xf32>
    %154 = vector.extract_strided_slice %144 {offsets = [0, 0], sizes = [8, 16], strides = [1, 1]} : vector<16x16xf32> to vector<8x16xf32>
    %155 = vector.extract_strided_slice %144 {offsets = [0, 0], sizes = [8, 16], strides = [1, 1]} : vector<16x16xf32> to vector<8x16xf32>
    %156 = arith.mulf %154, %155 : vector<8x16xf32>
    %cst_25 = arith.constant dense<0.000000e+00> : vector<8xf32>
    %157 = vector.multi_reduction <add>, %156, %cst_25 [1] : vector<8x16xf32> to vector<8xf32>
    %158 = vector.shape_cast %157 : vector<8xf32> to vector<8x1xf32>
    %cst_26 = arith.constant 0.000000e+00 : f32
    %159 = vector.broadcast %cst_26 : f32 to vector<8x1xf32>
    %160 = arith.addf %159, %158 : vector<8x1xf32>
    %161 = vector.extract_strided_slice %144 {offsets = [8, 0], sizes = [8, 16], strides = [1, 1]} : vector<16x16xf32> to vector<8x16xf32>
    %162 = vector.extract_strided_slice %144 {offsets = [8, 0], sizes = [8, 16], strides = [1, 1]} : vector<16x16xf32> to vector<8x16xf32>
    %163 = arith.mulf %161, %162 : vector<8x16xf32>
    %cst_27 = arith.constant dense<0.000000e+00> : vector<8xf32>
    %164 = vector.multi_reduction <add>, %163, %cst_27 [1] : vector<8x16xf32> to vector<8xf32>
    %165 = vector.shape_cast %164 : vector<8xf32> to vector<8x1xf32>
    %166 = arith.addf %160, %165 : vector<8x1xf32>
    %cst_28 = arith.constant 3.200000e+01 : f32
    %167 = vector.broadcast %cst_28 : f32 to vector<8x1xf32>
    %168 = arith.divf %153, %167 : vector<8x1xf32>
    %cst_29 = arith.constant 3.200000e+01 : f32
    %169 = vector.broadcast %cst_29 : f32 to vector<8x1xf32>
    %170 = arith.divf %166, %169 : vector<8x1xf32>
    %171 = arith.mulf %168, %168 : vector<8x1xf32>
    %172 = arith.subf %170, %171 : vector<8x1xf32>
    %cst_30 = arith.constant 0.000000e+00 : f32
    %173 = vector.broadcast %cst_30 : f32 to vector<8x1xf32>
    %174 = arith.maximumf %172, %173 : vector<8x1xf32>
    %cst_31 = arith.constant 9.99999974E-6 : f32
    %175 = vector.broadcast %cst_31 : f32 to vector<8x1xf32>
    %176 = arith.addf %174, %175 : vector<8x1xf32>
    %177 = math.rsqrt %176 : vector<8x1xf32>
    %cst_32 = arith.constant 0.000000e+00 : f32
    %178 = vector.broadcast %cst_32 : f32 to vector<8x1xf32>
    %179 = arith.subf %178, %168 : vector<8x1xf32>
    %180 = arith.mulf %179, %177 : vector<8x1xf32>
    %181 = tpu.concatenate %177, %177 in 0 : vector<8x1xf32>, vector<8x1xf32> -> vector<16x1xf32>
    %182 = vector.broadcast %181 : vector<16x1xf32> to vector<16x16xf32>
    %183 = arith.mulf %144, %182 : vector<16x16xf32>
    %184 = tpu.concatenate %180, %180 in 0 : vector<8x1xf32>, vector<8x1xf32> -> vector<16x1xf32>
    %185 = vector.broadcast %184 : vector<16x1xf32> to vector<16x16xf32>
    %186 = arith.addf %183, %185 : vector<16x16xf32>
    %c0_33 = arith.constant 0 : index
    %c0_34 = arith.constant 0 : index
    %187 = vector.load %arg3[%c0_33, %c0_34] : memref<16x36xbf16, #tpu.memory_space<vmem>>, vector<16x36xbf16>
    %188 = arith.extf %187 : vector<16x36xbf16> to vector<16x36xf32>
    %cst_35 = arith.constant dense<0.000000e+00> : vector<16x36xf32>
    %189 = tpu.matmul %186, %188, %cst_35 {dimension_numbers = #tpu.dot_dimension_numbers<[1], [0], [0], [1], [0, 0, 1, 1], [], []>} : vector<16x16xf32>, vector<16x36xf32>, vector<16x36xf32> -> vector<16x36xf32>
    %190 = vector.extract_strided_slice %0 {offsets = [32, 0], sizes = [16, 9], strides = [1, 1]} : vector<176x9xf32> to vector<16x9xf32>
    %191 = vector.extract_strided_slice %190 {offsets = [0, 0], sizes = [16, 1], strides = [1, 1]} : vector<16x9xf32> to vector<16x1xf32>
    %192 = vector.extract_strided_slice %189 {offsets = [0, 0], sizes = [16, 4], strides = [1, 1]} : vector<16x36xf32> to vector<16x4xf32>
    %193 = vector.broadcast %191 : vector<16x1xf32> to vector<16x4xf32>
    %194 = arith.mulf %193, %192 : vector<16x4xf32>
    %195 = vector.extract_strided_slice %190 {offsets = [0, 1], sizes = [16, 1], strides = [1, 1]} : vector<16x9xf32> to vector<16x1xf32>
    %196 = vector.extract_strided_slice %189 {offsets = [0, 4], sizes = [16, 4], strides = [1, 1]} : vector<16x36xf32> to vector<16x4xf32>
    %197 = vector.broadcast %195 : vector<16x1xf32> to vector<16x4xf32>
    %198 = arith.mulf %197, %196 : vector<16x4xf32>
    %199 = arith.addf %194, %198 : vector<16x4xf32>
    %200 = vector.extract_strided_slice %190 {offsets = [0, 2], sizes = [16, 1], strides = [1, 1]} : vector<16x9xf32> to vector<16x1xf32>
    %201 = vector.extract_strided_slice %189 {offsets = [0, 8], sizes = [16, 4], strides = [1, 1]} : vector<16x36xf32> to vector<16x4xf32>
    %202 = vector.broadcast %200 : vector<16x1xf32> to vector<16x4xf32>
    %203 = arith.mulf %202, %201 : vector<16x4xf32>
    %204 = arith.addf %199, %203 : vector<16x4xf32>
    %205 = vector.extract_strided_slice %190 {offsets = [0, 3], sizes = [16, 1], strides = [1, 1]} : vector<16x9xf32> to vector<16x1xf32>
    %206 = vector.extract_strided_slice %189 {offsets = [0, 12], sizes = [16, 4], strides = [1, 1]} : vector<16x36xf32> to vector<16x4xf32>
    %207 = vector.broadcast %205 : vector<16x1xf32> to vector<16x4xf32>
    %208 = arith.mulf %207, %206 : vector<16x4xf32>
    %209 = arith.addf %204, %208 : vector<16x4xf32>
    %210 = vector.extract_strided_slice %190 {offsets = [0, 4], sizes = [16, 1], strides = [1, 1]} : vector<16x9xf32> to vector<16x1xf32>
    %211 = vector.extract_strided_slice %189 {offsets = [0, 16], sizes = [16, 4], strides = [1, 1]} : vector<16x36xf32> to vector<16x4xf32>
    %212 = vector.broadcast %210 : vector<16x1xf32> to vector<16x4xf32>
    %213 = arith.mulf %212, %211 : vector<16x4xf32>
    %214 = arith.addf %209, %213 : vector<16x4xf32>
    %215 = vector.extract_strided_slice %190 {offsets = [0, 5], sizes = [16, 1], strides = [1, 1]} : vector<16x9xf32> to vector<16x1xf32>
    %216 = vector.extract_strided_slice %189 {offsets = [0, 20], sizes = [16, 4], strides = [1, 1]} : vector<16x36xf32> to vector<16x4xf32>
    %217 = vector.broadcast %215 : vector<16x1xf32> to vector<16x4xf32>
    %218 = arith.mulf %217, %216 : vector<16x4xf32>
    %219 = arith.addf %214, %218 : vector<16x4xf32>
    %220 = vector.extract_strided_slice %190 {offsets = [0, 6], sizes = [16, 1], strides = [1, 1]} : vector<16x9xf32> to vector<16x1xf32>
    %221 = vector.extract_strided_slice %189 {offsets = [0, 24], sizes = [16, 4], strides = [1, 1]} : vector<16x36xf32> to vector<16x4xf32>
    %222 = vector.broadcast %220 : vector<16x1xf32> to vector<16x4xf32>
    %223 = arith.mulf %222, %221 : vector<16x4xf32>
    %224 = arith.addf %219, %223 : vector<16x4xf32>
    %225 = vector.extract_strided_slice %190 {offsets = [0, 7], sizes = [16, 1], strides = [1, 1]} : vector<16x9xf32> to vector<16x1xf32>
    %226 = vector.extract_strided_slice %189 {offsets = [0, 28], sizes = [16, 4], strides = [1, 1]} : vector<16x36xf32> to vector<16x4xf32>
    %227 = vector.broadcast %225 : vector<16x1xf32> to vector<16x4xf32>
    %228 = arith.mulf %227, %226 : vector<16x4xf32>
    %229 = arith.addf %224, %228 : vector<16x4xf32>
    %230 = vector.extract_strided_slice %190 {offsets = [0, 8], sizes = [16, 1], strides = [1, 1]} : vector<16x9xf32> to vector<16x1xf32>
    %231 = vector.extract_strided_slice %189 {offsets = [0, 32], sizes = [16, 4], strides = [1, 1]} : vector<16x36xf32> to vector<16x4xf32>
    %232 = vector.broadcast %230 : vector<16x1xf32> to vector<16x4xf32>
    %233 = arith.mulf %232, %231 : vector<16x4xf32>
    %234 = arith.addf %229, %233 : vector<16x4xf32>
    %235 = vector.extract_strided_slice %234 {offsets = [0, 0], sizes = [8, 4], strides = [1, 1]} : vector<16x4xf32> to vector<8x4xf32>
    %cst_36 = arith.constant dense<0.000000e+00> : vector<8xf32>
    %236 = vector.multi_reduction <add>, %235, %cst_36 [1] : vector<8x4xf32> to vector<8xf32>
    %237 = vector.shape_cast %236 : vector<8xf32> to vector<8x1xf32>
    %cst_37 = arith.constant 0.000000e+00 : f32
    %238 = vector.broadcast %cst_37 : f32 to vector<8x1xf32>
    %239 = arith.addf %238, %237 : vector<8x1xf32>
    %240 = vector.extract_strided_slice %234 {offsets = [8, 0], sizes = [8, 4], strides = [1, 1]} : vector<16x4xf32> to vector<8x4xf32>
    %cst_38 = arith.constant dense<0.000000e+00> : vector<8xf32>
    %241 = vector.multi_reduction <add>, %240, %cst_38 [1] : vector<8x4xf32> to vector<8xf32>
    %242 = vector.shape_cast %241 : vector<8xf32> to vector<8x1xf32>
    %243 = arith.addf %239, %242 : vector<8x1xf32>
    %244 = vector.extract_strided_slice %234 {offsets = [0, 0], sizes = [8, 4], strides = [1, 1]} : vector<16x4xf32> to vector<8x4xf32>
    %245 = vector.extract_strided_slice %234 {offsets = [0, 0], sizes = [8, 4], strides = [1, 1]} : vector<16x4xf32> to vector<8x4xf32>
    %246 = arith.mulf %244, %245 : vector<8x4xf32>
    %cst_39 = arith.constant dense<0.000000e+00> : vector<8xf32>
    %247 = vector.multi_reduction <add>, %246, %cst_39 [1] : vector<8x4xf32> to vector<8xf32>
    %248 = vector.shape_cast %247 : vector<8xf32> to vector<8x1xf32>
    %cst_40 = arith.constant 0.000000e+00 : f32
    %249 = vector.broadcast %cst_40 : f32 to vector<8x1xf32>
    %250 = arith.addf %249, %248 : vector<8x1xf32>
    %251 = vector.extract_strided_slice %234 {offsets = [8, 0], sizes = [8, 4], strides = [1, 1]} : vector<16x4xf32> to vector<8x4xf32>
    %252 = vector.extract_strided_slice %234 {offsets = [8, 0], sizes = [8, 4], strides = [1, 1]} : vector<16x4xf32> to vector<8x4xf32>
    %253 = arith.mulf %251, %252 : vector<8x4xf32>
    %cst_41 = arith.constant dense<0.000000e+00> : vector<8xf32>
    %254 = vector.multi_reduction <add>, %253, %cst_41 [1] : vector<8x4xf32> to vector<8xf32>
    %255 = vector.shape_cast %254 : vector<8xf32> to vector<8x1xf32>
    %256 = arith.addf %250, %255 : vector<8x1xf32>
    %cst_42 = arith.constant 8.000000e+00 : f32
    %257 = vector.broadcast %cst_42 : f32 to vector<8x1xf32>
    %258 = arith.divf %243, %257 : vector<8x1xf32>
    %cst_43 = arith.constant 8.000000e+00 : f32
    %259 = vector.broadcast %cst_43 : f32 to vector<8x1xf32>
    %260 = arith.divf %256, %259 : vector<8x1xf32>
    %261 = arith.mulf %258, %258 : vector<8x1xf32>
    %262 = arith.subf %260, %261 : vector<8x1xf32>
    %cst_44 = arith.constant 0.000000e+00 : f32
    %263 = vector.broadcast %cst_44 : f32 to vector<8x1xf32>
    %264 = arith.maximumf %262, %263 : vector<8x1xf32>
    %cst_45 = arith.constant 9.99999974E-6 : f32
    %265 = vector.broadcast %cst_45 : f32 to vector<8x1xf32>
    %266 = arith.addf %264, %265 : vector<8x1xf32>
    %267 = math.rsqrt %266 : vector<8x1xf32>
    %cst_46 = arith.constant 0.000000e+00 : f32
    %268 = vector.broadcast %cst_46 : f32 to vector<8x1xf32>
    %269 = arith.subf %268, %258 : vector<8x1xf32>
    %270 = arith.mulf %269, %267 : vector<8x1xf32>
    %271 = tpu.concatenate %267, %267 in 0 : vector<8x1xf32>, vector<8x1xf32> -> vector<16x1xf32>
    %272 = vector.broadcast %271 : vector<16x1xf32> to vector<16x4xf32>
    %273 = arith.mulf %234, %272 : vector<16x4xf32>
    %274 = tpu.concatenate %270, %270 in 0 : vector<8x1xf32>, vector<8x1xf32> -> vector<16x1xf32>
    %275 = vector.broadcast %274 : vector<16x1xf32> to vector<16x4xf32>
    %276 = arith.addf %273, %275 : vector<16x4xf32>
    %277 = vector.extract_strided_slice %276 {offsets = [0, 0], sizes = [8, 4], strides = [1, 1]} : vector<16x4xf32> to vector<8x4xf32>
    %278 = vector.extract_strided_slice %276 {offsets = [8, 0], sizes = [8, 4], strides = [1, 1]} : vector<16x4xf32> to vector<8x4xf32>
    %279 = tpu.concatenate %277, %278 in 1 : vector<8x4xf32>, vector<8x4xf32> -> vector<8x8xf32>
    %280 = vector.extract_strided_slice %0 {offsets = [48, 0], sizes = [24, 8], strides = [1, 1]} : vector<176x9xf32> to vector<24x8xf32>
    %cst_47 = arith.constant dense<0.000000e+00> : vector<24x8xf32>
    %281 = tpu.matmul %280, %279, %cst_47 {dimension_numbers = #tpu.dot_dimension_numbers<[1], [0], [0], [1], [0, 0, 1, 1], [], []>} : vector<24x8xf32>, vector<8x8xf32>, vector<24x8xf32> -> vector<24x8xf32>
    %282 = vector.extract_strided_slice %0 {offsets = [72, 0], sizes = [24, 1], strides = [1, 1]} : vector<176x9xf32> to vector<24x1xf32>
    %283 = vector.broadcast %282 : vector<24x1xf32> to vector<24x8xf32>
    %284 = arith.addf %281, %283 : vector<24x8xf32>
    %285 = vector.extract_strided_slice %284 {offsets = [0, 0], sizes = [8, 8], strides = [1, 1]} : vector<24x8xf32> to vector<8x8xf32>
    %286 = vector.extract_strided_slice %284 {offsets = [8, 0], sizes = [8, 8], strides = [1, 1]} : vector<24x8xf32> to vector<8x8xf32>
    %287 = vector.extract_strided_slice %284 {offsets = [16, 0], sizes = [8, 8], strides = [1, 1]} : vector<24x8xf32> to vector<8x8xf32>
    %288 = tpu.iota {dimensions = array<i32: 1>} : vector<8x8xi32>
    %c4_i32 = arith.constant 4 : i32
    %289 = vector.broadcast %c4_i32 : i32 to vector<8x8xi32>
    %290 = arith.cmpi slt, %288, %289 : vector<8x8xi32>
    %291 = vector.extract_strided_slice %287 {offsets = [0, 0], sizes = [8, 4], strides = [1, 1]} : vector<8x8xf32> to vector<8x4xf32>
    %292 = vector.extract_strided_slice %286 {offsets = [0, 0], sizes = [8, 4], strides = [1, 1]} : vector<8x8xf32> to vector<8x4xf32>
    %cst_48 = arith.constant dense<0.000000e+00> : vector<8x8xf32>
    %293 = tpu.matmul %291, %292, %cst_48 {dimension_numbers = #tpu.dot_dimension_numbers<[1], [1], [0], [0], [0, 0, 1, 0], [], []>} : vector<8x4xf32>, vector<8x4xf32>, vector<8x8xf32> -> vector<8x8xf32>
    %cst_49 = arith.constant -1.000000e+30 : f32
    %294 = vector.broadcast %cst_49 : f32 to vector<8x8xf32>
    %295 = arith.select %290, %293, %294 : vector<8x8xi1>, vector<8x8xf32>
    %cst_50 = arith.constant dense<0xFF800000> : vector<8xf32>
    %296 = vector.multi_reduction <maximumf>, %295, %cst_50 [1] : vector<8x8xf32> to vector<8xf32>
    %297 = vector.shape_cast %296 : vector<8xf32> to vector<8x1xf32>
    %298 = vector.broadcast %297 : vector<8x1xf32> to vector<8x8xf32>
    %299 = arith.subf %295, %298 : vector<8x8xf32>
    %300 = math.exp %299 : vector<8x8xf32>
    %cst_51 = arith.constant dense<0.000000e+00> : vector<8xf32>
    %301 = vector.multi_reduction <add>, %300, %cst_51 [1] : vector<8x8xf32> to vector<8xf32>
    %302 = vector.shape_cast %301 : vector<8xf32> to vector<8x1xf32>
    %303 = vector.broadcast %302 : vector<8x1xf32> to vector<8x8xf32>
    %304 = arith.divf %300, %303 : vector<8x8xf32>
    %305 = vector.extract_strided_slice %285 {offsets = [0, 0], sizes = [8, 4], strides = [1, 1]} : vector<8x8xf32> to vector<8x4xf32>
    %cst_52 = arith.constant dense<0.000000e+00> : vector<8x4xf32>
    %306 = tpu.matmul %304, %305, %cst_52 {dimension_numbers = #tpu.dot_dimension_numbers<[0], [0], [1], [1], [0, 1, 1, 1], [], []>} : vector<8x8xf32>, vector<8x4xf32>, vector<8x4xf32> -> vector<8x4xf32>
    %307 = vector.extract_strided_slice %287 {offsets = [0, 4], sizes = [8, 4], strides = [1, 1]} : vector<8x8xf32> to vector<8x4xf32>
    %308 = vector.extract_strided_slice %286 {offsets = [0, 4], sizes = [8, 4], strides = [1, 1]} : vector<8x8xf32> to vector<8x4xf32>
    %cst_53 = arith.constant dense<0.000000e+00> : vector<8x8xf32>
    %309 = tpu.matmul %307, %308, %cst_53 {dimension_numbers = #tpu.dot_dimension_numbers<[1], [1], [0], [0], [0, 0, 1, 0], [], []>} : vector<8x4xf32>, vector<8x4xf32>, vector<8x8xf32> -> vector<8x8xf32>
    %cst_54 = arith.constant -1.000000e+30 : f32
    %310 = vector.broadcast %cst_54 : f32 to vector<8x8xf32>
    %311 = arith.select %290, %309, %310 : vector<8x8xi1>, vector<8x8xf32>
    %cst_55 = arith.constant dense<0xFF800000> : vector<8xf32>
    %312 = vector.multi_reduction <maximumf>, %311, %cst_55 [1] : vector<8x8xf32> to vector<8xf32>
    %313 = vector.shape_cast %312 : vector<8xf32> to vector<8x1xf32>
    %314 = vector.broadcast %313 : vector<8x1xf32> to vector<8x8xf32>
    %315 = arith.subf %311, %314 : vector<8x8xf32>
    %316 = math.exp %315 : vector<8x8xf32>
    %cst_56 = arith.constant dense<0.000000e+00> : vector<8xf32>
    %317 = vector.multi_reduction <add>, %316, %cst_56 [1] : vector<8x8xf32> to vector<8xf32>
    %318 = vector.shape_cast %317 : vector<8xf32> to vector<8x1xf32>
    %319 = vector.broadcast %318 : vector<8x1xf32> to vector<8x8xf32>
    %320 = arith.divf %316, %319 : vector<8x8xf32>
    %321 = vector.extract_strided_slice %285 {offsets = [0, 4], sizes = [8, 4], strides = [1, 1]} : vector<8x8xf32> to vector<8x4xf32>
    %cst_57 = arith.constant dense<0.000000e+00> : vector<8x4xf32>
    %322 = tpu.matmul %320, %321, %cst_57 {dimension_numbers = #tpu.dot_dimension_numbers<[0], [0], [1], [1], [0, 1, 1, 1], [], []>} : vector<8x8xf32>, vector<8x4xf32>, vector<8x4xf32> -> vector<8x4xf32>
    %323 = tpu.concatenate %306, %322 in 1 : vector<8x4xf32>, vector<8x4xf32> -> vector<8x8xf32>
    %324 = vector.extract_strided_slice %0 {offsets = [96, 0], sizes = [8, 8], strides = [1, 1]} : vector<176x9xf32> to vector<8x8xf32>
    %cst_58 = arith.constant dense<0.000000e+00> : vector<8x8xf32>
    %325 = tpu.matmul %324, %323, %cst_58 {dimension_numbers = #tpu.dot_dimension_numbers<[1], [0], [0], [1], [0, 0, 1, 1], [], []>} : vector<8x8xf32>, vector<8x8xf32>, vector<8x8xf32> -> vector<8x8xf32>
    %cst_59 = arith.constant dense<0.000000e+00> : vector<8xf32>
    %326 = vector.multi_reduction <add>, %325, %cst_59 [1] : vector<8x8xf32> to vector<8xf32>
    %327 = vector.shape_cast %326 : vector<8xf32> to vector<8x1xf32>
    %cst_60 = arith.constant 8.000000e+00 : f32
    %328 = vector.broadcast %cst_60 : f32 to vector<8x1xf32>
    %329 = arith.divf %327, %328 : vector<8x1xf32>
    %330 = arith.mulf %325, %325 : vector<8x8xf32>
    %cst_61 = arith.constant dense<0.000000e+00> : vector<8xf32>
    %331 = vector.multi_reduction <add>, %330, %cst_61 [1] : vector<8x8xf32> to vector<8xf32>
    %332 = vector.shape_cast %331 : vector<8xf32> to vector<8x1xf32>
    %cst_62 = arith.constant 8.000000e+00 : f32
    %333 = vector.broadcast %cst_62 : f32 to vector<8x1xf32>
    %334 = arith.divf %332, %333 : vector<8x1xf32>
    %335 = arith.mulf %329, %329 : vector<8x1xf32>
    %336 = arith.subf %334, %335 : vector<8x1xf32>
    %cst_63 = arith.constant 0.000000e+00 : f32
    %337 = vector.broadcast %cst_63 : f32 to vector<8x1xf32>
    %338 = arith.maximumf %336, %337 : vector<8x1xf32>
    %339 = vector.broadcast %329 : vector<8x1xf32> to vector<8x8xf32>
    %340 = arith.subf %325, %339 : vector<8x8xf32>
    %cst_64 = arith.constant 9.99999974E-6 : f32
    %341 = vector.broadcast %cst_64 : f32 to vector<8x1xf32>
    %342 = arith.addf %338, %341 : vector<8x1xf32>
    %343 = math.rsqrt %342 : vector<8x1xf32>
    %344 = vector.broadcast %343 : vector<8x1xf32> to vector<8x8xf32>
    %345 = arith.mulf %340, %344 : vector<8x8xf32>
    %346 = vector.extract_strided_slice %0 {offsets = [104, 0], sizes = [8, 8], strides = [1, 1]} : vector<176x9xf32> to vector<8x8xf32>
    %cst_65 = arith.constant dense<0.000000e+00> : vector<8x8xf32>
    %347 = tpu.matmul %346, %345, %cst_65 {dimension_numbers = #tpu.dot_dimension_numbers<[1], [0], [0], [1], [0, 0, 1, 1], [], []>} : vector<8x8xf32>, vector<8x8xf32>, vector<8x8xf32> -> vector<8x8xf32>
    %348 = vector.extract_strided_slice %0 {offsets = [112, 0], sizes = [8, 1], strides = [1, 1]} : vector<176x9xf32> to vector<8x1xf32>
    %349 = vector.broadcast %348 : vector<8x1xf32> to vector<8x8xf32>
    %350 = arith.addf %347, %349 : vector<8x8xf32>
    %cst_66 = arith.constant dense<0.000000e+00> : vector<8xf32>
    %351 = vector.multi_reduction <add>, %350, %cst_66 [1] : vector<8x8xf32> to vector<8xf32>
    %352 = vector.shape_cast %351 : vector<8xf32> to vector<8x1xf32>
    %cst_67 = arith.constant 8.000000e+00 : f32
    %353 = vector.broadcast %cst_67 : f32 to vector<8x1xf32>
    %354 = arith.divf %352, %353 : vector<8x1xf32>
    %355 = arith.mulf %350, %350 : vector<8x8xf32>
    %cst_68 = arith.constant dense<0.000000e+00> : vector<8xf32>
    %356 = vector.multi_reduction <add>, %355, %cst_68 [1] : vector<8x8xf32> to vector<8xf32>
    %357 = vector.shape_cast %356 : vector<8xf32> to vector<8x1xf32>
    %cst_69 = arith.constant 8.000000e+00 : f32
    %358 = vector.broadcast %cst_69 : f32 to vector<8x1xf32>
    %359 = arith.divf %357, %358 : vector<8x1xf32>
    %360 = arith.mulf %354, %354 : vector<8x1xf32>
    %361 = arith.subf %359, %360 : vector<8x1xf32>
    %cst_70 = arith.constant 0.000000e+00 : f32
    %362 = vector.broadcast %cst_70 : f32 to vector<8x1xf32>
    %363 = arith.maximumf %361, %362 : vector<8x1xf32>
    %364 = vector.broadcast %354 : vector<8x1xf32> to vector<8x8xf32>
    %365 = arith.subf %350, %364 : vector<8x8xf32>
    %cst_71 = arith.constant 9.99999974E-6 : f32
    %366 = vector.broadcast %cst_71 : f32 to vector<8x1xf32>
    %367 = arith.addf %363, %366 : vector<8x1xf32>
    %368 = math.rsqrt %367 : vector<8x1xf32>
    %369 = vector.broadcast %368 : vector<8x1xf32> to vector<8x8xf32>
    %370 = arith.mulf %365, %369 : vector<8x8xf32>
    %371 = arith.addf %370, %279 : vector<8x8xf32>
    %cst_72 = arith.constant 0.000000e+00 : f32
    %372 = vector.broadcast %cst_72 : f32 to vector<8x8xf32>
    %373 = arith.maximumf %371, %372 : vector<8x8xf32>
    %c0_73 = arith.constant 0 : index
    %c0_74 = arith.constant 0 : index
    %374 = vector.load %arg4[%c0_73, %c0_74] : memref<8x512xf32, #tpu.memory_space<vmem>>, vector<8x512xf32>
    %cst_75 = arith.constant dense<0.000000e+00> : vector<8x512xf32>
    %375 = tpu.matmul %373, %374, %cst_75 {dimension_numbers = #tpu.dot_dimension_numbers<[1], [0], [0], [1], [0, 0, 1, 1], [], []>} : vector<8x8xf32>, vector<8x512xf32>, vector<8x512xf32> -> vector<8x512xf32>
    %376 = arith.mulf %6, %375 : vector<8x512xf32>
    %377 = arith.addf %376, %6 : vector<8x512xf32>
    %378 = vector.extract_strided_slice %0 {offsets = [120, 0], sizes = [4, 8], strides = [1, 1]} : vector<176x9xf32> to vector<4x8xf32>
    %cst_76 = arith.constant dense<0.000000e+00> : vector<4x512xf32>
    %379 = tpu.matmul %378, %6, %cst_76 {dimension_numbers = #tpu.dot_dimension_numbers<[1], [0], [0], [1], [0, 0, 1, 1], [], []>} : vector<4x8xf32>, vector<8x512xf32>, vector<4x512xf32> -> vector<4x512xf32>
    %cst_77 = arith.constant dense<0.000000e+00> : vector<4xf32>
    %380 = vector.multi_reduction <add>, %379, %cst_77 [1] : vector<4x512xf32> to vector<4xf32>
    %381 = vector.shape_cast %380 : vector<4xf32> to vector<4x1xf32>
    %cst_78 = arith.constant 5.120000e+02 : f32
    %382 = vector.broadcast %cst_78 : f32 to vector<4x1xf32>
    %383 = arith.divf %381, %382 : vector<4x1xf32>
    %384 = arith.mulf %379, %379 : vector<4x512xf32>
    %cst_79 = arith.constant dense<0.000000e+00> : vector<4xf32>
    %385 = vector.multi_reduction <add>, %384, %cst_79 [1] : vector<4x512xf32> to vector<4xf32>
    %386 = vector.shape_cast %385 : vector<4xf32> to vector<4x1xf32>
    %cst_80 = arith.constant 5.120000e+02 : f32
    %387 = vector.broadcast %cst_80 : f32 to vector<4x1xf32>
    %388 = arith.divf %386, %387 : vector<4x1xf32>
    %389 = arith.mulf %383, %383 : vector<4x1xf32>
    %390 = arith.subf %388, %389 : vector<4x1xf32>
    %cst_81 = arith.constant 0.000000e+00 : f32
    %391 = vector.broadcast %cst_81 : f32 to vector<4x1xf32>
    %392 = arith.maximumf %390, %391 : vector<4x1xf32>
    %393 = vector.broadcast %383 : vector<4x1xf32> to vector<4x512xf32>
    %394 = arith.subf %379, %393 : vector<4x512xf32>
    %cst_82 = arith.constant 9.99999974E-6 : f32
    %395 = vector.broadcast %cst_82 : f32 to vector<4x1xf32>
    %396 = arith.addf %392, %395 : vector<4x1xf32>
    %397 = math.rsqrt %396 : vector<4x1xf32>
    %398 = vector.broadcast %397 : vector<4x1xf32> to vector<4x512xf32>
    %399 = arith.mulf %394, %398 : vector<4x512xf32>
    %400 = vector.extract_strided_slice %0 {offsets = [128, 0], sizes = [2, 8], strides = [1, 1]} : vector<176x9xf32> to vector<2x8xf32>
    %cst_83 = arith.constant dense<0.000000e+00> : vector<2x512xf32>
    %401 = tpu.matmul %400, %6, %cst_83 {dimension_numbers = #tpu.dot_dimension_numbers<[1], [0], [0], [1], [0, 0, 1, 1], [], []>} : vector<2x8xf32>, vector<8x512xf32>, vector<2x512xf32> -> vector<2x512xf32>
    %cst_84 = arith.constant dense<0.000000e+00> : vector<2xf32>
    %402 = vector.multi_reduction <add>, %401, %cst_84 [1] : vector<2x512xf32> to vector<2xf32>
    %403 = vector.shape_cast %402 : vector<2xf32> to vector<2x1xf32>
    %cst_85 = arith.constant 5.120000e+02 : f32
    %404 = vector.broadcast %cst_85 : f32 to vector<2x1xf32>
    %405 = arith.divf %403, %404 : vector<2x1xf32>
    %406 = arith.mulf %401, %401 : vector<2x512xf32>
    %cst_86 = arith.constant dense<0.000000e+00> : vector<2xf32>
    %407 = vector.multi_reduction <add>, %406, %cst_86 [1] : vector<2x512xf32> to vector<2xf32>
    %408 = vector.shape_cast %407 : vector<2xf32> to vector<2x1xf32>
    %cst_87 = arith.constant 5.120000e+02 : f32
    %409 = vector.broadcast %cst_87 : f32 to vector<2x1xf32>
    %410 = arith.divf %408, %409 : vector<2x1xf32>
    %411 = arith.mulf %405, %405 : vector<2x1xf32>
    %412 = arith.subf %410, %411 : vector<2x1xf32>
    %cst_88 = arith.constant 0.000000e+00 : f32
    %413 = vector.broadcast %cst_88 : f32 to vector<2x1xf32>
    %414 = arith.maximumf %412, %413 : vector<2x1xf32>
    %415 = vector.broadcast %405 : vector<2x1xf32> to vector<2x512xf32>
    %416 = arith.subf %401, %415 : vector<2x512xf32>
    %cst_89 = arith.constant 9.99999974E-6 : f32
    %417 = vector.broadcast %cst_89 : f32 to vector<2x1xf32>
    %418 = arith.addf %414, %417 : vector<2x1xf32>
    %419 = math.rsqrt %418 : vector<2x1xf32>
    %420 = vector.broadcast %419 : vector<2x1xf32> to vector<2x512xf32>
    %421 = arith.mulf %416, %420 : vector<2x512xf32>
    %422 = vector.extract_strided_slice %0 {offsets = [136, 0], sizes = [2, 2], strides = [1, 1]} : vector<176x9xf32> to vector<2x2xf32>
    %423 = vector.extract_strided_slice %0 {offsets = [144, 0], sizes = [4, 4], strides = [1, 1]} : vector<176x9xf32> to vector<4x4xf32>
    %424 = vector.extract_strided_slice %399 {offsets = [0, 0], sizes = [4, 256], strides = [1, 1]} : vector<4x512xf32> to vector<4x256xf32>
    %425 = vector.extract_strided_slice %421 {offsets = [0, 0], sizes = [2, 256], strides = [1, 1]} : vector<2x512xf32> to vector<2x256xf32>
    %cst_90 = arith.constant dense<0.000000e+00> : vector<4x2xf32>
    %426 = tpu.matmul %424, %425, %cst_90 {dimension_numbers = #tpu.dot_dimension_numbers<[1], [1], [0], [0], [0, 0, 1, 0], [], []>} : vector<4x256xf32>, vector<2x256xf32>, vector<4x2xf32> -> vector<4x2xf32>
    %427 = vector.extract_strided_slice %399 {offsets = [0, 256], sizes = [4, 256], strides = [1, 1]} : vector<4x512xf32> to vector<4x256xf32>
    %428 = vector.extract_strided_slice %421 {offsets = [0, 256], sizes = [2, 256], strides = [1, 1]} : vector<2x512xf32> to vector<2x256xf32>
    %cst_91 = arith.constant dense<0.000000e+00> : vector<4x2xf32>
    %429 = tpu.matmul %427, %428, %cst_91 {dimension_numbers = #tpu.dot_dimension_numbers<[1], [1], [0], [0], [0, 0, 1, 0], [], []>} : vector<4x256xf32>, vector<2x256xf32>, vector<4x2xf32> -> vector<4x2xf32>
    %cst_92 = arith.constant dense<0.000000e+00> : vector<4x2xf32>
    %430 = tpu.matmul %426, %422, %cst_92 {dimension_numbers = #tpu.dot_dimension_numbers<[1], [1], [0], [0], [0, 0, 1, 0], [], []>} : vector<4x2xf32>, vector<2x2xf32>, vector<4x2xf32> -> vector<4x2xf32>
    %cst_93 = arith.constant dense<0.000000e+00> : vector<4x2xf32>
    %431 = tpu.matmul %429, %422, %cst_93 {dimension_numbers = #tpu.dot_dimension_numbers<[1], [1], [0], [0], [0, 0, 1, 0], [], []>} : vector<4x2xf32>, vector<2x2xf32>, vector<4x2xf32> -> vector<4x2xf32>
    %cst_94 = arith.constant dense<0.000000e+00> : vector<2xf32>
    %432 = vector.multi_reduction <add>, %430, %cst_94 [0] : vector<4x2xf32> to vector<2xf32>
    %433 = vector.shape_cast %432 : vector<2xf32> to vector<1x2xf32>
    %cst_95 = arith.constant 0.000000e+00 : f32
    %434 = vector.broadcast %cst_95 : f32 to vector<1x2xf32>
    %435 = arith.addf %434, %433 : vector<1x2xf32>
    %cst_96 = arith.constant dense<0.000000e+00> : vector<2xf32>
    %436 = vector.multi_reduction <add>, %431, %cst_96 [0] : vector<4x2xf32> to vector<2xf32>
    %437 = vector.shape_cast %436 : vector<2xf32> to vector<1x2xf32>
    %438 = arith.addf %435, %437 : vector<1x2xf32>
    %439 = arith.mulf %430, %430 : vector<4x2xf32>
    %cst_97 = arith.constant dense<0.000000e+00> : vector<2xf32>
    %440 = vector.multi_reduction <add>, %439, %cst_97 [0] : vector<4x2xf32> to vector<2xf32>
    %441 = vector.shape_cast %440 : vector<2xf32> to vector<1x2xf32>
    %cst_98 = arith.constant 0.000000e+00 : f32
    %442 = vector.broadcast %cst_98 : f32 to vector<1x2xf32>
    %443 = arith.addf %442, %441 : vector<1x2xf32>
    %444 = arith.mulf %431, %431 : vector<4x2xf32>
    %cst_99 = arith.constant dense<0.000000e+00> : vector<2xf32>
    %445 = vector.multi_reduction <add>, %444, %cst_99 [0] : vector<4x2xf32> to vector<2xf32>
    %446 = vector.shape_cast %445 : vector<2xf32> to vector<1x2xf32>
    %447 = arith.addf %443, %446 : vector<1x2xf32>
    %cst_100 = arith.constant 8.000000e+00 : f32
    %448 = vector.broadcast %cst_100 : f32 to vector<1x2xf32>
    %449 = arith.divf %438, %448 : vector<1x2xf32>
    %cst_101 = arith.constant 8.000000e+00 : f32
    %450 = vector.broadcast %cst_101 : f32 to vector<1x2xf32>
    %451 = arith.divf %447, %450 : vector<1x2xf32>
    %452 = arith.mulf %449, %449 : vector<1x2xf32>
    %453 = arith.subf %451, %452 : vector<1x2xf32>
    %cst_102 = arith.constant 0.000000e+00 : f32
    %454 = vector.broadcast %cst_102 : f32 to vector<1x2xf32>
    %455 = arith.maximumf %453, %454 : vector<1x2xf32>
    %cst_103 = arith.constant 9.99999974E-6 : f32
    %456 = vector.broadcast %cst_103 : f32 to vector<1x2xf32>
    %457 = arith.addf %455, %456 : vector<1x2xf32>
    %458 = math.rsqrt %457 : vector<1x2xf32>
    %459 = vector.broadcast %449 : vector<1x2xf32> to vector<4x2xf32>
    %460 = arith.subf %430, %459 : vector<4x2xf32>
    %461 = vector.broadcast %458 : vector<1x2xf32> to vector<4x2xf32>
    %462 = arith.mulf %460, %461 : vector<4x2xf32>
    %463 = vector.broadcast %449 : vector<1x2xf32> to vector<4x2xf32>
    %464 = arith.subf %431, %463 : vector<4x2xf32>
    %465 = vector.broadcast %458 : vector<1x2xf32> to vector<4x2xf32>
    %466 = arith.mulf %464, %465 : vector<4x2xf32>
    %467 = arith.addf %462, %426 : vector<4x2xf32>
    %468 = arith.addf %466, %429 : vector<4x2xf32>
    %cst_104 = arith.constant dense<0.000000e+00> : vector<4x2xf32>
    %469 = tpu.matmul %423, %467, %cst_104 {dimension_numbers = #tpu.dot_dimension_numbers<[1], [0], [0], [1], [0, 0, 1, 1], [], []>} : vector<4x4xf32>, vector<4x2xf32>, vector<4x2xf32> -> vector<4x2xf32>
    %cst_105 = arith.constant dense<0.000000e+00> : vector<4x2xf32>
    %470 = tpu.matmul %423, %468, %cst_105 {dimension_numbers = #tpu.dot_dimension_numbers<[1], [0], [0], [1], [0, 0, 1, 1], [], []>} : vector<4x4xf32>, vector<4x2xf32>, vector<4x2xf32> -> vector<4x2xf32>
    %cst_106 = arith.constant dense<0.000000e+00> : vector<4xf32>
    %471 = vector.multi_reduction <add>, %469, %cst_106 [1] : vector<4x2xf32> to vector<4xf32>
    %472 = vector.shape_cast %471 : vector<4xf32> to vector<4x1xf32>
    %cst_107 = arith.constant 0.000000e+00 : f32
    %473 = vector.broadcast %cst_107 : f32 to vector<4x1xf32>
    %474 = arith.addf %473, %472 : vector<4x1xf32>
    %cst_108 = arith.constant dense<0.000000e+00> : vector<4xf32>
    %475 = vector.multi_reduction <add>, %470, %cst_108 [1] : vector<4x2xf32> to vector<4xf32>
    %476 = vector.shape_cast %475 : vector<4xf32> to vector<4x1xf32>
    %477 = arith.addf %474, %476 : vector<4x1xf32>
    %478 = arith.mulf %469, %469 : vector<4x2xf32>
    %cst_109 = arith.constant dense<0.000000e+00> : vector<4xf32>
    %479 = vector.multi_reduction <add>, %478, %cst_109 [1] : vector<4x2xf32> to vector<4xf32>
    %480 = vector.shape_cast %479 : vector<4xf32> to vector<4x1xf32>
    %cst_110 = arith.constant 0.000000e+00 : f32
    %481 = vector.broadcast %cst_110 : f32 to vector<4x1xf32>
    %482 = arith.addf %481, %480 : vector<4x1xf32>
    %483 = arith.mulf %470, %470 : vector<4x2xf32>
    %cst_111 = arith.constant dense<0.000000e+00> : vector<4xf32>
    %484 = vector.multi_reduction <add>, %483, %cst_111 [1] : vector<4x2xf32> to vector<4xf32>
    %485 = vector.shape_cast %484 : vector<4xf32> to vector<4x1xf32>
    %486 = arith.addf %482, %485 : vector<4x1xf32>
    %cst_112 = arith.constant 4.000000e+00 : f32
    %487 = vector.broadcast %cst_112 : f32 to vector<4x1xf32>
    %488 = arith.divf %477, %487 : vector<4x1xf32>
    %cst_113 = arith.constant 4.000000e+00 : f32
    %489 = vector.broadcast %cst_113 : f32 to vector<4x1xf32>
    %490 = arith.divf %486, %489 : vector<4x1xf32>
    %491 = arith.mulf %488, %488 : vector<4x1xf32>
    %492 = arith.subf %490, %491 : vector<4x1xf32>
    %cst_114 = arith.constant 0.000000e+00 : f32
    %493 = vector.broadcast %cst_114 : f32 to vector<4x1xf32>
    %494 = arith.maximumf %492, %493 : vector<4x1xf32>
    %cst_115 = arith.constant 9.99999974E-6 : f32
    %495 = vector.broadcast %cst_115 : f32 to vector<4x1xf32>
    %496 = arith.addf %494, %495 : vector<4x1xf32>
    %497 = math.rsqrt %496 : vector<4x1xf32>
    %498 = vector.broadcast %488 : vector<4x1xf32> to vector<4x2xf32>
    %499 = arith.subf %469, %498 : vector<4x2xf32>
    %500 = vector.broadcast %497 : vector<4x1xf32> to vector<4x2xf32>
    %501 = arith.mulf %499, %500 : vector<4x2xf32>
    %502 = vector.broadcast %488 : vector<4x1xf32> to vector<4x2xf32>
    %503 = arith.subf %470, %502 : vector<4x2xf32>
    %504 = vector.broadcast %497 : vector<4x1xf32> to vector<4x2xf32>
    %505 = arith.mulf %503, %504 : vector<4x2xf32>
    %506 = vector.extract_strided_slice %421 {offsets = [0, 0], sizes = [2, 256], strides = [1, 1]} : vector<2x512xf32> to vector<2x256xf32>
    %cst_116 = arith.constant dense<0.000000e+00> : vector<4x256xf32>
    %507 = tpu.matmul %501, %506, %cst_116 {dimension_numbers = #tpu.dot_dimension_numbers<[1], [0], [0], [1], [0, 0, 1, 1], [], []>} : vector<4x2xf32>, vector<2x256xf32>, vector<4x256xf32> -> vector<4x256xf32>
    %508 = vector.extract_strided_slice %421 {offsets = [0, 256], sizes = [2, 256], strides = [1, 1]} : vector<2x512xf32> to vector<2x256xf32>
    %cst_117 = arith.constant dense<0.000000e+00> : vector<4x256xf32>
    %509 = tpu.matmul %505, %508, %cst_117 {dimension_numbers = #tpu.dot_dimension_numbers<[1], [0], [0], [1], [0, 0, 1, 1], [], []>} : vector<4x2xf32>, vector<2x256xf32>, vector<4x256xf32> -> vector<4x256xf32>
    %510 = tpu.concatenate %507, %509 in 1 : vector<4x256xf32>, vector<4x256xf32> -> vector<4x512xf32>
    %511 = vector.extract_strided_slice %0 {offsets = [152, 0], sizes = [8, 4], strides = [1, 1]} : vector<176x9xf32> to vector<8x4xf32>
    %cst_118 = arith.constant dense<0.000000e+00> : vector<8x512xf32>
    %512 = tpu.matmul %511, %510, %cst_118 {dimension_numbers = #tpu.dot_dimension_numbers<[1], [0], [0], [1], [0, 0, 1, 1], [], []>} : vector<8x4xf32>, vector<4x512xf32>, vector<8x512xf32> -> vector<8x512xf32>
    %cst_119 = arith.constant dense<0.000000e+00> : vector<8xf32>
    %513 = vector.multi_reduction <add>, %512, %cst_119 [1] : vector<8x512xf32> to vector<8xf32>
    %514 = vector.shape_cast %513 : vector<8xf32> to vector<8x1xf32>
    %cst_120 = arith.constant 5.120000e+02 : f32
    %515 = vector.broadcast %cst_120 : f32 to vector<8x1xf32>
    %516 = arith.divf %514, %515 : vector<8x1xf32>
    %517 = arith.mulf %512, %512 : vector<8x512xf32>
    %cst_121 = arith.constant dense<0.000000e+00> : vector<8xf32>
    %518 = vector.multi_reduction <add>, %517, %cst_121 [1] : vector<8x512xf32> to vector<8xf32>
    %519 = vector.shape_cast %518 : vector<8xf32> to vector<8x1xf32>
    %cst_122 = arith.constant 5.120000e+02 : f32
    %520 = vector.broadcast %cst_122 : f32 to vector<8x1xf32>
    %521 = arith.divf %519, %520 : vector<8x1xf32>
    %522 = arith.mulf %516, %516 : vector<8x1xf32>
    %523 = arith.subf %521, %522 : vector<8x1xf32>
    %cst_123 = arith.constant 0.000000e+00 : f32
    %524 = vector.broadcast %cst_123 : f32 to vector<8x1xf32>
    %525 = arith.maximumf %523, %524 : vector<8x1xf32>
    %526 = vector.broadcast %516 : vector<8x1xf32> to vector<8x512xf32>
    %527 = arith.subf %512, %526 : vector<8x512xf32>
    %cst_124 = arith.constant 9.99999974E-6 : f32
    %528 = vector.broadcast %cst_124 : f32 to vector<8x1xf32>
    %529 = arith.addf %525, %528 : vector<8x1xf32>
    %530 = math.rsqrt %529 : vector<8x1xf32>
    %531 = vector.broadcast %530 : vector<8x1xf32> to vector<8x512xf32>
    %532 = arith.mulf %527, %531 : vector<8x512xf32>
    %533 = arith.addf %6, %532 : vector<8x512xf32>
    %cst_125 = arith.constant 0.000000e+00 : f32
    %534 = vector.broadcast %cst_125 : f32 to vector<8x512xf32>
    %535 = arith.maximumf %533, %534 : vector<8x512xf32>
    %536 = vector.extract_strided_slice %0 {offsets = [160, 0], sizes = [8, 8], strides = [1, 1]} : vector<176x9xf32> to vector<8x8xf32>
    %cst_126 = arith.constant dense<0.000000e+00> : vector<8x512xf32>
    %537 = tpu.matmul %536, %377, %cst_126 {dimension_numbers = #tpu.dot_dimension_numbers<[1], [0], [0], [1], [0, 0, 1, 1], [], []>} : vector<8x8xf32>, vector<8x512xf32>, vector<8x512xf32> -> vector<8x512xf32>
    %538 = vector.extract_strided_slice %0 {offsets = [168, 0], sizes = [8, 8], strides = [1, 1]} : vector<176x9xf32> to vector<8x8xf32>
    %cst_127 = arith.constant dense<0.000000e+00> : vector<8x512xf32>
    %539 = tpu.matmul %538, %535, %cst_127 {dimension_numbers = #tpu.dot_dimension_numbers<[1], [0], [0], [1], [0, 0, 1, 1], [], []>} : vector<8x8xf32>, vector<8x512xf32>, vector<8x512xf32> -> vector<8x512xf32>
    %540 = arith.addf %537, %539 : vector<8x512xf32>
    %cst_128 = arith.constant dense<0.000000e+00> : vector<8xf32>
    %541 = vector.multi_reduction <add>, %540, %cst_128 [1] : vector<8x512xf32> to vector<8xf32>
    %542 = vector.shape_cast %541 : vector<8xf32> to vector<8x1xf32>
    %cst_129 = arith.constant 5.120000e+02 : f32
    %543 = vector.broadcast %cst_129 : f32 to vector<8x1xf32>
    %544 = arith.divf %542, %543 : vector<8x1xf32>
    %545 = arith.mulf %540, %540 : vector<8x512xf32>
    %cst_130 = arith.constant dense<0.000000e+00> : vector<8xf32>
    %546 = vector.multi_reduction <add>, %545, %cst_130 [1] : vector<8x512xf32> to vector<8xf32>
    %547 = vector.shape_cast %546 : vector<8xf32> to vector<8x1xf32>
    %cst_131 = arith.constant 5.120000e+02 : f32
    %548 = vector.broadcast %cst_131 : f32 to vector<8x1xf32>
    %549 = arith.divf %547, %548 : vector<8x1xf32>
    %550 = arith.mulf %544, %544 : vector<8x1xf32>
    %551 = arith.subf %549, %550 : vector<8x1xf32>
    %cst_132 = arith.constant 0.000000e+00 : f32
    %552 = vector.broadcast %cst_132 : f32 to vector<8x1xf32>
    %553 = arith.maximumf %551, %552 : vector<8x1xf32>
    %554 = vector.broadcast %544 : vector<8x1xf32> to vector<8x512xf32>
    %555 = arith.subf %540, %554 : vector<8x512xf32>
    %cst_133 = arith.constant 9.99999974E-6 : f32
    %556 = vector.broadcast %cst_133 : f32 to vector<8x1xf32>
    %557 = arith.addf %553, %556 : vector<8x1xf32>
    %558 = math.rsqrt %557 : vector<8x1xf32>
    %559 = vector.broadcast %558 : vector<8x1xf32> to vector<8x512xf32>
    %560 = arith.mulf %555, %559 : vector<8x512xf32>
    %561 = vector.extract_strided_slice %560 {offsets = [0, 0], sizes = [8, 256], strides = [1, 1]} : vector<8x512xf32> to vector<8x256xf32>
    %c0_134 = arith.constant 0 : index
    %c0_135 = arith.constant 0 : index
    %c0_136 = arith.constant 0 : index
    %562 = vector.load %arg6[%c0_134, %c0_135, %c0_136] : memref<2x8x256xf32, #tpu.memory_space<vmem>>, vector<1x8x256xf32>
    %563 = vector.shape_cast %562 : vector<1x8x256xf32> to vector<8x256xf32>
    %564 = vector.shape_cast %561 : vector<8x256xf32> to vector<1x8x256xf32>
    tpu.vector_store %arg6[%c0_134, %c0_135, %c0_136], %564 {strides = array<i32>} : memref<2x8x256xf32, #tpu.memory_space<vmem>>, vector<1x8x256xf32>,
    %565 = vector.extract_strided_slice %560 {offsets = [0, 256], sizes = [8, 256], strides = [1, 1]} : vector<8x512xf32> to vector<8x256xf32>
    %c1_137 = arith.constant 1 : index
    %c0_138 = arith.constant 0 : index
    %c0_139 = arith.constant 0 : index
    %566 = vector.load %arg6[%c1_137, %c0_138, %c0_139] : memref<2x8x256xf32, #tpu.memory_space<vmem>>, vector<1x8x256xf32>
    %567 = vector.shape_cast %566 : vector<1x8x256xf32> to vector<8x256xf32>
    %568 = vector.shape_cast %565 : vector<8x256xf32> to vector<1x8x256xf32>
    tpu.vector_store %arg6[%c1_137, %c0_138, %c0_139], %568 {strides = array<i32>} : memref<2x8x256xf32, #tpu.memory_space<vmem>>, vector<1x8x256xf32>,
    return
  }
}

</mosaic_0001>

<bundles_post_ra>
// kernel: tpu_custom_call.1
= control target key start
LH: loop header
LB: loop body
LE: loop exit
PB: predicated region body
PF: predicated region fallthrough
CT: control target
= control target key end

     0   :  { %v4473_v2 = vmov 3   ;;  %v4474_v3 = vmov 1   ;;  %v4475_v61 = vmov 5   ;;  %s5283_s0 = inlined_call_operand.vmem [shape: f32[2,8,256], index: 0, kind: input, shape index: {}]   ;;  %s5284_s1 = inlined_call_operand.vmem [shape: bf16[256,576], index: 1, kind: input, shape index: {}]   ;;  %s5285_s2 = inlined_call_operand.vmem [shape: bf16[64,144], index: 2, kind: input, shape index: {}]   ;;  %s5286_s3 = inlined_call_operand.vmem [shape: bf16[16,36], index: 3, kind: input, shape index: {}]   ;;  %s5287_s4 = inlined_call_operand.vmem [shape: f32[8,512], index: 4, kind: input, shape index: {}]   ;;  %s5288_s5 = inlined_call_operand.vmem [shape: f32[176,9], index: 5, kind: input, shape index: {}]   ;;  %s5289_s6 = inlined_call_operand.hbm [shape: f32[2,8,256], index: 6, kind: output, shape index: {}]  }
   0x1   :  { %v4291_v0 = vld [vmem:[%s5284_s1 + $0x4] ss:$20 sps:$4 sm:$0xff]   ;;  %v4293_v1 = vld [vmem:[%s5284_s1] ss:$20 sps:$4 sm:$0xff]   ;;  %4248 = vset.pattern.permute.xlu1 %v4473_v2  ;;  %4247 = vset.pattern.permute.xlu0 %v4474_v3  ;;  %v4296_v5 = vld [vmem:[%s5284_s1 + $0x28] ss:$20 sps:$4 sm:$0xff]  }
   0x2   :  { %3949 = vmatprep.subr.bf16.mxu0 %v4291_v0  ;;  %v4294_v4 = vld [vmem:[%s5284_s1 + $0x2c] ss:$20 sps:$4 sm:$0xff]   ;;  %v4297_v6 = vld [vmem:[%s5284_s1 + $0x54] ss:$20 sps:$4 sm:$0xff]   ;;  %v4299_v9 = vld [vmem:[%s5284_s1 + $0x50] ss:$20 sps:$4 sm:$0xff]  }
   0x3   :  { %3951 = vmatpush1.bf16.msra.mxu0 %v4293_v1  ;;  %v4302_v7 = vld [vmem:[%s5284_s1 + $0xc] ss:$20 sps:$4 sm:$0xff]   ;;  %v4305_v8 = vld [vmem:[%s5284_s1 + $0x8] ss:$20 sps:$4 sm:$0xff]   ;;  %v4311_v12 = vld [vmem:[%s5284_s1 + $0x30] ss:$20 sps:$4 sm:$0xff]  }
   0x4   :  { %3953 = vmatprep.subr.bf16.mxu0 %v4294_v4  ;;  %4013 = vmatprep.subr.bf16.mxu1 %v4302_v7  ;;  %v4300_v10 = vld [vmem:[%s5284_s1 + $0x7c] ss:$20 sps:$4 sm:$0xff]   ;;  %v4308_v11 = vld [vmem:[%s5284_s1 + $0x34] ss:$20 sps:$4 sm:$0xff]   ;;  %v4304_v13 = vld [vmem:[%s5284_s1 + $0x78] ss:$20 sps:$4 sm:$0xff]  }
   0x5   :  { %4015 = vmatpush1.bf16.msra.mxu1 %v4305_v8  ;;  %v4306_v14 = vld [vmem:[%s5284_s1 + $0xa4] ss:$20 sps:$4 sm:$0xff]   ;;  %v4314_v15 = vld [vmem:[%s5284_s1 + $0x5c] ss:$20 sps:$4 sm:$0xff]   ;;  %v4310_v18 = vld [vmem:[%s5284_s1 + $0xa0] ss:$20 sps:$4 sm:$0xff]  }
   0x6   :  { %4017 = vmatprep.subr.bf16.mxu1 %v4308_v11  ;;  %v4317_v16 = vld [vmem:[%s5284_s1 + $0x58] ss:$20 sps:$4 sm:$0xff]   ;;  %v4323_v20 = vld [vmem:[%s5284_s1 + $0x80] ss:$20 sps:$4 sm:$0xff]   ;;  %v4316_v22 = vld [vmem:[%s5284_s1 + $0xc8] ss:$20 sps:$4 sm:$0xff]  }
   0x7   :  { %3955 = vmatpush1.bf16.msra.mxu0 %v4296_v5  ;;  %v4320_v17 = vld [vmem:[%s5284_s1 + $0x84] ss:$20 sps:$4 sm:$0xff]   ;;  %v4312_v19 = vld [vmem:[%s5284_s1 + $0xcc] ss:$20 sps:$4 sm:$0xff]   ;;  %v4318_v23 = vld [vmem:[%s5284_s1 + $0xf4] ss:$20 sps:$4 sm:$0xff]  }
   0x8   :  { %3957 = vmatprep.subr.bf16.mxu0 %v4297_v6  ;;  %v4326_v21 = vld [vmem:[%s5284_s1 + $0xac] ss:$20 sps:$4 sm:$0xff]   ;;  %v4329_v24 = vld [vmem:[%s5284_s1 + $0xa8] ss:$20 sps:$4 sm:$0xff]   ;;  %v4322_v26 = vld [vmem:[%s5284_s1 + $0xf0] ss:$20 sps:$4 sm:$0xff]  }
   0x9   :  { %4019 = vmatpush1.bf16.msra.mxu1 %v4311_v12  ;;  %v4332_v25 = vld [vmem:[%s5284_s1 + $0xd4] ss:$20 sps:$4 sm:$0xff]   ;;  %v4324_v27 = vld [vmem:[%s5284_s1 + $0x11c] ss:$20 sps:$4 sm:$0xff]   ;;  %v4328_v30 = vld [vmem:[%s5284_s1 + $0x118] ss:$20 sps:$4 sm:$0xff]  }
   0xa   :  { %4021 = vmatprep.subr.bf16.mxu1 %v4314_v15  ;;  %v4335_v28 = vld [vmem:[%s5284_s1 + $0xd0] ss:$20 sps:$4 sm:$0xff]   ;;  %v4341_v32 = vld [vmem:[%s5284_s1 + $0xf8] ss:$20 sps:$4 sm:$0xff]   ;;  %v4334_v34 = vld [vmem:[%s5284_s1 + $0x140] ss:$20 sps:$4 sm:$0xff]  }
   0xb   :  { %3959 = vmatpush1.bf16.msra.mxu0 %v4299_v9  ;;  %v4338_v29 = vld [vmem:[%s5284_s1 + $0xfc] ss:$20 sps:$4 sm:$0xff]   ;;  %v4330_v31 = vld [vmem:[%s5284_s1 + $0x144] ss:$20 sps:$4 sm:$0xff]   ;;  %v4336_v35 = vld [vmem:[%s5284_s1 + $0x16c] ss:$20 sps:$4 sm:$0xff]  }
   0xc   :  { %3961 = vmatprep.subr.bf16.mxu0 %v4300_v10  ;;  %v4344_v33 = vld [vmem:[%s5284_s1 + $0x124] ss:$20 sps:$4 sm:$0xff]   ;;  %v4347_v36 = vld [vmem:[%s5284_s1 + $0x120] ss:$20 sps:$4 sm:$0xff]   ;;  %v4340_v38 = vld [vmem:[%s5284_s1 + $0x168] ss:$20 sps:$4 sm:$0xff]  }
   0xd   :  { %4023 = vmatpush1.bf16.msra.mxu1 %v4317_v16  ;;  %v4350_v37 = vld [vmem:[%s5284_s1 + $0x14c] ss:$20 sps:$4 sm:$0xff]   ;;  %v4342_v39 = vld [vmem:[%s5284_s1 + $0x194] ss:$20 sps:$4 sm:$0xff]   ;;  %v4346_v43 = vld [vmem:[%s5284_s1 + $0x190] ss:$20 sps:$4 sm:$0xff]  }
   0xe   :  { %4025 = vmatprep.subr.bf16.mxu1 %v4320_v17  ;;  %v4353_v40 = vld [vmem:[%s5284_s1 + $0x148] ss:$20 sps:$4 sm:$0xff]   ;;  %v4359_v45 = vld [vmem:[%s5284_s1 + $0x170] ss:$20 sps:$4 sm:$0xff]   ;;  %v4352_v47 = vld [vmem:[%s5284_s1 + $0x1b8] ss:$20 sps:$4 sm:$0xff]  }
   0xf   :  { %3963 = vmatpush1.bf16.msra.mxu0 %v4304_v13  ;;  %v4356_v41 = vld [vmem:[%s5284_s1 + $0x174] ss:$20 sps:$4 sm:$0xff]   ;;  %v4348_v44 = vld [vmem:[%s5284_s1 + $0x1bc] ss:$20 sps:$4 sm:$0xff]   ;;  %v4354_v48 = vld [vmem:[%s5284_s1 + $0x1e4] ss:$20 sps:$4 sm:$0xff]  }
  0x10   :  { %3965 = vmatprep.subr.bf16.mxu0 %v4306_v14  ;;  %v4660_v42 = vld [vmem:[%s5283_s0 + $0x8] sm:$0xff]  ;;  %v4362_v46 = vld [vmem:[%s5284_s1 + $0x19c] ss:$20 sps:$4 sm:$0xff]   ;;  %v4688_v50 = vld [vmem:[%s5288_s5] sm:$0xff]  ;;  %v4476_v6 = vmov 7   ;;  %v4477_v10 = vmov 0  }
  0x11   :  { %4027 = vmatpush1.bf16.msra.mxu1 %v4323_v20  ;;  %371 = vmatprep.mubr.f32.mxu0 %v4660_v42  ;;  %v4365_v49 = vld [vmem:[%s5284_s1 + $0x198] ss:$20 sps:$4 sm:$0xff]   ;;  %v4358_v51 = vld [vmem:[%s5284_s1 + $0x1e0] ss:$20 sps:$4 sm:$0xff]   ;;  %v4364_v57 = vld [vmem:[%s5284_s1 + $0x208] ss:$20 sps:$4 sm:$0xff]  }
  0x12   :  { %4029 = vmatprep.subr.bf16.mxu1 %v4326_v21  ;;  %448 = vmatprep.mubr.f32.mxu1 %v4660_v42  ;;  %v4368_v52 = vld [vmem:[%s5284_s1 + $0x1c4] ss:$20 sps:$4 sm:$0xff]   ;;  %v4700_v53 = vld [vmem:[%s5288_s5 + $0x8] sm:$0xff]  ;;  %v4371_v55 = vld [vmem:[%s5284_s1 + $0x1c0] ss:$20 sps:$4 sm:$0xff]  }
  0x13   :  { %3967 = vmatpush1.bf16.msra.mxu0 %v4310_v18  ;;  %581 = vperm.xlu1 %4248, %v4688_v50   ;;  %v4360_v54 = vld [vmem:[%s5284_s1 + $0x20c] ss:$20 sps:$4 sm:$0xff]   ;;  %v4366_v58 = vld [vmem:[%s5284_s1 + $0x234] ss:$20 sps:$4 sm:$0xff]   ;;  %v4370_v62 = vld [vmem:[%s5284_s1 + $0x230] ss:$20 sps:$4 sm:$0xff]  }
  0x14   :  { %3969 = vmatprep.subr.bf16.mxu0 %v4312_v19  ;;  %549 = vperm.xlu0 %4247, %v4688_v50   ;;  %v4374_v56 = vld [vmem:[%s5284_s1 + $0x1ec] ss:$20 sps:$4 sm:$0xff]   ;;  %v4377_v59 = vld [vmem:[%s5284_s1 + $0x1e8] ss:$20 sps:$4 sm:$0xff]   ;;  %v4380_v0 = vld [vmem:[%s5284_s1 + $0x210] ss:$20 sps:$4 sm:$0xff]  }
  0x15   :  { %4031 = vmatpush1.bf16.msra.mxu1 %v4329_v24  ;;  %v4378_v60 = vld [vmem:[%s5284_s1 + $0x214] ss:$20 sps:$4 sm:$0xff]   ;;  %v4372_v63 = vld [vmem:[%s5284_s1 + $0x25c] ss:$20 sps:$4 sm:$0xff]   ;;  %v4376_v1 = vld [vmem:[%s5284_s1 + $0x258] ss:$20 sps:$4 sm:$0xff]  }
  0x16   :  { %4033 = vmatprep.subr.bf16.mxu1 %v4332_v25  ;;  %v4381_v4 = vld [vmem:[%s5284_s1 + $0x23c] ss:$20 sps:$4 sm:$0xff]   ;;  %v4383_v5 = vld [vmem:[%s5284_s1 + $0x238] ss:$20 sps:$4 sm:$0xff]   ;;  %v4761_v9 = vld [vmem:[%s5283_s0] sm:$0xff] }
  0x17   :  { %3971 = vmatpush1.bf16.msra.mxu0 %v4316_v22  ;;  %585 = vperm.xlu1 %4248, %v4700_v53   ;;  %v4384_v7 = vld [vmem:[%s5284_s1 + $0x264] ss:$20 sps:$4 sm:$0xff]  }
  0x18   :  { %3973 = vmatprep.subr.bf16.mxu0 %v4318_v23  ;;  %553 = vperm.xlu0 %4247, %v4700_v53   ;;  %v4387_v8 = vld [vmem:[%s5284_s1 + $0x150] ss:$20 sps:$4 sm:$0xff]  }
  0x19   :  { %4035 = vmatpush1.bf16.msra.mxu1 %v4335_v28 }
  0x1a   :  { %4037 = vmatprep.subr.bf16.mxu1 %v4338_v29 }
  0x1b   :  { %3975 = vmatpush1.bf16.msra.mxu0 %v4322_v26  ;;  %4250 = vset.pattern.permute.xlu1 %v4475_v61 }
  0x1c   :  { %3977 = vmatprep.subr.bf16.mxu0 %v4324_v27  ;;  %617 = vperm.xlu1 %4250, %v4700_v53  }
  0x1d   :  { %4039 = vmatpush1.bf16.msra.mxu1 %v4341_v32  ;;  %4249 = vset.pattern.permute.xlu0 %v4475_v61 }
  0x1e   :  { %4041 = vmatprep.subr.bf16.mxu1 %v4344_v33  ;;  %613 = vperm.xlu0 %4249, %v4688_v50  }
  0x1f   :  { %3979 = vmatpush1.bf16.msra.mxu0 %v4328_v30 }
  0x20   :  { %3981 = vmatprep.subr.bf16.mxu0 %v4330_v31  ;;  %4251 = vset.pattern.permute.xlu1 %v4476_v6 }
  0x21   :  { %4043 = vmatpush1.bf16.msra.mxu1 %v4347_v36  ;;  %645 = vperm.xlu1 %4251, %v4688_v50  }
  0x22   :  { %4045 = vmatprep.subr.bf16.mxu1 %v4350_v37  ;;  %4252 = vset.pattern.permute.xlu0 %v4476_v6 }
  0x23   :  { %3983 = vmatpush1.bf16.msra.mxu0 %v4334_v34  ;;  %649 = vperm.xlu0 %4252, %v4700_v53  }
  0x24   :  { %3985 = vmatprep.subr.bf16.mxu0 %v4336_v35 }
  0x25   :  { %4047 = vmatpush1.bf16.msra.mxu1 %v4353_v40  ;;  %4253 = vset.pattern.permute.xlu1 %v4477_v10 }
  0x26   :  { %4049 = vmatprep.subr.bf16.mxu1 %v4356_v41 }
  0x27   :  { %3987 = vmatpush1.bf16.msra.mxu0 %v4340_v38 }
  0x28   :  { %3989 = vmatprep.subr.bf16.mxu0 %v4342_v39 }
  0x29   :  { %4051 = vmatpush1.bf16.msra.mxu1 %v4359_v45 }
  0x2a   :  { %4053 = vmatprep.subr.bf16.mxu1 %v4362_v46 }
  0x2b   :  { %3991 = vmatpush1.bf16.msra.mxu0 %v4346_v43 }
  0x2c   :  { %3993 = vmatprep.subr.bf16.mxu0 %v4348_v44 }
  0x2d   :  { %4055 = vmatpush1.bf16.msra.mxu1 %v4365_v49 }
  0x2e   :  { %4057 = vmatprep.subr.bf16.mxu1 %v4368_v52 }
  0x2f   :  { %3995 = vmatpush1.bf16.msra.mxu0 %v4352_v47 }
  0x30   :  { %3997 = vmatprep.subr.bf16.mxu0 %v4354_v48 }
  0x31   :  { %4059 = vmatpush1.bf16.msra.mxu1 %v4371_v55 }
  0x32   :  { %4061 = vmatprep.subr.bf16.mxu1 %v4374_v56 }
  0x33   :  { %3999 = vmatpush1.bf16.msra.mxu0 %v4358_v51 }
  0x34   :  { %4001 = vmatprep.subr.bf16.mxu0 %v4360_v54 }
  0x35   :  { %4063 = vmatpush1.bf16.msra.mxu1 %v4377_v59 }
  0x36   :  { %4065 = vmatprep.subr.bf16.mxu1 %v4378_v60 }
  0x37   :  { %4003 = vmatpush1.bf16.msra.mxu0 %v4364_v57 }
  0x38   :  { %4005 = vmatprep.subr.bf16.mxu0 %v4366_v58 }
  0x39   :  { %4067 = vmatpush1.bf16.msra.mxu1 %v4380_v0 }
  0x3a   :  { %4069 = vmatprep.subr.bf16.mxu1 %v4381_v4 }
  0x3b   :  { %4007 = vmatpush1.bf16.msra.mxu0 %v4370_v62 }
  0x3c   :  { %4009 = vmatprep.subr.bf16.mxu0 %v4372_v63 }
  0x3f   :  { %4011 = vmatpush1.bf16.msra.mxu0 %v4376_v1 }
  0x40   :  { %11 = vsyncpa [#allocation3], 0  ;;  %v4767_v11 = vld [vmem:[%s5283_s0 + $0x18] sm:$0xff]  ;;  %4071 = vmatpush1.bf16.msra.mxu1 %v4383_v5  ;;  %v4386_v12 = vld [vmem:[%s5284_s1 + $0x260] ss:$20 sps:$4 sm:$0xff]   ;;  %538 = vperm.xlu1 %4253, %v4688_v50   ;;  %v4478_v14 = vmov 2  }
  0x41   :  { %4073 = vmatprep.subr.bf16.mxu1 %v4384_v7  ;;  %4077 = vmatprep.subr.bf16.mxu0 %v4387_v8  ;;  %v4388_v13 = vld [vmem:[%s5284_s1 + $0x10] ss:$20 sps:$4 sm:$0xff]   ;;  %v4389_v15 = vld [vmem:[%s5284_s1 + $0x178] ss:$20 sps:$4 sm:$0xff]   ;;  %v4391_v18 = vld [vmem:[%s5284_s1 + $0x1a0] ss:$20 sps:$4 sm:$0xff]  }
  0x42   :  { %372 = vmatmul.mubr.f32.vlgmr.msra.gmra.mrb[0].mxu0 %v4761_v9  ;;  %4254 = vset.pattern.permute.xlu0 %v4478_v14  ;;  %v3763_v16 = vld [vmem:[%s5283_s0 + $0x10] sm:$0xff]  ;;  %v4390_v17 = vld [vmem:[%s5284_s1 + $0x38] ss:$20 sps:$4 sm:$0xff]   ;;  %v4479_v19 = vmov 4   ;;  %v4393_v21 = vld [vmem:[%s5284_s1 + $0x1c8] ss:$20 sps:$4 sm:$0xff]  }
  0x43   :  { %377 = vmatprep.mubr.f32.mxu0 %v4767_v11  ;;  %569 = vperm.xlu0 %4254, %v4688_v50   ;;  %v4392_v20 = vld [vmem:[%s5284_s1 + $0x60] ss:$20 sps:$4 sm:$0xff]   ;;  %v4394_v22 = vld [vmem:[%s5284_s1 + $0x88] ss:$20 sps:$4 sm:$0xff]   ;;  %v4395_v23 = vld [vmem:[%s5284_s1 + $0x1f0] ss:$20 sps:$4 sm:$0xff]  }
  0x44   :  { %4075 = vmatpush1.bf16.msra.mxu1 %v4386_v12  ;;  %543 = vperm.xlu1 %4253, %v4700_v53   ;;  %v4480_v24 = vmov 6   ;;  %v4396_v25 = vld [vmem:[%s5284_s1 + $0xb0] ss:$20 sps:$4 sm:$0xff]   ;;  %v4397_v26 = vld [vmem:[%s5284_s1 + $0x218] ss:$20 sps:$4 sm:$0xff]   ;;  %v4481_v27 = vmov 8  }
  0x45   :  { %4079 = vmatpush3.bf16.msra.mxu0 %v4388_v13  ;;  %v4398_v28 = vld [vmem:[%s5284_s1 + $0xd8] ss:$20 sps:$4 sm:$0xff]   ;;  %v4399_v29 = vld [vmem:[%s5284_s1 + $0x240] ss:$20 sps:$4 sm:$0xff]   ;;  %v4401_v31 = vld [vmem:[%s5284_s1 + $0x268] ss:$20 sps:$4 sm:$0xff]  }
  0x46   :  { %378 = vmatmul.mubr.f32.gmra.mrb[2].mxu0 %v3763_v16  ;;  %4081 = vmatprep.subr.bf16.mxu0 %v4389_v15  ;;  %v4400_v30 = vld [vmem:[%s5284_s1 + $0x100] ss:$20 sps:$4 sm:$0xff]   ;;  %v4402_v32 = vld [vmem:[%s5284_s1 + $0x128] ss:$20 sps:$4 sm:$0xff]   ;;  %s4482_s25 = smov 64   ;;  %vm676_vm0 = vcmask 523264  }
  0x47   :  { %449 = vmatmul.mubr.f32.vlgmr.msra.gmra.mrb[0].mxu1 %v4761_v9  ;;  %4257 = vset.pattern.permute.xlu0 %v4479_v19  ;;  %s4484_s20 = smov 112   ;;  %s4485_s21 = smov 48   ;;  %vm990_vm1 = vcmask 130048   ;;  %vm1290_vm2 = vcmask 31744   ;;  %vm4496_vm3 = vmmov 0   ;;  %vm1353_vm4 = vcmask 64512  }
  0x48   :  { %454 = vmatprep.mubr.f32.mxu1 %v4767_v11  ;;  %4255 = vset.pattern.permute.xlu1 %v4478_v14  ;;  %s4486_s22 = smov 96   ;;  %s4487_s23 = smov 80   ;;  %vm2330_vm6 = vcmask 1043456   ;;  %vm2514_vm7 = vcmask 1041408   ;;  %vm2692_vm8 = vcmask 15360   ;;  %vm2842_vm9 = vcmask 11264  }
  0x49   :  { %573 = vperm.xlu1 %4255, %v4700_v53   ;;  %4083 = vmatpush3.bf16.msra.mxu0 %v4390_v17  ;;  %s4488_s24 = smov 32   ;;  %s4489_s1 = smov 16  }
  0x4a   :  { %4085 = vmatprep.subr.bf16.mxu0 %v4391_v18  ;;  %605 = vperm.xlu0 %4257, %v4700_v53   ;;  %s4490_s30 = smov 124   ;;  %s4491_s7 = smov 120  }
  0x4b   :  { %455 = vmatmul.mubr.f32.gmra.mrb[2].mxu1 %v3763_v16  ;;  %525 = vmatprep.mubr.f32.mxu0 %v4660_v42  ;;  %s4492_s8 = smov 116   ;;  %s4493_s9 = smov 108  }
  0x4c   :  { %s4494_s10 = smov 104   ;;  %s4495_s11 = smov 100  }
  0x4d   :  { %4087 = vmatpush3.bf16.msra.mxu0 %v4392_v20  ;;  %4256 = vset.pattern.permute.xlu1 %v4479_v19  ;;  %s4497_s14 = smov 4  }
  0x4e   :  { %4089 = vmatprep.subr.bf16.mxu0 %v4393_v21  ;;  %4258 = vset.pattern.permute.xlu0 %v4480_v24 }
  0x4f   :  { %601 = vperm.xlu1 %4256, %v4688_v50   ;;  %633 = vperm.xlu0 %4258, %v4688_v50  }
  0x51   :  { %4091 = vmatpush3.bf16.msra.mxu0 %v4394_v22 }
  0x52   :  { %4093 = vmatprep.subr.bf16.mxu0 %v4395_v23 }
  0x53   :  { %4259 = vset.pattern.permute.xlu1 %v4480_v24  ;;  %4261 = vset.pattern.permute.xlu0 %v4481_v27 }
  0x54   :  { %637 = vperm.xlu1 %4259, %v4700_v53  }
  0x55   :  { %4095 = vmatpush3.bf16.msra.mxu0 %v4396_v25 }
  0x56   :  { %4097 = vmatprep.subr.bf16.mxu0 %v4397_v26 }
  0x58   :  { %4260 = vset.pattern.permute.xlu1 %v4481_v27 }
  0x59   :  { %4099 = vmatpush3.bf16.msra.mxu0 %v4398_v28  ;;  %665 = vperm.xlu1 %4260, %v4688_v50  }
  0x5a   :  { %4101 = vmatprep.subr.bf16.mxu0 %v4399_v29 }
  0x5d   :  { %4103 = vmatpush3.bf16.msra.mxu0 %v4400_v30  ;;  %4262 = vset.pattern.permute.xlu1 %v4477_v10 }
  0x5e   :  { %4105 = vmatprep.subr.bf16.mxu0 %v4401_v31 }
  0x61   :  { %4107 = vmatpush3.bf16.msra.mxu0 %v4402_v32 }
  0x64   :  { %526 = vmatmul.mubr.f32.vlgmr.msra.gmra.mrb[4].mxu0 %v4761_v9 }
  0x65   :  { %530 = vmatprep.mubr.f32.mxu0 %v4767_v11 }
  0x68   :  { %531 = vmatmul.mubr.f32.gmra.mrb[6].mxu0 %v3763_v16 }
  0x92   :  { %v582_v33 = vpop.permute.xlu1 %581 }
  0x93   :  { %v550_v34 = vpop.permute.xlu0 %549 }
  0x96   :  { %v586_v35 = vpop.permute.xlu1 %585 }
  0x97   :  { %v554_v39 = vpop.permute.xlu0 %553 }
  0x9b   :  { %v618_v40 = vpop.permute.xlu1 %617 }
  0x9d   :  { %v614_v49 = vpop.permute.xlu0 %613 }
  0xa0   :  { %v646_v51 = vpop.permute.xlu1 %645 }
  0xa2   :  { %v650_v56 = vpop.permute.xlu0 %649 }
  0xbf   :  { %v539_v0 = vpop.permute.xlu1 %538 }
  0xc2   :  { %v570_v9 = vpop.permute.xlu0 %569 }
  0xc3   :  { %v544_v1 = vpop.permute.xlu1 %543 }
  0xc8   :  { %v574_v4 = vpop.permute.xlu1 %573 }
  0xc9   :  { %v606_v16 = vpop.permute.xlu0 %605 }
  0xce   :  { %v602_v5 = vpop.permute.xlu1 %601  ;;  %v634_v25 = vpop.permute.xlu0 %633 }
  0xd3   :  { %v638_v7 = vpop.permute.xlu1 %637 }
  0xd8   :  { %v666_v8 = vpop.permute.xlu1 %665 }
 0x115   :  { %v373_v36 = vpop.f32.mrb[0].mxu0 }
 0x116   :  { %v556_v37 = vmul.f32 %v550_v34, %v373_v36  ;;  %v375_v38 = vpop.f32.mrb[1].mxu0  ;;  %v546_v11 = vmul.f32 %v539_v0, %v373_v36  ;;  %v4411_v0 = vld [vmem:[%s5285_s2 + $0x20] ss:$8 sps:$4 sm:$0xff]  }
 0x117   :  { %v588_v42 = vmul.f32 %v582_v33, %v375_v38  ;;  %v576_v13 = vmul.f32 %v570_v9, %v375_v38 }
 0x118   :  { %560 = vrot.lane.b32.xlu1 %v556_v37, %s4482_s25 }
 0x119   :  { %v379_v41 = vpop.f32.mrb[2].mxu0 }
 0x11a   :  { %v381_v43 = vpop.f32.mrb[3].mxu0  ;;  %v450_v44 = vpop.f32.mrb[0].mxu1  ;;  %v557_v47 = vmul.f32 %v554_v39, %v379_v41  ;;  %v547_v22 = vmul.f32 %v544_v1, %v379_v41 }
 0x11b   :  { %v589_v45 = vmul.f32 %v586_v35, %v381_v43  ;;  %v452_v46 = vpop.f32.mrb[1].mxu1  ;;  %v620_v52 = vmul.f32 %v614_v49, %v450_v44  ;;  %v608_v20 = vmul.f32 %v602_v5, %v450_v44  ;;  %v577_v28 = vmul.f32 %v574_v4, %v381_v43 }
 0x11c   :  { %592 = vrot.lane.b32.xlu1 %v588_v42, %s4482_s25  ;;  %v652_v54 = vmul.f32 %v646_v51, %v452_v46  ;;  %v640_v34 = vmul.f32 %v634_v25, %v452_v46  ;;  %v4483_v25 = vmov 0.0  }
 0x11d   :  { %594 = vrot.lane.b32.xlu0 %v589_v45, %s4482_s25  ;;  %813 = vmatprep.mubr.f32.mxu1 %v4483_v25 }
 0x11e   :  { %v456_v48 = vpop.f32.mrb[2].mxu1  ;;  %3898 = vmatprep.subr.mxu0 %v4483_v25  ;;  %3900 = vmatprep.mubr.msk.f32.mxu0 %vm4496_vm3, %v4483_v25 }
 0x11f   :  { %v458_v50 = vpop.f32.mrb[3].mxu1  ;;  %v621_v55 = vmul.f32 %v618_v40, %v456_v48  ;;  %v609_v33 = vmul.f32 %v606_v16, %v456_v48 }
 0x120   :  { %562 = vrot.lane.b32.xlu1 %v557_v47, %s4482_s25  ;;  %v653_v57 = vmul.f32 %v650_v56, %v458_v50  ;;  %v641_v40 = vmul.f32 %v638_v7, %v458_v50 }
 0x121   :  { %669 = vperm.xlu0 %4261, %v4700_v53  }
 0x124   :  { %624 = vrot.lane.b32.xlu1 %v620_v52, %s4482_s25 }
 0x125   :  { %656 = vrot.lane.b32.xlu0 %v652_v54, %s4482_s25 }
 0x126   :  { %4263 = vset.pattern.permute.xlu0 %v4477_v10 }
 0x128   :  { %626 = vrot.lane.b32.xlu1 %v621_v55, %s4482_s25 }
 0x12c   :  { %658 = vrot.lane.b32.xlu1 %v653_v57, %s4482_s25 }
 0x137   :  { %v3846_v58 = vpop.f32.mrb[4].mxu0 }
 0x138   :  { %v3847_v59 = vpop.f32.mrb[5].mxu0 }
 0x139   :  { %v3848_v60 = vadd.f32 %v3847_v59, %v3846_v58  ;;  %v4403_v59 = vld [vmem:[%s5285_s2 + $0x4] ss:$8 sps:$4 sm:$0xff]  }
 0x13a   :  { %4109 = vmatprep.subr.bf16.mxu1 %v4403_v59 }
 0x13b   :  { %v3849_v62 = vpop.f32.mrb[6].mxu0  ;;  %v672_v52 = vmul.f32 %v3848_v60, %v666_v8  ;;  %v4405_v60 = vld [vmem:[%s5285_s2] ss:$8 sps:$4 sm:$0xff]  }
 0x13c   :  { %v3850_v63 = vpop.f32.mrb[7].mxu0  ;;  %4111 = vmatpush1.bf16.msra.mxu1 %v4405_v60 }
 0x13d   :  { %v3851_v53 = vadd.f32 %v3850_v63, %v3849_v62  ;;  %v4406_v62 = vld [vmem:[%s5285_s2 + $0x14] ss:$8 sps:$4 sm:$0xff]   ;;  %v4408_v63 = vld [vmem:[%s5285_s2 + $0x10] ss:$8 sps:$4 sm:$0xff]  }
 0x13e   :  { %4113 = vmatprep.subr.bf16.mxu1 %v4406_v62 }
 0x140   :  { %4115 = vmatpush1.bf16.msra.mxu1 %v4408_v63 }
 0x18a   :  { %v561_v12 = vpop.permute.xlu1 %560 }
 0x18b   :  { %v566_v15 = vadd.f32 %v561_v12, %v546_v11 }
 0x18d   :  { %v578_v17 = vadd.f32 %v576_v13, %v566_v15 }
 0x18e   :  { %v593_v18 = vpop.permute.xlu1 %592 }
 0x18f   :  { %v598_v21 = vadd.f32 %v593_v18, %v578_v17  ;;  %v595_v31 = vpop.permute.xlu0 %594 }
 0x191   :  { %v610_v23 = vadd.f32 %v608_v20, %v598_v21  ;;  %v4412_v20 = vld [vmem:[%s5285_s2 + $0x34] ss:$8 sps:$4 sm:$0xff]  }
 0x192   :  { %v563_v26 = vpop.permute.xlu1 %562 }
 0x193   :  { %v567_v29 = vadd.f32 %v563_v26, %v547_v22  ;;  %v4414_v22 = vld [vmem:[%s5285_s2 + $0x30] ss:$8 sps:$4 sm:$0xff]  }
 0x194   :  { %v26_v26 = vld [vmem:[%s5288_s5 + $0x10] sm:$0xff] }
 0x195   :  { %v579_v30 = vadd.f32 %v577_v28, %v567_v29  ;;  %v27_v28 = vld [vmem:[%s5288_s5 + $0x18] sm:$0xff] }
 0x196   :  { %v625_v32 = vpop.permute.xlu1 %624 }
 0x197   :  { %v630_v35 = vadd.f32 %v625_v32, %v610_v23  ;;  %v599_v36 = vadd.f32 %v595_v31, %v579_v30 }
 0x199   :  { %v611_v37 = vadd.f32 %v609_v33, %v599_v36  ;;  %v642_v38 = vadd.f32 %v640_v34, %v630_v35 }
 0x19a   :  { %v627_v39 = vpop.permute.xlu1 %626 }
 0x19b   :  { %v631_v42 = vadd.f32 %v627_v39, %v611_v37 }
 0x19d   :  { %v643_v44 = vadd.f32 %v641_v40, %v631_v42 }
 0x19e   :  { %v659_v45 = vpop.permute.xlu1 %658 }
 0x19f   :  { %v663_v47 = vadd.f32 %v659_v45, %v643_v44 }
 0x1a0   :  { %v670_v41 = vpop.permute.xlu0 %669 }
 0x1a1   :  { %v673_v49 = vmul.f32 %v3851_v53, %v670_v41  ;;  %v4409_v53 = vld [vmem:[%s5285_s2 + $0x24] ss:$8 sps:$4 sm:$0xff]  }
 0x1a2   :  { %4117 = vmatprep.subr.bf16.mxu1 %v4409_v53 }
 0x1a3   :  { %v4855_v43 = vadd.f32 %v673_v49, %v663_v47  ;;  %4119 = vmatpush1.bf16.msra.mxu1 %v4411_v0 }
 0x1a4   :  { %v657_v51 = vpop.permute.xlu0 %656  ;;  %4121 = vmatprep.subr.bf16.mxu1 %v4412_v20 }
 0x1a5   :  { %v662_v54 = vadd.f32 %v657_v51, %v642_v38  ;;  %v681_v46 = vsel %vm676_vm0, %v4855_v43, 0.0  ;;  %v690_v57 = vmul.f32 %v4855_v43, %v4855_v43 }
 0x1a6   :  { %682 = vadd.xlane.f32.xlu1 %v681_v46 }
 0x1a7   :  { %v4859_v48 = vadd.f32 %v672_v52, %v662_v54  ;;  %v691_v58 = vsel %vm676_vm0, %v690_v57, 0.0  ;;  %4123 = vmatpush1.bf16.msra.mxu1 %v4414_v22 }
 0x1a9   :  { %v677_v50 = vsel %vm676_vm0, %v4859_v48, 0.0  ;;  %v685_v55 = vmul.f32 %v4859_v48, %v4859_v48 }
 0x1aa   :  { %678 = vadd.xlane.f32.xlu0 %v677_v50 }
 0x1ab   :  { %v686_v56 = vsel %vm676_vm0, %v685_v55, 0.0 }
 0x1ae   :  { %687 = vadd.xlane.f32.xlu0 %v686_v56 }
 0x1b2   :  { %692 = vadd.xlane.f32.xlu0 %v691_v58 }
 0x233   :  { %v683_v4 = vpop.xlane.xlu1 %682 }
 0x237   :  { %v679_v1 = vpop.xlane.xlu0 %678 }
 0x238   :  { %v684_v5 = vadd.f32 %v683_v4, %v679_v1 }
 0x23a   :  { %v696_v8 = vmul.f32 0.0078125, %v684_v5 }
 0x23b   :  { %v688_v7 = vpop.xlane.xlu0 %687 }
 0x23c   :  { %v698_v12 = vmul.f32 %v696_v8, %v696_v8  ;;  %v703_v18 = vsub.f32 0.0, %v696_v8 }
 0x23f   :  { %v693_v9 = vpop.xlane.xlu0 %692 }
 0x240   :  { %v694_v11 = vadd.f32 %v693_v9, %v688_v7 }
 0x242   :  { %v697_v13 = vmul.f32 0.0078125, %v694_v11 }
 0x244   :  { %v699_v15 = vsub.f32 %v697_v13, %v698_v12 }
 0x246   :  { %v700_v16 = vmax.f32 %v699_v15, 0.0 }
 0x248   :  { %v701_v17 = vadd.f32 1e-05, %v700_v16 }
 0x24a   :  { %4415 = vrsqrt.f32 %v701_v17 }
 0x254   :  { %v4416_v21 = vpop.eup %4415 }
 0x255   :  { %707 = vperm.xlu1 %4262, %v4416_v21   ;;  %v704_v23 = vmul.f32 %v4416_v21, %v703_v18 }
 0x257   :  { %714 = vperm.xlu0 %4263, %v704_v23  }
 0x259   :  { %4264 = vset.pattern.permute.xlu1 %v4474_v3 }
 0x25a   :  { %839 = vperm.xlu1 %4264, %v26_v26  }
 0x25b   :  { %4268 = vset.pattern.permute.xlu0 %v4475_v61 }
 0x25c   :  { %919 = vperm.xlu0 %4268, %v26_v26  }
 0x25e   :  { %843 = vperm.xlu1 %4264, %v27_v28  }
 0x260   :  { %4271 = vset.pattern.permute.xlu0 %v4480_v24 }
 0x261   :  { %943 = vperm.xlu0 %4271, %v27_v28  }
 0x262   :  { %4265 = vset.pattern.permute.xlu1 %v4478_v14 }
 0x263   :  { %859 = vperm.xlu1 %4265, %v26_v26  }
 0x265   :  { %4275 = vset.pattern.permute.xlu0 %v4481_v27 }
 0x266   :  { %983 = vperm.xlu0 %4275, %v27_v28  }
 0x267   :  { %863 = vperm.xlu1 %4265, %v27_v28  }
 0x26a   :  { %4276 = vset.pattern.permute.xlu0 %v4477_v10 }
 0x26b   :  { %828 = vperm.xlu0 %4276, %v26_v26   ;;  %4266 = vset.pattern.permute.xlu1 %v4473_v2 }
 0x26c   :  { %879 = vperm.xlu1 %4266, %v26_v26  }
 0x270   :  { %883 = vperm.xlu1 %4266, %v27_v28  }
 0x274   :  { %4267 = vset.pattern.permute.xlu1 %v4479_v19 }
 0x275   :  { %899 = vperm.xlu1 %4267, %v26_v26  }
 0x279   :  { %903 = vperm.xlu1 %4267, %v27_v28  }
 0x27d   :  { %4269 = vset.pattern.permute.xlu1 %v4475_v61 }
 0x27e   :  { %923 = vperm.xlu1 %4269, %v27_v28  }
 0x282   :  { %4270 = vset.pattern.permute.xlu1 %v4480_v24 }
 0x283   :  { %939 = vperm.xlu1 %4270, %v26_v26  }
 0x287   :  { %4272 = vset.pattern.permute.xlu1 %v4476_v6 }
 0x288   :  { %959 = vperm.xlu1 %4272, %v26_v26  }
 0x28c   :  { %963 = vperm.xlu1 %4272, %v27_v28  }
 0x290   :  { %4273 = vset.pattern.permute.xlu1 %v4477_v10 }
 0x291   :  { %833 = vperm.xlu1 %4273, %v27_v28  }
 0x295   :  { %4274 = vset.pattern.permute.xlu1 %v4481_v27 }
 0x296   :  { %979 = vperm.xlu1 %4274, %v26_v26  }
 0x29a   :  { %4277 = vset.pattern.permute.xlu1 %v4477_v10 }
 0x2d4   :  { %v708_v29 = vpop.permute.xlu1 %707 }
 0x2d5   :  { %v710_v30 = vmul.f32 %v708_v29, %v4859_v48  ;;  %v711_v32 = vmul.f32 %v708_v29, %v4855_v43 }
 0x2d6   :  { %v715_v31 = vpop.permute.xlu0 %714 }
 0x2d7   :  { %v717_v33 = vadd.f32 %v715_v31, %v710_v30  ;;  %v718_v34 = vadd.f32 %v715_v31, %v711_v32 }
 0x2d9   :  { %3765 = vmatmul.mubr.msk.f32.vlgmr.msra.gmra.mrb[4].mxu1 %vm676_vm0, %v717_v33  ;;  %v840_v35 = vpop.permute.xlu1 %839 }
 0x2da   :  { %819 = vmatprep.mubr.f32.mxu1 %v4483_v25 }
 0x2db   :  { %v920_v44 = vpop.permute.xlu0 %919 }
 0x2dd   :  { %3766 = vmatmul.mubr.msk.f32.gmra.mrb[6].mxu1 %vm676_vm0, %v718_v34  ;;  %v844_v36 = vpop.permute.xlu1 %843 }
 0x2e0   :  { %v944_v0 = vpop.permute.xlu0 %943 }
 0x2e2   :  { %v860_v37 = vpop.permute.xlu1 %859 }
 0x2e5   :  { %v984_v7 = vpop.permute.xlu0 %983 }
 0x2e6   :  { %v864_v38 = vpop.permute.xlu1 %863 }
 0x2ea   :  { %v829_v9 = vpop.permute.xlu0 %828 }
 0x2eb   :  { %v880_v39 = vpop.permute.xlu1 %879 }
 0x2ef   :  { %v884_v40 = vpop.permute.xlu1 %883 }
 0x2f4   :  { %v900_v42 = vpop.permute.xlu1 %899 }
 0x2f8   :  { %v904_v43 = vpop.permute.xlu1 %903 }
 0x2fd   :  { %v924_v48 = vpop.permute.xlu1 %923 }
 0x302   :  { %v940_v58 = vpop.permute.xlu1 %939 }
 0x307   :  { %v960_v62 = vpop.permute.xlu1 %959 }
 0x30b   :  { %v964_v4 = vpop.permute.xlu1 %963 }
 0x310   :  { %v834_v8 = vpop.permute.xlu1 %833 }
 0x315   :  { %v980_v11 = vpop.permute.xlu1 %979 }
 0x3ac   :  { %v815_v45 = vpop.f32.mrb[4].mxu1 }
 0x3ad   :  { %v4920_v41 = vpop.f32.mrb[5].mxu1  ;;  %v846_v47 = vmul.f32 %v840_v35, %v815_v45  ;;  %v926_v49 = vmul.f32 %v920_v44, %v815_v45  ;;  %v866_v54 = vmul.f32 %v860_v37, %v815_v45  ;;  %v886_v50 = vmul.f32 %v880_v39, %v815_v45 }
 0x3ae   :  { %v906_v56 = vmul.f32 %v900_v42, %v815_v45  ;;  %v946_v60 = vmul.f32 %v940_v58, %v815_v45  ;;  %v966_v53 = vmul.f32 %v960_v62, %v815_v45  ;;  %v836_v17 = vmul.f32 %v829_v9, %v815_v45 }
 0x3af   :  { %850 = vrot.lane.b32.xlu1 %v846_v47, %s4484_s20  ;;  %930 = vrot.lane.b32.xlu0 %v926_v49, %s4485_s21  ;;  %v986_v39 = vmul.f32 %v980_v11, %v4920_v41 }
 0x3b0   :  { %v821_v51 = vpop.f32.mrb[6].mxu1 }
 0x3b1   :  { %v4923_v52 = vpop.f32.mrb[7].mxu1  ;;  %v847_v46 = vmul.f32 %v844_v36, %v821_v51  ;;  %v867_v55 = vmul.f32 %v864_v38, %v821_v51  ;;  %v887_v57 = vmul.f32 %v884_v40, %v821_v51  ;;  %v907_v59 = vmul.f32 %v904_v43, %v821_v51 }
 0x3b2   :  { %v927_v63 = vmul.f32 %v924_v48, %v821_v51  ;;  %v947_v1 = vmul.f32 %v944_v0, %v821_v51  ;;  %v967_v5 = vmul.f32 %v964_v4, %v821_v51  ;;  %v837_v30 = vmul.f32 %v834_v8, %v821_v51 }
 0x3b3   :  { %870 = vrot.lane.b32.xlu1 %v866_v54, %s4486_s22  ;;  %852 = vrot.lane.b32.xlu0 %v847_v46, %s4484_s20  ;;  %v987_v48 = vmul.f32 %v984_v7, %v4923_v52  ;;  %v3811_v52 = vld [vmem:[%s5286_s3] sm:$0xff]  }
 0x3b4   :  { %4125 = vmatprep.subr.bf16.mxu1 %v3811_v52 }
 0x3b5   :  { %4127 = vmatpush3.bf16.msra.mxu1 %v3811_v52 }
 0x3b6   :  { %3887 = vmatprep.subr.mxu1 %v4483_v25 }
 0x3b7   :  { %890 = vrot.lane.b32.xlu1 %v886_v50, %s4487_s23  ;;  %872 = vrot.lane.b32.xlu0 %v867_v55, %s4486_s22 }
 0x3bb   :  { %910 = vrot.lane.b32.xlu1 %v906_v56, %s4482_s25  ;;  %892 = vrot.lane.b32.xlu0 %v887_v57, %s4487_s23 }
 0x3bf   :  { %912 = vrot.lane.b32.xlu1 %v907_v59, %s4482_s25  ;;  %950 = vrot.lane.b32.xlu0 %v946_v60, %s4488_s24 }
 0x3c3   :  { %932 = vrot.lane.b32.xlu1 %v927_v63, %s4485_s21  ;;  %970 = vrot.lane.b32.xlu0 %v966_v53, %s4489_s1 }
 0x3c7   :  { %952 = vrot.lane.b32.xlu1 %v947_v1, %s4488_s24 }
 0x3cb   :  { %972 = vrot.lane.b32.xlu1 %v967_v5, %s4489_s1 }
 0x421   :  { %v851_v12 = vpop.permute.xlu1 %850  ;;  %v931_v13 = vpop.permute.xlu0 %930 }
 0x422   :  { %v856_v18 = vadd.f32 %v851_v12, %v836_v17 }
 0x425   :  { %v871_v15 = vpop.permute.xlu1 %870  ;;  %v853_v16 = vpop.permute.xlu0 %852 }
 0x426   :  { %v876_v22 = vadd.f32 %v871_v15, %v856_v18  ;;  %v857_v34 = vadd.f32 %v853_v16, %v837_v30  ;;  %v28_v15 = vld [vmem:[%s5288_s5 + $0x20] sm:$0xff]  ;;  %v29_v16 = vld [vmem:[%s5288_s5 + $0x28] sm:$0xff] }
 0x429   :  { %v891_v20 = vpop.permute.xlu1 %890  ;;  %v873_v21 = vpop.permute.xlu0 %872 }
 0x42a   :  { %v896_v23 = vadd.f32 %v891_v20, %v876_v22  ;;  %v877_v35 = vadd.f32 %v873_v21, %v857_v34 }
 0x42d   :  { %v911_v26 = vpop.permute.xlu1 %910  ;;  %v893_v28 = vpop.permute.xlu0 %892 }
 0x42e   :  { %v916_v29 = vadd.f32 %v911_v26, %v896_v23  ;;  %v897_v40 = vadd.f32 %v893_v28, %v877_v35 }
 0x430   :  { %v936_v31 = vadd.f32 %v931_v13, %v916_v29 }
 0x431   :  { %v913_v32 = vpop.permute.xlu1 %912  ;;  %v951_v33 = vpop.permute.xlu0 %950 }
 0x432   :  { %v956_v36 = vadd.f32 %v951_v33, %v936_v31  ;;  %v917_v44 = vadd.f32 %v913_v32, %v897_v40 }
 0x435   :  { %v933_v37 = vpop.permute.xlu1 %932  ;;  %v971_v38 = vpop.permute.xlu0 %970 }
 0x436   :  { %v976_v42 = vadd.f32 %v971_v38, %v956_v36  ;;  %v937_v49 = vadd.f32 %v933_v37, %v917_v44 }
 0x438   :  { %v4933_v45 = vadd.f32 %v986_v39, %v976_v42 }
 0x439   :  { %v953_v47 = vpop.permute.xlu1 %952 }
 0x43a   :  { %v991_v43 = vsel %vm990_vm1, %v4933_v45, 0.0  ;;  %v999_v51 = vmul.f32 %v4933_v45, %v4933_v45  ;;  %v957_v54 = vadd.f32 %v953_v47, %v937_v49 }
 0x43b   :  { %992 = vadd.xlane.f32.xlu0 %v991_v43 }
 0x43c   :  { %v1000_v50 = vsel %vm990_vm1, %v999_v51, 0.0 }
 0x43d   :  { %v973_v46 = vpop.permute.xlu1 %972 }
 0x43e   :  { %v977_v41 = vadd.f32 %v973_v46, %v957_v54 }
 0x43f   :  { %1001 = vadd.xlane.f32.xlu0 %v1000_v50 }
 0x440   :  { %v4941_v55 = vadd.f32 %v987_v48, %v977_v41 }
 0x442   :  { %v995_v56 = vsel %vm990_vm1, %v4941_v55, 0.0  ;;  %v1004_v57 = vmul.f32 %v4941_v55, %v4941_v55 }
 0x443   :  { %996 = vadd.xlane.f32.xlu1 %v995_v56 }
 0x444   :  { %v1005_v58 = vsel %vm990_vm1, %v1004_v57, 0.0 }
 0x445   :  { %1006 = vadd.xlane.f32.xlu0 %v1005_v58 }
 0x4c8   :  { %v993_v59 = vpop.xlane.xlu0 %992 }
 0x4cc   :  { %v1002_v60 = vpop.xlane.xlu0 %1001 }
 0x4d0   :  { %v997_v62 = vpop.xlane.xlu1 %996 }
 0x4d1   :  { %v998_v63 = vadd.f32 %v997_v62, %v993_v59 }
 0x4d2   :  { %v1007_v53 = vpop.xlane.xlu0 %1006 }
 0x4d3   :  { %v1010_v0 = vmul.f32 0.03125, %v998_v63  ;;  %v1008_v1 = vadd.f32 %v1007_v53, %v1002_v60 }
 0x4d5   :  { %v1012_v4 = vmul.f32 %v1010_v0, %v1010_v0  ;;  %v1011_v5 = vmul.f32 0.03125, %v1008_v1  ;;  %v1017_v11 = vsub.f32 0.0, %v1010_v0 }
 0x4d7   :  { %v1013_v7 = vsub.f32 %v1011_v5, %v1012_v4 }
 0x4d9   :  { %v1014_v8 = vmax.f32 %v1013_v7, 0.0 }
 0x4db   :  { %v1015_v9 = vadd.f32 1e-05, %v1014_v8 }
 0x4dd   :  { %4417 = vrsqrt.f32 %v1015_v9 }
 0x4e7   :  { %v4418_v12 = vpop.eup %4417 }
 0x4e8   :  { %1021 = vperm.xlu1 %4277, %v4418_v12   ;;  %v1018_v13 = vmul.f32 %v4418_v12, %v1017_v11 }
 0x4ea   :  { %1028 = vperm.xlu0 %4276, %v1018_v13  }
 0x4ec   :  { %4278 = vset.pattern.permute.xlu1 %v4474_v3 }
 0x4ed   :  { %1131 = vperm.xlu1 %4278, %v28_v15  }
 0x4ee   :  { %4282 = vset.pattern.permute.xlu0 %v4479_v19 }
 0x4ef   :  { %1195 = vperm.xlu0 %4282, %v29_v16  }
 0x4f1   :  { %1135 = vperm.xlu1 %4278, %v29_v16  }
 0x4f3   :  { %4284 = vset.pattern.permute.xlu0 %v4480_v24 }
 0x4f4   :  { %1231 = vperm.xlu0 %4284, %v28_v15  }
 0x4f5   :  { %4279 = vset.pattern.permute.xlu1 %v4478_v14 }
 0x4f6   :  { %1151 = vperm.xlu1 %4279, %v28_v15  }
 0x4f8   :  { %4287 = vset.pattern.permute.xlu0 %v4476_v6 }
 0x4f9   :  { %1255 = vperm.xlu0 %4287, %v29_v16  }
 0x4fa   :  { %1155 = vperm.xlu1 %4279, %v29_v16  }
 0x4fd   :  { %4289 = vset.pattern.permute.xlu0 %v4477_v10 }
 0x4fe   :  { %1120 = vperm.xlu0 %4289, %v28_v15   ;;  %4280 = vset.pattern.permute.xlu1 %v4473_v2 }
 0x4ff   :  { %1171 = vperm.xlu1 %4280, %v28_v15  }
 0x503   :  { %1175 = vperm.xlu1 %4280, %v29_v16  }
 0x507   :  { %4281 = vset.pattern.permute.xlu1 %v4479_v19 }
 0x508   :  { %1191 = vperm.xlu1 %4281, %v28_v15  }
 0x50c   :  { %4283 = vset.pattern.permute.xlu1 %v4475_v61 }
 0x50d   :  { %1211 = vperm.xlu1 %4283, %v28_v15  }
 0x511   :  { %1215 = vperm.xlu1 %4283, %v29_v16  }
 0x515   :  { %4285 = vset.pattern.permute.xlu1 %v4480_v24 }
 0x516   :  { %1235 = vperm.xlu1 %4285, %v29_v16  }
 0x51a   :  { %4286 = vset.pattern.permute.xlu1 %v4476_v6 }
 0x51b   :  { %1251 = vperm.xlu1 %4286, %v28_v15  }
 0x51f   :  { %4288 = vset.pattern.permute.xlu1 %v4481_v27 }
 0x520   :  { %1271 = vperm.xlu1 %4288, %v28_v15  }
 0x524   :  { %1275 = vperm.xlu1 %4288, %v29_v16  }
 0x528   :  { %4290 = vset.pattern.permute.xlu1 %v4477_v10 }
 0x529   :  { %1125 = vperm.xlu1 %4290, %v29_v16  }
 0x567   :  { %v1022_v2 = vpop.permute.xlu1 %1021 }
 0x568   :  { %v1024_v3 = vmul.f32 %v1022_v2, %v4933_v45  ;;  %v1025_v61 = vmul.f32 %v1022_v2, %v4941_v55 }
 0x569   :  { %v1029_v14 = vpop.permute.xlu0 %1028 }
 0x56a   :  { %v1031_v19 = vadd.f32 %v1029_v14, %v1024_v3  ;;  %v1032_v17 = vadd.f32 %v1029_v14, %v1025_v61 }
 0x56c   :  { %3884 = vmatprep.mubr.msk.f32.mxu1 %vm990_vm1, %v1031_v19  ;;  %v1132_v6 = vpop.permute.xlu1 %1131 }
 0x56d   :  { %3885 = vmatmul.mubr.msk.f32.vlgmr.msra.gmra.mrb[8].mxu1 %vm990_vm1, %v1032_v17 }
 0x56e   :  { %v1196_v36 = vpop.permute.xlu0 %1195  ;;  %3889 = vmatprep.mubr.msk.f32.mxu1 %vm4496_vm3, %v4483_v25 }
 0x570   :  { %v1136_v24 = vpop.permute.xlu1 %1135 }
 0x573   :  { %v1232_v42 = vpop.permute.xlu0 %1231 }
 0x575   :  { %v1152_v27 = vpop.permute.xlu1 %1151 }
 0x578   :  { %v1256_v43 = vpop.permute.xlu0 %1255 }
 0x579   :  { %v1156_v18 = vpop.permute.xlu1 %1155 }
 0x57d   :  { %v1121_v50 = vpop.permute.xlu0 %1120 }
 0x57e   :  { %v1172_v20 = vpop.permute.xlu1 %1171 }
 0x582   :  { %v1176_v21 = vpop.permute.xlu1 %1175 }
 0x587   :  { %v1192_v10 = vpop.permute.xlu1 %1191 }
 0x58c   :  { %v1212_v22 = vpop.permute.xlu1 %1211 }
 0x590   :  { %v1216_v30 = vpop.permute.xlu1 %1215 }
 0x595   :  { %v1236_v34 = vpop.permute.xlu1 %1235 }
 0x59a   :  { %v1252_v39 = vpop.permute.xlu1 %1251 }
 0x59f   :  { %v1272_v47 = vpop.permute.xlu1 %1271 }
 0x5a3   :  { %v1276_v46 = vpop.permute.xlu1 %1275 }
 0x5a8   :  { %v1126_v55 = vpop.permute.xlu1 %1125 }
 0x640   :  { %v3886_v23 = vpop.f32.mrb[8].mxu1 }
 0x641   :  { %v1109_v26 = vpop.f32.mrb[9].mxu1  ;;  %v1139_v28 = vmul.f32 %v3886_v23, %v1136_v24  ;;  %v1159_v31 = vmul.f32 %v3886_v23, %v1156_v18  ;;  %v1179_v33 = vmul.f32 %v3886_v23, %v1176_v21  ;;  %v1199_v37 = vmul.f32 %v3886_v23, %v1196_v36 }
 0x642   :  { %v1138_v29 = vmul.f32 %v1132_v6, %v1109_v26  ;;  %v1158_v32 = vmul.f32 %v1152_v27, %v1109_v26  ;;  %v1178_v35 = vmul.f32 %v1172_v20, %v1109_v26  ;;  %v1198_v38 = vmul.f32 %v1192_v10, %v1109_v26 }
 0x643   :  { %1144 = vrot.lane.b32.xlu0 %v1139_v28, %s4490_s30  ;;  %v1219_v40 = vmul.f32 %v3886_v23, %v1216_v30  ;;  %v1218_v44 = vmul.f32 %v1212_v22, %v1109_v26  ;;  %v1239_v45 = vmul.f32 %v3886_v23, %v1236_v34  ;;  %v1238_v49 = vmul.f32 %v1232_v42, %v1109_v26 }
 0x644   :  { %1142 = vrot.lane.b32.xlu1 %v1138_v29, %s4490_s30  ;;  %v1259_v51 = vmul.f32 %v3886_v23, %v1256_v43  ;;  %v1258_v54 = vmul.f32 %v1252_v39, %v1109_v26  ;;  %v1279_v48 = vmul.f32 %v3886_v23, %v1276_v46  ;;  %v1278_v41 = vmul.f32 %v1272_v47, %v1109_v26  ;;  %v34_v43 = vld [vmem:[%s5288_s5 + $0x50] sm:$0xff] }
 0x645   :  { %v1129_v63 = vmul.f32 %v3886_v23, %v1126_v55  ;;  %v1128_v0 = vmul.f32 %v1121_v50, %v1109_v26 }
 0x647   :  { %1164 = vrot.lane.b32.xlu0 %v1159_v31, %s4491_s7 }
 0x648   :  { %1162 = vrot.lane.b32.xlu1 %v1158_v32, %s4491_s7 }
 0x64b   :  { %1184 = vrot.lane.b32.xlu0 %v1179_v33, %s4492_s8 }
 0x64c   :  { %1182 = vrot.lane.b32.xlu1 %v1178_v35, %s4492_s8 }
 0x64f   :  { %1204 = vrot.lane.b32.xlu0 %v1199_v37, %s4484_s20 }
 0x650   :  { %1202 = vrot.lane.b32.xlu1 %v1198_v38, %s4484_s20 }
 0x653   :  { %1224 = vrot.lane.b32.xlu0 %v1219_v40, %s4493_s9 }
 0x654   :  { %1222 = vrot.lane.b32.xlu1 %v1218_v44, %s4493_s9 }
 0x657   :  { %1244 = vrot.lane.b32.xlu0 %v1239_v45, %s4494_s10 }
 0x658   :  { %1242 = vrot.lane.b32.xlu1 %v1238_v49, %s4494_s10 }
 0x65b   :  { %1264 = vrot.lane.b32.xlu0 %v1259_v51, %s4495_s11 }
 0x65c   :  { %1262 = vrot.lane.b32.xlu1 %v1258_v54, %s4495_s11 }
 0x65f   :  { %1284 = vrot.lane.b32.xlu0 %v1279_v48, %s4486_s22 }
 0x660   :  { %1282 = vrot.lane.b32.xlu1 %v1278_v41, %s4486_s22  ;;  %v35_v41 = vld [vmem:[%s5288_s5 + $0x58] sm:$0xff] }
 0x6b5   :  { %v1145_v56 = vpop.permute.xlu0 %1144 }
 0x6b6   :  { %v1143_v57 = vpop.permute.xlu1 %1142  ;;  %v1149_v1 = vadd.f32 %v1145_v56, %v1129_v63 }
 0x6b7   :  { %v1148_v4 = vadd.f32 %v1143_v57, %v1128_v0  ;;  %v30_v57 = vld [vmem:[%s5288_s5 + $0x30] sm:$0xff] }
 0x6b9   :  { %v1165_v58 = vpop.permute.xlu0 %1164 }
 0x6ba   :  { %v1163_v52 = vpop.permute.xlu1 %1162  ;;  %v1169_v7 = vadd.f32 %v1165_v58, %v1149_v1 }
 0x6bb   :  { %v1168_v9 = vadd.f32 %v1163_v52, %v1148_v4  ;;  %v31_v52 = vld [vmem:[%s5288_s5 + $0x38] sm:$0xff] }
 0x6bd   :  { %v1185_v59 = vpop.permute.xlu0 %1184 }
 0x6be   :  { %v1183_v60 = vpop.permute.xlu1 %1182  ;;  %v1189_v11 = vadd.f32 %v1185_v59, %v1169_v7  ;;  %v32_v59 = vld [vmem:[%s5288_s5 + $0x40] sm:$0xff] }
 0x6bf   :  { %v1188_v12 = vadd.f32 %v1183_v60, %v1168_v9 }
 0x6c1   :  { %v1205_v62 = vpop.permute.xlu0 %1204 }
 0x6c2   :  { %v1203_v53 = vpop.permute.xlu1 %1202  ;;  %v1209_v15 = vadd.f32 %v1205_v62, %v1189_v11 }
 0x6c3   :  { %v1208_v2 = vadd.f32 %v1203_v53, %v1188_v12  ;;  %v1443_v12 = vlaneseq }
 0x6c5   :  { %v1225_v5 = vpop.permute.xlu0 %1224 }
 0x6c6   :  { %v1223_v8 = vpop.permute.xlu1 %1222  ;;  %v1229_v3 = vadd.f32 %v1225_v5, %v1209_v15 }
 0x6c7   :  { %v1228_v61 = vadd.f32 %v1223_v8, %v1208_v2 }
 0x6c9   :  { %v1245_v13 = vpop.permute.xlu0 %1244 }
 0x6ca   :  { %v1243_v16 = vpop.permute.xlu1 %1242  ;;  %v1249_v19 = vadd.f32 %v1245_v13, %v1229_v3  ;;  %v1444_v13 = vand.u32 127, %v1443_v12 }
 0x6cb   :  { %v1248_v6 = vadd.f32 %v1243_v16, %v1228_v61  ;;  %v33_v61 = vld [vmem:[%s5288_s5 + $0x48] sm:$0xff] }
 0x6cc   :  { %vm1445_vm5 = vcmp.lt.s32.totalorder %v1444_v13, 4 }
 0x6cd   :  { %v1265_v14 = vpop.permute.xlu0 %1264 }
 0x6ce   :  { %v1263_v17 = vpop.permute.xlu1 %1262  ;;  %v1269_v24 = vadd.f32 %v1265_v14, %v1249_v19 }
 0x6cf   :  { %v1268_v27 = vadd.f32 %v1263_v17, %v1248_v6 }
 0x6d1   :  { %v1285_v18 = vpop.permute.xlu0 %1284 }
 0x6d2   :  { %v1289_v20 = vadd.f32 %v1285_v18, %v1269_v24  ;;  %v1283_v21 = vpop.permute.xlu1 %1282 }
 0x6d3   :  { %v1288_v10 = vadd.f32 %v1283_v21, %v1268_v27 }
 0x6d4   :  { %v1295_v22 = vsel %vm1290_vm2, %v1289_v20, 0.0  ;;  %v1304_v28 = vmul.f32 %v1289_v20, %v1289_v20 }
 0x6d5   :  { %1296 = vadd.xlane.f32.xlu0 %v1295_v22  ;;  %v1291_v23 = vsel %vm1290_vm2, %v1288_v10, 0.0  ;;  %v1299_v26 = vmul.f32 %v1288_v10, %v1288_v10 }
 0x6d6   :  { %1292 = vadd.xlane.f32.xlu1 %v1291_v23  ;;  %v1305_v30 = vsel %vm1290_vm2, %v1304_v28, 0.0 }
 0x6d7   :  { %v1300_v29 = vsel %vm1290_vm2, %v1299_v26, 0.0 }
 0x6d9   :  { %1301 = vadd.xlane.f32.xlu0 %v1300_v29 }
 0x6da   :  { %1306 = vadd.xlane.f32.xlu1 %v1305_v30 }
 0x762   :  { %v1297_v31 = vpop.xlane.xlu0 %1296 }
 0x763   :  { %v1293_v32 = vpop.xlane.xlu1 %1292 }
 0x764   :  { %v1298_v33 = vadd.f32 %v1297_v31, %v1293_v32 }
 0x766   :  { %v1310_v34 = vmul.f32 0.125, %v1298_v33  ;;  %v1302_v35 = vpop.xlane.xlu0 %1301 }
 0x767   :  { %v1307_v36 = vpop.xlane.xlu1 %1306 }
 0x768   :  { %v1308_v37 = vadd.f32 %v1307_v36, %v1302_v35  ;;  %v1312_v38 = vmul.f32 %v1310_v34, %v1310_v34  ;;  %v1317_v45 = vsub.f32 0.0, %v1310_v34 }
 0x76a   :  { %v1311_v39 = vmul.f32 0.125, %v1308_v37 }
 0x76c   :  { %v1313_v40 = vsub.f32 %v1311_v39, %v1312_v38 }
 0x76e   :  { %v1314_v42 = vmax.f32 %v1313_v40, 0.0 }
 0x770   :  { %v1315_v44 = vadd.f32 1e-05, %v1314_v42 }
 0x772   :  { %4419 = vrsqrt.f32 %v1315_v44 }
 0x77c   :  { %v4420_v47 = vpop.eup %4419 }
 0x77d   :  { %1321 = vperm.xlu0 %4289, %v4420_v47   ;;  %v1318_v49 = vmul.f32 %v4420_v47, %v1317_v45 }
 0x77f   :  { %1328 = vperm.xlu1 %4290, %v1318_v49   ;;  %v36_v49 = vld [vmem:[%s5288_s5 + $0x60] sm:$0xff] }
 0x781   :  { %1345 = vperm.xlu0 %4289, %v34_v43  }
 0x7fc   :  { %v1322_v51 = vpop.permute.xlu0 %1321 }
 0x7fd   :  { %v1325_v54 = vmul.f32 %v1322_v51, %v1289_v20  ;;  %v1324_v50 = vmul.f32 %v1322_v51, %v1288_v10 }
 0x7fe   :  { %v1329_v46 = vpop.permute.xlu1 %1328 }
 0x7ff   :  { %v1332_v48 = vadd.f32 %v1329_v46, %v1325_v54  ;;  %v1331_v55 = vadd.f32 %v1329_v46, %v1324_v50  ;;  %v38_v50 = vld [vmem:[%s5288_s5 + $0x70] sm:$0xff] }
 0x800   :  { %v1346_v63 = vpop.permute.xlu0 %1345 }
 0x801   :  { %1334 = vrot.lane.b32.xlu1 %v1332_v48, %s4497_s14 }
 0x805   :  { %1350 = vperm.xlu1 %4290, %v35_v41  }
 0x873   :  { %v1335_v56 = vpop.permute.xlu1 %1334 }
 0x874   :  { %v5000_v58 = vsel %vm1290_vm2, %v1331_v55, %v1335_v56 }
 0x875   :  { %3888 = vmatpush3.msra.mxu1 %v5000_v58 }
 0x876   :  { %3890 = vmatmul.mubr.msk.f32.vlgmr.msra.gmra.mrb[10].mxu1 %vm1353_vm4, %v30_v57  ;;  %3903 = vmatprep.subr.mxu1 %v4483_v25 }
 0x877   :  { %3892 = vmatprep.mubr.msk.f32.mxu1 %vm4496_vm3, %v4483_v25 }
 0x87a   :  { %3893 = vmatmul.mubr.msk.f32.gmra.mrb[12].mxu1 %vm1353_vm4, %v31_v52 }
 0x87b   :  { %3895 = vmatprep.mubr.msk.f32.mxu1 %vm4496_vm3, %v4483_v25 }
 0x87e   :  { %3896 = vmatmul.mubr.msk.f32.gmra.mrb[14].mxu1 %vm1353_vm4, %v32_v59 }
 0x87f   :  { %3905 = vmatprep.mubr.msk.f32.mxu1 %vm4496_vm3, %v4483_v25 }
 0x884   :  { %v1351_v4 = vpop.permute.xlu1 %1350 }
 0x949   :  { %v1429_v60 = vpop.f32.mrb[10].mxu1 }
 0x94a   :  { %v3891_v62 = vpop.f32.mrb[11].mxu1 }
 0x94d   :  { %v1434_v53 = vpop.f32.mrb[12].mxu1 }
 0x94e   :  { %v1435_v0 = vadd.f32 %v1434_v53, %v1346_v63  ;;  %v3894_v1 = vpop.f32.mrb[13].mxu1 }
 0x950   :  { %1641 = vrot.lane.b32.xlu0 %v1435_v0, %s4490_s30  ;;  %3899 = vmatpush3.xpose.msk.msra.mxu0 %vm1290_vm2, %v1435_v0 }
 0x951   :  { %v1439_v5 = vpop.f32.mrb[14].mxu1  ;;  %3908 = vmatprep.subr.mxu0 %v4483_v25 }
 0x952   :  { %v1440_v7 = vadd.f32 %v1439_v5, %v1351_v4  ;;  %v3897_v8 = vpop.f32.mrb[15].mxu1  ;;  %v37_v4 = vld [vmem:[%s5288_s5 + $0x68] sm:$0xff] }
 0x954   :  { %1639 = vrot.lane.b32.xlu1 %v1440_v7, %s4490_s30  ;;  %3901 = vmatmul.mubr.msk.f32.vlgmr.msra.gmra.mrb[8].mxu0 %vm1290_vm2, %v1440_v7 }
 0x955   :  { %3910 = vmatprep.mubr.msk.f32.mxu0 %vm4496_vm3, %v4483_v25 }
 0x9c2   :  { %v1642_v9 = vpop.permute.xlu0 %1641 }
 0x9c3   :  { %3909 = vmatpush3.xpose.msk.msra.mxu0 %vm1290_vm2, %v1642_v9 }
 0x9c4   :  { %3918 = vmatprep.subr.mxu0 %v4483_v25 }
 0x9c6   :  { %v1640_v11 = vpop.permute.xlu1 %1639 }
 0x9c7   :  { %3911 = vmatmul.mubr.msk.f32.vlgmr.msra.gmra.mrb[10].mxu0 %vm1290_vm2, %v1640_v11 }
 0x9c8   :  { %3920 = vmatprep.mubr.msk.f32.mxu0 %vm4496_vm3, %v4483_v25 }
 0xa27   :  { %v1518_v15 = vpop.f32.mrb[8].mxu0 }
 0xa28   :  { %v1522_v16 = vsel %vm1445_vm5, %v1518_v15, -1e+30  ;;  %v3902_v2 = vpop.f32.mrb[9].mxu0  ;;  %v2029_v15 = vld [vmem:[%s5287_s4 + $0x8] sm:$0xff] }
 0xa29   :  { %v1523_v3 = vsel %vm1353_vm4, %v1522_v16, -inf  ;;  %v2028_v2 = vld [vmem:[%s5287_s4] sm:$0xff] }
 0xa2a   :  { %1524 = vmax.xlane.f32.xlu0 %v1523_v3  ;;  %v2030_v3 = vld [vmem:[%s5287_s4 + $0x10] sm:$0xff] }
 0xa40   :  { %1340 = vperm.xlu0 %4289, %v33_v61   ;;  %v5081_v61 = vld [vmem:[%s5283_s0 + $0x8] sm:$0xff] }
 0xa9a   :  { %v1713_v14 = vpop.f32.mrb[10].mxu0 }
 0xa9b   :  { %v1717_v19 = vsel %vm1445_vm5, %v1713_v14, -1e+30  ;;  %v3912_v17 = vpop.f32.mrb[11].mxu0  ;;  %v5087_v14 = vld [vmem:[%s5283_s0 + $0x18] sm:$0xff] }
 0xa9c   :  { %v1718_v6 = vsel %vm1353_vm4, %v1717_v19, -inf }
 0xa9d   :  { %1719 = vmax.xlane.f32.xlu1 %v1718_v6 }
 0xab7   :  { %v1525_v24 = vpop.xlane.xlu0 %1524 }
 0xab8   :  { %v1526_v27 = vsub.f32 %v1522_v16, %v1525_v24  ;;  %v2031_v16 = vld [vmem:[%s5287_s4 + $0x18] sm:$0xff] }
 0xaba   :  { %v1527_v18 = vmul.f32 1.442695, %v1526_v27 }
 0xabc   :  { %4421 = vpow2.f32 %v1527_v18 }
 0xabf   :  { %v1341_v20 = vpop.permute.xlu0 %1340 }
 0xac0   :  { %v1430_v21 = vadd.f32 %v1429_v60, %v1341_v20 }
 0xac2   :  { %3904 = vmatpush3.msra.mxu1 %v1430_v21 }
 0xac3   :  { %3913 = vmatprep.subr.mxu1 %v4483_v25 }
 0xac6   :  { %v4422_v10 = vpop.eup %4421 }
 0xac7   :  { %v1529_v22 = vsel %vm1353_vm4, %v4422_v10, 0.0 }
 0xac8   :  { %1530 = vadd.xlane.f32.xlu1 %v1529_v22 }
 0xb2a   :  { %v1720_v23 = vpop.xlane.xlu1 %1719 }
 0xb2b   :  { %v1721_v26 = vsub.f32 %v1717_v19, %v1720_v23 }
 0xb2d   :  { %v1722_v28 = vmul.f32 1.442695, %v1721_v26 }
 0xb2f   :  { %4423 = vpow2.f32 %v1722_v28 }
 0xb39   :  { %v4424_v29 = vpop.eup %4423 }
 0xb3a   :  { %v1724_v30 = vsel %vm1353_vm4, %v4424_v29, 0.0 }
 0xb3b   :  { %1725 = vadd.xlane.f32.xlu1 %v1724_v30  ;;  %v39_v30 = vld [vmem:[%s5288_s5 + $0x78] sm:$0xff] }
 0xb4c   :  { %1762 = vrot.lane.b32.xlu1 %v1430_v21, %s4490_s30 }
 0xb55   :  { %v1531_v31 = vpop.xlane.xlu1 %1530 }
 0xb56   :  { %4425 = vrcp.f32 %v1531_v31  ;;  %v40_v31 = vld [vmem:[%s5288_s5 + $0x80] sm:$0xff] }
 0xb60   :  { %v4426_v32 = vpop.eup %4425 }
 0xb61   :  { %v1533_v33 = vmul.f32 %v4426_v32, %v4422_v10 }
 0xb63   :  { %1534 = vxpose.xlu0.b32.start.end [1/1] (short) (narrow) %v1533_v33, 8 }
 0xbc8   :  { %v1726_v34 = vpop.xlane.xlu1 %1725 }
 0xbc9   :  { %4427 = vrcp.f32 %v1726_v34 }
 0xbcc   :  { %v1763_v38 = vpop.permute.xlu1 %1762 }
 0xbd3   :  { %v4428_v35 = vpop.eup %4427 }
 0xbd4   :  { %v1728_v36 = vmul.f32 %v4428_v35, %v4424_v29  ;;  %v5096_v29 = vld [vmem:[%s5283_s0] sm:$0xff] }
 0xbd6   :  { %1729 = vxpose.xlu1.b32.start.end [1/1] (short) (narrow) %v1728_v36, 8 }
 0xbe3   :  { %v1550_v37 = vpop.trf.xlu0 }
 0xbe4   :  { %3906 = vmatmul.mubr.msk.f32.vlgmr.msra.gmra.mrb[16].mxu1 %vm1353_vm4, %v1550_v37 }
 0xbe5   :  { %3914 = vmatpush3.msra.mxu1 %v1763_v38  ;;  %3915 = vmatprep.mubr.msk.f32.mxu1 %vm4496_vm3, %v4483_v25 }
 0xbe6   :  { %3923 = vmatprep.subr.mxu1 %v4483_v25 }
 0xc56   :  { %v1745_v39 = vpop.trf.xlu1 }
 0xc57   :  { %3916 = vmatmul.mubr.msk.f32.vlgmr.msra.gmra.mrb[18].mxu1 %vm1353_vm4, %v1745_v39 }
 0xc58   :  { %3925 = vmatprep.mubr.msk.f32.mxu1 %vm4496_vm3, %v4483_v25 }
 0xcb7   :  { %v1635_v40 = vpop.f32.mrb[16].mxu1 }
 0xcb8   :  { %v3907_v42 = vpop.f32.mrb[17].mxu1 }
 0xd2a   :  { %v1834_v44 = vpop.f32.mrb[18].mxu1 }
 0xd2b   :  { %1839 = vrot.lane.b32.xlu0 %v1834_v44, %s4497_s14  ;;  %v3917_v45 = vpop.f32.mrb[19].mxu1 }
 0xd9d   :  { %v1840_v47 = vpop.permute.xlu0 %1839 }
 0xd9e   :  { %v1842_v43 = vsel %vm1290_vm2, %v1635_v40, %v1840_v47 }
 0xd9f   :  { %3919 = vmatpush3.msra.mxu0 %v1842_v43 }
 0xda0   :  { %3921 = vmatmul.mubr.msk.f32.vlgmr.msra.gmra.mrb[12].mxu0 %vm1353_vm4, %v36_v49  ;;  %2035 = vmatprep.subr.mxu0 %v2029_v15 }
 0xda1   :  { %2099 = vmatprep.mubr.f32.mxu0 %v4483_v25  ;;  %2036 = vmatpush1.msra.mxu0 %v2028_v2 }
 0xda2   :  { %2188 = vmatprep.subr.mxu0 %v5081_v61 }
 0xe73   :  { %v1912_v51 = vpop.f32.mrb[12].mxu0 }
 0xe74   :  { %v1920_v54 = vmul.f32 %v1912_v51, %v1912_v51  ;;  %v3922_v46 = vpop.f32.mrb[13].mxu0  ;;  %v1916_v48 = vsel %vm1353_vm4, %v1912_v51, 0.0 }
 0xe75   :  { %1917 = vadd.xlane.f32.xlu1 %v1916_v48 }
 0xe76   :  { %v1921_v41 = vsel %vm1353_vm4, %v1920_v54, 0.0 }
 0xe77   :  { %1922 = vadd.xlane.f32.xlu0 %v1921_v41 }
 0xe86   :  { %1934 = vperm.xlu1 %4290, %v38_v50  }
 0xf02   :  { %v1918_v55 = vpop.xlane.xlu1 %1917 }
 0xf03   :  { %v1919_v56 = vmul.f32 0.125, %v1918_v55 }
 0xf04   :  { %v1923_v57 = vpop.xlane.xlu0 %1922 }
 0xf05   :  { %v1925_v52 = vmul.f32 %v1919_v56, %v1919_v56  ;;  %v1924_v59 = vmul.f32 0.125, %v1923_v57  ;;  %v1928_v53 = vsub.f32 %v1912_v51, %v1919_v56 }
 0xf06   :  { %v1935_v5 = vpop.permute.xlu1 %1934 }
 0xf07   :  { %v1926_v60 = vsub.f32 %v1924_v59, %v1925_v52 }
 0xf09   :  { %v1927_v62 = vmax.f32 %v1926_v60, 0.0 }
 0xf0b   :  { %v1929_v63 = vadd.f32 1e-05, %v1927_v62 }
 0xf0d   :  { %4429 = vrsqrt.f32 %v1929_v63 }
 0xf17   :  { %v4430_v0 = vpop.eup %4429 }
 0xf18   :  { %v1931_v1 = vmul.f32 %v4430_v0, %v1928_v53 }
 0xf1a   :  { %3924 = vmatpush3.msra.mxu1 %v1931_v1 }
 0xf1b   :  { %3926 = vmatmul.mubr.msk.f32.vlgmr.msra.gmra.mrb[20].mxu1 %vm1353_vm4, %v37_v4  ;;  %2106 = vmatprep.subr.mxu1 %v2031_v16 }
 0xf1c   :  { %2170 = vmatprep.mubr.f32.mxu1 %v4483_v25  ;;  %2107 = vmatpush1.msra.mxu1 %v2030_v3 }
 0xf1d   :  { %2259 = vmatprep.subr.mxu1 %v5087_v14 }
 0xfee   :  { %v2006_v7 = vpop.f32.mrb[20].mxu1 }
 0xfef   :  { %v2007_v8 = vadd.f32 %v2006_v7, %v1935_v5  ;;  %v3927_v9 = vpop.f32.mrb[21].mxu1 }
 0xff1   :  { %v2010_v11 = vsel %vm1353_vm4, %v2007_v8, 0.0  ;;  %v2014_v12 = vmul.f32 %v2007_v8, %v2007_v8 }
 0xff2   :  { %2011 = vadd.xlane.f32.xlu0 %v2010_v11 }
 0xff3   :  { %v2015_v13 = vsel %vm1353_vm4, %v2014_v12, 0.0 }
 0xff4   :  { %2016 = vadd.xlane.f32.xlu1 %v2015_v13 }
0x107f   :  { %v2012_v19 = vpop.xlane.xlu0 %2011 }
0x1080   :  { %v2013_v17 = vmul.f32 0.125, %v2012_v19 }
0x1081   :  { %v2017_v6 = vpop.xlane.xlu1 %2016 }
0x1082   :  { %v2019_v24 = vmul.f32 %v2013_v17, %v2013_v17  ;;  %v2018_v27 = vmul.f32 0.125, %v2017_v6  ;;  %v2022_v10 = vsub.f32 %v2007_v8, %v2013_v17 }
0x1084   :  { %v2020_v18 = vsub.f32 %v2018_v27, %v2019_v24 }
0x1086   :  { %v2021_v20 = vmax.f32 %v2020_v18, 0.0 }
0x1088   :  { %v2023_v21 = vadd.f32 1e-05, %v2021_v20 }
0x108a   :  { %4431 = vrsqrt.f32 %v2023_v21 }
0x1094   :  { %v4432_v22 = vpop.eup %4431 }
0x1095   :  { %v2025_v23 = vmul.f32 %v4432_v22, %v2022_v10 }
0x1097   :  { %v2026_v26 = vadd.f32 %v2025_v23, %v5000_v58  ;;  %v5106_v58 = vld [vmem:[%s5283_s0 + $0x10] sm:$0xff] }
0x1099   :  { %v2027_v28 = vmax.f32 %v2026_v26, 0.0 }
0x109b   :  { %3780 = vmatmul.mubr.msk.f32.vlgmr.msra.gmra.mrb[14].mxu0 %vm1353_vm4, %v2027_v28  ;;  %3781 = vmatmul.mubr.msk.f32.vlgmr.msra.gmra.mrb[22].mxu1 %vm1353_vm4, %v2027_v28 }
0x109c   :  { %2189 = vmatpush1.msra.mxu0 %v5096_v29  ;;  %2252 = vmatprep.mubr.f32.mxu0 %v4483_v25 }
0x109d   :  { %2260 = vmatpush1.msra.mxu1 %v5106_v58  ;;  %2323 = vmatprep.mubr.f32.mxu1 %v4483_v25 }
0x109e   :  { %2372 = vmatprep.subr.mxu0 %v5081_v61  ;;  %2443 = vmatprep.subr.mxu1 %v5087_v14 }
0x109f   :  { %3782 = vmatmul.mubr.msk.f32.vlgmr.msra.gmra.mrb[16].mxu0 %vm1353_vm4, %v39_v30  ;;  %3783 = vmatmul.mubr.msk.f32.vlgmr.msra.gmra.mrb[24].mxu1 %vm1353_vm4, %v39_v30 }
0x10a0   :  { %2373 = vmatpush1.msra.mxu0 %v5096_v29  ;;  %2436 = vmatprep.mubr.f32.mxu0 %v4483_v25 }
0x10a1   :  { %2444 = vmatpush1.msra.mxu1 %v5106_v58  ;;  %2507 = vmatprep.mubr.f32.mxu1 %v4483_v25 }
0x10a3   :  { %3784 = vmatmul.mubr.msk.f32.vlgmr.msra.gmra.mrb[18].mxu0 %vm1353_vm4, %v40_v31  ;;  %3785 = vmatmul.mubr.msk.f32.vlgmr.msra.gmra.mrb[26].mxu1 %vm1353_vm4, %v40_v31 }
0x116e   :  { %v5123_v32 = vpop.f32.mrb[14].mxu0  ;;  %v5125_v33 = vpop.f32.mrb[22].mxu1 }
0x116f   :  { %v5127_v34 = vpop.f32.mrb[15].mxu0  ;;  %v5129_v35 = vpop.f32.mrb[23].mxu1 }
0x1172   :  { %v5131_v36 = vpop.f32.mrb[16].mxu0  ;;  %v5133_v37 = vpop.f32.mrb[24].mxu1 }
0x1173   :  { %v2331_v38 = vsel %vm2330_vm6, %v5131_v36, 0.0  ;;  %v2342_v39 = vmul.f32 %v5131_v36, %v5131_v36  ;;  %v5139_v40 = vpop.f32.mrb[17].mxu0  ;;  %v2344_v42 = vmul.f32 %v5133_v37, %v5133_v37  ;;  %v5143_v44 = vpop.f32.mrb[25].mxu1  ;;  %v2334_v49 = vsel %vm2330_vm6, %v5133_v37, 0.0 }
0x1174   :  { %v2332_v45 = vsel %vm2330_vm6, %v5139_v40, 0.0  ;;  %v2343_v47 = vmul.f32 %v5139_v40, %v5139_v40  ;;  %v2345_v48 = vmul.f32 %v5143_v44, %v5143_v44  ;;  %v2336_v1 = vsel %vm2330_vm6, %v5143_v44, 0.0 }
0x1175   :  { %v2346_v43 = vsel %vm2330_vm6, %v2342_v39, 0.0  ;;  %v2333_v51 = vadd.f32 %v2332_v45, %v2331_v38  ;;  %v2349_v46 = vsel %vm2330_vm6, %v2344_v42, 0.0 }
0x1176   :  { %v2347_v54 = vsel %vm2330_vm6, %v2343_v47, 0.0  ;;  %v2438_v41 = vpop.f32.mrb[18].mxu0  ;;  %v2509_v50 = vpop.f32.mrb[26].mxu1  ;;  %v2351_v16 = vsel %vm2330_vm6, %v2345_v48, 0.0 }
0x1177   :  { %v2348_v55 = vadd.f32 %v2347_v54, %v2346_v43  ;;  %v2335_v56 = vadd.f32 %v2334_v49, %v2333_v51  ;;  %v2515_v57 = vsel %vm2514_vm7, %v2438_v41, 0.0  ;;  %v2525_v52 = vmul.f32 %v2438_v41, %v2438_v41  ;;  %v2440_v59 = vpop.f32.mrb[19].mxu0  ;;  %v2511_v60 = vpop.f32.mrb[27].mxu1 }
0x1178   :  { %v2516_v62 = vsel %vm2514_vm7, %v2440_v59, 0.0  ;;  %v2526_v63 = vmul.f32 %v2440_v59, %v2440_v59  ;;  %v2518_v53 = vsel %vm2514_vm7, %v2509_v50, 0.0  ;;  %v2527_v0 = vmul.f32 %v2509_v50, %v2509_v50 }
0x1179   :  { %v2529_v4 = vsel %vm2514_vm7, %v2525_v52, 0.0  ;;  %v2517_v5 = vadd.f32 %v2516_v62, %v2515_v57  ;;  %v2528_v7 = vmul.f32 %v2511_v60, %v2511_v60  ;;  %v2337_v11 = vadd.f32 %v2336_v1, %v2335_v56 }
0x117a   :  { %v2530_v8 = vsel %vm2514_vm7, %v2526_v63, 0.0  ;;  %v2532_v9 = vsel %vm2514_vm7, %v2527_v0, 0.0  ;;  %v2350_v12 = vadd.f32 %v2349_v46, %v2348_v55  ;;  %v2520_v2 = vsel %vm2514_vm7, %v2511_v60, 0.0 }
0x117b   :  { %v2531_v13 = vadd.f32 %v2530_v8, %v2529_v4  ;;  %v2519_v15 = vadd.f32 %v2518_v53, %v2517_v5  ;;  %2338 = vadd.xlane.f32.xlu0 %v2337_v11  ;;  %v2534_v6 = vsel %vm2514_vm7, %v2528_v7, 0.0 }
0x117c   :  { %v2352_v3 = vadd.f32 %v2351_v16, %v2350_v12 }
0x117d   :  { %v2521_v19 = vadd.f32 %v2520_v2, %v2519_v15  ;;  %v2533_v17 = vadd.f32 %v2532_v9, %v2531_v13 }
0x117f   :  { %v2535_v24 = vadd.f32 %v2534_v6, %v2533_v17  ;;  %2522 = vadd.xlane.f32.xlu0 %v2521_v19 }
0x1183   :  { %2536 = vadd.xlane.f32.xlu0 %v2535_v24 }
0x1187   :  { %2353 = vadd.xlane.f32.xlu0 %v2352_v3 }
0x1208   :  { %v2339_v27 = vpop.xlane.xlu0 %2338 }
0x1209   :  { %v2341_v10 = vmul.f32 0.001953125, %v2339_v27 }
0x120b   :  { %v2356_v31 = vmul.f32 %v2341_v10, %v2341_v10  ;;  %v2360_v52 = vsub.f32 %v5139_v40, %v2341_v10  ;;  %v41_v40 = vld [vmem:[%s5288_s5 + $0x88] sm:$0xff] }
0x120c   :  { %v2523_v18 = vpop.xlane.xlu0 %2522 }
0x120d   :  { %v2524_v20 = vmul.f32 0.001953125, %v2523_v18 }
0x120f   :  { %v2539_v22 = vmul.f32 %v2524_v20, %v2524_v20  ;;  %v2543_v49 = vsub.f32 %v2440_v59, %v2524_v20  ;;  %v2545_v43 = vsub.f32 %v2511_v60, %v2524_v20  ;;  %v2542_v51 = vsub.f32 %v2438_v41, %v2524_v20 }
0x1210   :  { %v2537_v21 = vpop.xlane.xlu0 %2536  ;;  %v2544_v54 = vsub.f32 %v2509_v50, %v2524_v20  ;;  %v2362_v59 = vsub.f32 %v5143_v44, %v2341_v10  ;;  %v2359_v41 = vsub.f32 %v5131_v36, %v2341_v10  ;;  %v2361_v50 = vsub.f32 %v5133_v37, %v2341_v10 }
0x1211   :  { %v2538_v23 = vmul.f32 0.001953125, %v2537_v21 }
0x1213   :  { %v2540_v26 = vsub.f32 %v2538_v23, %v2539_v22 }
0x1214   :  { %v2354_v28 = vpop.xlane.xlu0 %2353 }
0x1215   :  { %v2541_v30 = vmax.f32 %v2540_v26, 0.0  ;;  %v2355_v38 = vmul.f32 0.001953125, %v2354_v28 }
0x1217   :  { %v2546_v39 = vadd.f32 1e-05, %v2541_v30  ;;  %v2357_v42 = vsub.f32 %v2355_v38, %v2356_v31 }
0x1219   :  { %4433 = vrsqrt.f32 %v2546_v39  ;;  %v2358_v45 = vmax.f32 %v2357_v42, 0.0 }
0x121b   :  { %v2363_v47 = vadd.f32 1e-05, %v2358_v45 }
0x121d   :  { %4435 = vrsqrt.f32 %v2363_v47 }
0x1223   :  { %v4434_v46 = vpop.eup %4433 }
0x1224   :  { %v5167_v48 = vmul.f32 %v4434_v46, %v2543_v49  ;;  %v5169_v55 = vmul.f32 %v4434_v46, %v2545_v43  ;;  %v5171_v56 = vmul.f32 %v4434_v46, %v2542_v51  ;;  %v5173_v57 = vmul.f32 %v4434_v46, %v2544_v54 }
0x1226   :  { %2552 = vmatprep.subr.mxu0 %v5167_v48  ;;  %2622 = vmatprep.subr.mxu1 %v5169_v55 }
0x1227   :  { %v4436_v60 = vpop.eup %4435  ;;  %2553 = vmatpush1.xpose.msra.mxu0 %v5171_v56  ;;  %2623 = vmatpush1.xpose.msra.mxu1 %v5173_v57 }
0x1228   :  { %v2366_v62 = vmul.f32 %v4436_v60, %v2360_v52  ;;  %v2368_v63 = vmul.f32 %v4436_v60, %v2362_v59  ;;  %v2365_v53 = vmul.f32 %v4436_v60, %v2359_v41  ;;  %v2367_v0 = vmul.f32 %v4436_v60, %v2361_v50  ;;  %3928 = vmatprep.subr.mxu0 %v4483_v25 }
0x1229   :  { %3933 = vmatprep.subr.mxu1 %v4483_v25 }
0x122a   :  { %2616 = vmatprep.mubr.f32.mxu0 %v2366_v62  ;;  %2686 = vmatprep.mubr.f32.mxu1 %v2368_v63 }
0x122b   :  { %2617 = vmatmul.mubr.f32.vlgmr.msra.gmra.mrb[20].mxu0 %v2365_v53  ;;  %2687 = vmatmul.mubr.f32.vlgmr.msra.gmra.mrb[28].mxu1 %v2367_v0 }
0x122c   :  { %3929 = vmatpush3.xpose.msk.msra.mxu0 %vm2692_vm8, %v41_v40  ;;  %3934 = vmatpush3.xpose.msk.msra.mxu1 %vm2692_vm8, %v41_v40 }
0x122d   :  { %3930 = vmatprep.mubr.msk.f32.mxu0 %vm4496_vm3, %v4483_v25  ;;  %3935 = vmatprep.mubr.msk.f32.mxu1 %vm4496_vm3, %v4483_v25 }
0x122e   :  { %3938 = vmatprep.subr.mxu0 %v4483_v25  ;;  %3943 = vmatprep.subr.mxu1 %v4483_v25 }
0x12fe   :  { %v2618_v36 = vpop.f32.mrb[20].mxu0  ;;  %v2688_v37 = vpop.f32.mrb[28].mxu1 }
0x12ff   :  { %v2620_v44 = vpop.f32.mrb[21].mxu0  ;;  %v2690_v1 = vpop.f32.mrb[29].mxu1  ;;  %3931 = vmatmul.mubr.msk.f32.vlgmr.msra.gmra.mrb[22].mxu0 %vm2692_vm8, %v2618_v36  ;;  %3936 = vmatmul.mubr.msk.f32.vlgmr.msra.gmra.mrb[30].mxu1 %vm2692_vm8, %v2688_v37 }
0x1300   :  { %3940 = vmatprep.mubr.msk.f32.mxu0 %vm4496_vm3, %v4483_v25  ;;  %3945 = vmatprep.mubr.msk.f32.mxu1 %vm4496_vm3, %v4483_v25 }
0x13d2   :  { %v2765_v4 = vpop.f32.mrb[22].mxu0  ;;  %v2838_v5 = vpop.f32.mrb[30].mxu1 }
0x13d3   :  { %v2843_v7 = vsel %vm2842_vm9, %v2765_v4, 0.0  ;;  %v2859_v8 = vmul.f32 %v2765_v4, %v2765_v4  ;;  %v2851_v9 = vsel %vm2842_vm9, %v2838_v5, 0.0  ;;  %v2868_v11 = vmul.f32 %v2838_v5, %v2838_v5  ;;  %v3932_v12 = vpop.f32.mrb[23].mxu0  ;;  %v3937_v13 = vpop.f32.mrb[31].mxu1 }
0x13d4   :  { %v2844_v15 = vrot.slane %v2843_v7, 4  ;;  %v2852_v16 = vrot.slane %v2851_v9, 4 }
0x13d5   :  { %v2860_v2 = vsel %vm2842_vm9, %v2859_v8, 0.0  ;;  %v2869_v3 = vsel %vm2842_vm9, %v2868_v11, 0.0 }
0x13d6   :  { %v2845_v19 = vadd.f32 %v2844_v15, %v2843_v7  ;;  %v2861_v17 = vrot.slane %v2860_v2, 4  ;;  %v2853_v6 = vadd.f32 %v2852_v16, %v2851_v9  ;;  %v2870_v24 = vrot.slane %v2869_v3, 4  ;;  %v42_v7 = vld [vmem:[%s5288_s5 + $0x90] sm:$0xff] }
0x13d8   :  { %v2846_v27 = vrot.slane %v2845_v19, 2  ;;  %v2862_v18 = vadd.f32 %v2861_v17, %v2860_v2  ;;  %v2854_v20 = vrot.slane %v2853_v6, 2  ;;  %v2871_v21 = vadd.f32 %v2870_v24, %v2869_v3 }
0x13da   :  { %v2847_v10 = vadd.f32 %v2846_v27, %v2845_v19  ;;  %v2863_v22 = vrot.slane %v2862_v18, 2  ;;  %v2855_v23 = vadd.f32 %v2854_v20, %v2853_v6  ;;  %v2872_v26 = vrot.slane %v2871_v21, 2 }
0x13dc   :  { %v2848_v28 = vrot.slane %v2847_v10, 1  ;;  %v2864_v30 = vadd.f32 %v2863_v22, %v2862_v18  ;;  %v2856_v31 = vrot.slane %v2855_v23, 1  ;;  %v2873_v38 = vadd.f32 %v2872_v26, %v2871_v21 }
0x13de   :  { %v2849_v39 = vadd.f32 %v2848_v28, %v2847_v10  ;;  %v2865_v42 = vrot.slane %v2864_v30, 1  ;;  %v2857_v45 = vadd.f32 %v2856_v31, %v2855_v23  ;;  %v2874_v47 = vrot.slane %v2873_v38, 1  ;;  %v43_v31 = vld [vmem:[%s5288_s5 + $0x98] sm:$0xff] }
0x13e0   :  { %v2866_v49 = vadd.f32 %v2865_v42, %v2864_v30  ;;  %v2858_v43 = vadd.f32 %v2857_v45, %v2849_v39  ;;  %v2875_v51 = vadd.f32 %v2874_v47, %v2873_v38 }
0x13e2   :  { %v2876_v54 = vadd.f32 %v2875_v51, %v2866_v49  ;;  %v2877_v46 = vmul.f32 0.125, %v2858_v43 }
0x13e4   :  { %v2878_v52 = vmul.f32 0.125, %v2876_v54  ;;  %v2879_v59 = vmul.f32 %v2877_v46, %v2877_v46  ;;  %v2884_v41 = vsub.f32 %v2765_v4, %v2877_v46  ;;  %v2886_v50 = vsub.f32 %v2838_v5, %v2877_v46 }
0x13e6   :  { %v2880_v60 = vsub.f32 %v2878_v52, %v2879_v59 }
0x13e8   :  { %v2881_v62 = vmax.f32 %v2880_v60, 0.0 }
0x13ea   :  { %v2882_v63 = vadd.f32 1e-05, %v2881_v62 }
0x13ec   :  { %4437 = vrsqrt.f32 %v2882_v63 }
0x13f6   :  { %v4438_v53 = vpop.eup %4437 }
0x13f7   :  { %v2887_v0 = vmul.f32 %v4438_v53, %v2886_v50  ;;  %v2885_v40 = vmul.f32 %v4438_v53, %v2884_v41 }
0x13f9   :  { %v2889_v44 = vadd.f32 %v2887_v0, %v2688_v37  ;;  %v2888_v1 = vadd.f32 %v2885_v40, %v2618_v36 }
0x13fb   :  { %3939 = vmatpush3.msk.msra.mxu0 %vm2330_vm6, %v2888_v1  ;;  %3944 = vmatpush3.msk.msra.mxu1 %vm2330_vm6, %v2889_v44 }
0x13fc   :  { %3941 = vmatmul.mubr.msk.f32.vlgmr.msra.gmra.mrb[24].mxu0 %vm1290_vm2, %v42_v7  ;;  %3794 = vmatprep.subr.msk.mxu0 %vm2514_vm7, %v5167_v48 }
0x13fd   :  { %3797 = vmatprep.subr.msk.mxu1 %vm2514_vm7, %v5169_v55  ;;  %3946 = vmatmul.mubr.msk.f32.vlgmr.msra.gmra.mrb[32].mxu1 %vm1290_vm2, %v42_v7 }
0x13fe   :  { %3795 = vmatpush1.msk.msra.mxu0 %vm2514_vm7, %v5171_v56  ;;  %3798 = vmatpush1.msk.msra.mxu1 %vm2514_vm7, %v5173_v57 }
0x13ff   :  { %3142 = vmatprep.mubr.f32.mxu0 %v4483_v25  ;;  %3222 = vmatprep.mubr.f32.mxu1 %v4483_v25 }
0x14cf   :  { %v2962_v36 = vpop.f32.mrb[24].mxu0 }
0x14d0   :  { %v3942_v37 = vpop.f32.mrb[25].mxu0  ;;  %v3039_v4 = vsel %vm2842_vm9, %v2962_v36, 0.0  ;;  %v3035_v48 = vpop.f32.mrb[32].mxu1  ;;  %v3047_v8 = vmul.f32 %v2962_v36, %v2962_v36 }
0x14d1   :  { %3040 = vadd.xlane.f32.xlu0 %v3039_v4  ;;  %v3947_v5 = vpop.f32.mrb[33].mxu1  ;;  %v3043_v55 = vsel %vm2842_vm9, %v3035_v48, 0.0  ;;  %v3052_v9 = vmul.f32 %v3035_v48, %v3035_v48 }
0x14d2   :  { %v3048_v56 = vsel %vm2842_vm9, %v3047_v8, 0.0 }
0x14d3   :  { %v3053_v57 = vsel %vm2842_vm9, %v3052_v9, 0.0 }
0x14d5   :  { %3044 = vadd.xlane.f32.xlu0 %v3043_v55 }
0x14d9   :  { %3049 = vadd.xlane.f32.xlu0 %v3048_v56 }
0x14dd   :  { %3054 = vadd.xlane.f32.xlu0 %v3053_v57 }
0x155e   :  { %v3041_v11 = vpop.xlane.xlu0 %3040 }
0x1562   :  { %v3045_v12 = vpop.xlane.xlu0 %3044 }
0x1563   :  { %v3046_v13 = vadd.f32 %v3045_v12, %v3041_v11 }
0x1565   :  { %v3058_v16 = vmul.f32 0.25, %v3046_v13  ;;  %v2177_v13 = vmul.f32 %v5096_v29, %v5123_v32 }
0x1566   :  { %v3050_v15 = vpop.xlane.xlu0 %3049 }
0x1567   :  { %v3060_v19 = vmul.f32 %v3058_v16, %v3058_v16  ;;  %v3065_v18 = vsub.f32 %v2962_v36, %v3058_v16  ;;  %v3067_v20 = vsub.f32 %v3035_v48, %v3058_v16  ;;  %v2178_v16 = vmul.f32 %v5081_v61, %v5127_v34 }
0x1568   :  { %v2181_v34 = vadd.f32 %v5096_v29, %v2177_v13 }
0x1569   :  { %v2182_v32 = vadd.f32 %v5081_v61, %v2178_v16 }
0x156a   :  { %v3055_v2 = vpop.xlane.xlu0 %3054 }
0x156b   :  { %v3056_v3 = vadd.f32 %v3055_v2, %v3050_v15  ;;  %v2179_v15 = vmul.f32 %v5106_v58, %v5125_v33  ;;  %v2180_v2 = vmul.f32 %v5087_v14, %v5129_v35 }
0x156d   :  { %v3059_v17 = vmul.f32 0.25, %v3056_v3  ;;  %v2184_v33 = vadd.f32 %v5087_v14, %v2180_v2  ;;  %v2183_v35 = vadd.f32 %v5106_v58, %v2179_v15 }
0x156f   :  { %v3061_v6 = vsub.f32 %v3059_v17, %v3060_v19 }
0x1571   :  { %v3062_v24 = vmax.f32 %v3061_v6, 0.0 }
0x1573   :  { %v3063_v27 = vadd.f32 1e-05, %v3062_v24  ;;  %v45_v24 = vld [vmem:[%s5288_s5 + $0xa8] sm:$0xff] }
0x1575   :  { %4439 = vrsqrt.f32 %v3063_v27 }
0x157f   :  { %v4440_v21 = vpop.eup %4439 }
0x1580   :  { %v3066_v10 = vmul.f32 %v4440_v21, %v3065_v18  ;;  %v3068_v22 = vmul.f32 %v4440_v21, %v3067_v20 }
0x1582   :  { %3796 = vmatmul.mubr.msk.f32.vlgmr.msra.gmra.mrb[26].mxu0 %vm2692_vm8, %v3066_v10  ;;  %3799 = vmatmul.mubr.msk.f32.vlgmr.msra.gmra.mrb[34].mxu1 %vm2692_vm8, %v3068_v22 }
0x1583   :  { %3308 = vmatprep.mubr.f32.mxu0 %v4483_v25  ;;  %3379 = vmatprep.mubr.f32.mxu1 %v4483_v25 }
0x1655   :  { %v3144_v23 = vpop.f32.mrb[26].mxu0  ;;  %v3224_v26 = vpop.f32.mrb[34].mxu1 }
0x1656   :  { %v3146_v28 = vpop.f32.mrb[27].mxu0  ;;  %v3226_v30 = vpop.f32.mrb[35].mxu1 }
0x1657   :  { %3800 = vmatprep.subr.msk.mxu0 %vm2330_vm6, %v3146_v28  ;;  %3803 = vmatprep.subr.msk.mxu1 %vm2330_vm6, %v3226_v30 }
0x1658   :  { %3801 = vmatpush1.msk.msra.mxu0 %vm2330_vm6, %v3144_v23  ;;  %3804 = vmatpush1.msk.msra.mxu1 %vm2330_vm6, %v3224_v26 }
0x1659   :  { %3802 = vmatmul.mubr.msk.f32.vlgmr.msra.gmra.mrb[28].mxu0 %vm1290_vm2, %v43_v31  ;;  %3805 = vmatmul.mubr.msk.f32.vlgmr.msra.gmra.mrb[36].mxu1 %vm1290_vm2, %v43_v31 }
0x165a   :  { %3490 = vmatprep.mubr.f32.mxu0 %v4483_v25  ;;  %3561 = vmatprep.mubr.f32.mxu1 %v4483_v25 }
0x172c   :  { %v3310_v38 = vpop.f32.mrb[28].mxu0  ;;  %v3381_v39 = vpop.f32.mrb[36].mxu1 }
0x172d   :  { %v3392_v42 = vmul.f32 %v3310_v38, %v3310_v38  ;;  %v3312_v45 = vpop.f32.mrb[29].mxu0  ;;  %v3383_v47 = vpop.f32.mrb[37].mxu1  ;;  %v3394_v51 = vmul.f32 %v3381_v39, %v3381_v39 }
0x172e   :  { %v3386_v49 = vadd.f32 %v3312_v45, %v3310_v38  ;;  %v3393_v43 = vmul.f32 %v3312_v45, %v3312_v45  ;;  %v3395_v41 = vmul.f32 %v3383_v47, %v3383_v47 }
0x1730   :  { %v3396_v54 = vadd.f32 %v3393_v43, %v3392_v42  ;;  %v3387_v46 = vadd.f32 %v3386_v49, %v3381_v39 }
0x1732   :  { %v3397_v52 = vadd.f32 %v3396_v54, %v3394_v51  ;;  %v3388_v59 = vadd.f32 %v3387_v46, %v3383_v47 }
0x1734   :  { %3389 = vadd.xlane.f32.xlu0 %v3388_v59  ;;  %v3398_v50 = vadd.f32 %v3397_v52, %v3395_v41 }
0x1736   :  { %3399 = vadd.xlane.f32.xlu1 %v3398_v50 }
0x17c1   :  { %v3390_v60 = vpop.xlane.xlu0 %3389 }
0x17c2   :  { %v3391_v62 = vmul.f32 0.001953125, %v3390_v60 }
0x17c3   :  { %v3400_v63 = vpop.xlane.xlu1 %3399 }
0x17c4   :  { %v3401_v53 = vmul.f32 0.001953125, %v3400_v63  ;;  %v3402_v0 = vmul.f32 %v3391_v62, %v3391_v62  ;;  %v3406_v7 = vsub.f32 %v3312_v45, %v3391_v62  ;;  %v3408_v36 = vsub.f32 %v3383_v47, %v3391_v62 }
0x17c5   :  { %v3405_v37 = vsub.f32 %v3310_v38, %v3391_v62  ;;  %v3407_v4 = vsub.f32 %v3381_v39, %v3391_v62 }
0x17c6   :  { %v3403_v40 = vsub.f32 %v3401_v53, %v3402_v0 }
0x17c8   :  { %v3404_v44 = vmax.f32 %v3403_v40, 0.0 }
0x17ca   :  { %v3409_v1 = vadd.f32 1e-05, %v3404_v44 }
0x17cc   :  { %4441 = vrsqrt.f32 %v3409_v1 }
0x17d6   :  { %v4442_v48 = vpop.eup %4441 }
0x17d7   :  { %v3412_v5 = vmul.f32 %v4442_v48, %v3406_v7  ;;  %v3414_v55 = vmul.f32 %v4442_v48, %v3408_v36  ;;  %v3411_v8 = vmul.f32 %v4442_v48, %v3405_v37  ;;  %v3413_v9 = vmul.f32 %v4442_v48, %v3407_v4 }
0x17d9   :  { %v3416_v56 = vadd.f32 %v5081_v61, %v3412_v5  ;;  %v3418_v57 = vadd.f32 %v5087_v14, %v3414_v55  ;;  %v3415_v11 = vadd.f32 %v5096_v29, %v3411_v8  ;;  %v3417_v12 = vadd.f32 %v5106_v58, %v3413_v9  ;;  %v44_v61 = vld [vmem:[%s5288_s5 + $0xa0] sm:$0xff]  ;;  %s4498_s5 = smov [#allocation2]  }
0x17da   :  { %s3752_s7 = sshll.u32 %s4498_s5, 4  ;;  %s3753_s7 = int_to_ptr.vmem [resolvable:$true] %s3752_s7 }
0x17db   :  { %v3420_v3 = vmax.f32 %v3416_v56, 0.0  ;;  %v3422_v19 = vmax.f32 %v3418_v57, 0.0  ;;  %v3419_v17 = vmax.f32 %v3415_v11, 0.0  ;;  %v3421_v6 = vmax.f32 %v3417_v12, 0.0  ;;  %s4449_s8 = scalar_lea.vmem %s3753_s7, 512  ;;  %p4454_p1 = scmp.lt.s32.totalorder %s3753_s7, %s3753_s7 }
0x17dc   :  { %p4450_p0 = scmp.ne.s32.totalorder %s3753_s7, %s4449_s8  ;;  %p4455_p2 = scmp.lt.s32.totalorder %s4449_s8, %s4449_s8 }
0x17dd   :  { %3426 = vmatprep.subr.mxu0 %v3420_v3  ;;  %3497 = vmatprep.subr.mxu1 %v3422_v19 }
0x17de   :  { %3427 = vmatpush1.msra.mxu0 %v3419_v17  ;;  %3498 = vmatpush1.msra.mxu1 %v3421_v6  ;;  %p4456_p3 = por %p4455_p2, %p4454_p1 }
0x17df   :  { %3806 = vmatmul.mubr.msk.f32.vlgmr.msra.gmra.mrb[30].mxu0 %vm1353_vm4, %v45_v24  ;;  %3807 = vmatmul.mubr.msk.f32.vlgmr.msra.gmra.mrb[38].mxu1 %vm1353_vm4, %v45_v24 }
0x17e0   :  { %3571 = vmatprep.subr.mxu0 %v2182_v32  ;;  %3642 = vmatprep.subr.mxu1 %v2184_v33  ;;  %p4457_p4 = pnand %p4456_p3, %p4450_p0 }
0x17e1   :  { %3572 = vmatpush1.msra.mxu0 %v2181_v34  ;;  %3643 = vmatpush1.msra.mxu1 %v2183_v35 }
0x17e2   :  { %3635 = vmatprep.mubr.f32.mxu0 %v4483_v25  ;;  %3706 = vmatprep.mubr.f32.mxu1 %v4483_v25 }
0x17e7   :  { %3808 = vmatmul.mubr.msk.f32.vlgmr.msra.gmra.mrb[30].mxu0 %vm1353_vm4, %v44_v61  ;;  %3809 = vmatmul.mubr.msk.f32.vlgmr.msra.gmra.mrb[38].mxu1 %vm1353_vm4, %v44_v61 }
0x18ba   :  { %v3637_v14 = vpop.f32.mrb[30].mxu0  ;;  %v3708_v29 = vpop.f32.mrb[38].mxu1 }
0x18bb   :  { %v3719_v58 = vmul.f32 %v3637_v14, %v3637_v14  ;;  %v3639_v27 = vpop.f32.mrb[31].mxu0  ;;  %v3710_v18 = vpop.f32.mrb[39].mxu1  ;;  %v3721_v10 = vmul.f32 %v3708_v29, %v3708_v29 }
0x18bc   :  { %v3713_v20 = vadd.f32 %v3639_v27, %v3637_v14  ;;  %v3720_v21 = vmul.f32 %v3639_v27, %v3639_v27  ;;  %v3722_v25 = vmul.f32 %v3710_v18, %v3710_v18 }
0x18be   :  { %v3723_v22 = vadd.f32 %v3720_v21, %v3719_v58  ;;  %v3714_v23 = vadd.f32 %v3713_v20, %v3708_v29 }
0x18c0   :  { %v3715_v26 = vadd.f32 %v3714_v23, %v3710_v18  ;;  %v3724_v28 = vadd.f32 %v3723_v22, %v3721_v10 }
0x18c2   :  { %v3725_v30 = vadd.f32 %v3724_v28, %v3722_v25  ;;  %3716 = vadd.xlane.f32.xlu0 %v3715_v26 }
0x18c4   :  { %3726 = vadd.xlane.f32.xlu1 %v3725_v30 }
0x194f   :  { %v3717_v31 = vpop.xlane.xlu0 %3716 }
0x1950   :  { %v3718_v38 = vmul.f32 0.001953125, %v3717_v31 }
0x1951   :  { %v3727_v39 = vpop.xlane.xlu1 %3726 }
0x1952   :  { %v3728_v42 = vmul.f32 0.001953125, %v3727_v39  ;;  %v3729_v45 = vmul.f32 %v3718_v38, %v3718_v38  ;;  %v3732_v51 = vsub.f32 %v3637_v14, %v3718_v38  ;;  %v3733_v54 = vsub.f32 %v3639_v27, %v3718_v38 }
0x1953   :  { %v3734_v46 = vsub.f32 %v3708_v29, %v3718_v38  ;;  %v3735_v52 = vsub.f32 %v3710_v18, %v3718_v38 }
0x1954   :  { %v3730_v47 = vsub.f32 %v3728_v42, %v3729_v45 }
0x1956   :  { %v3731_v49 = vmax.f32 %v3730_v47, 0.0 }
0x1958   :  { %v3736_v43 = vadd.f32 1e-05, %v3731_v49 }
0x195a   :  { %4443 = vrsqrt.f32 %v3736_v43 }
0x1964   :  { %v4444_v59 = vpop.eup %4443 }
0x1965   :  { %v3738_v41 = vmul.f32 %v4444_v59, %v3732_v51  ;;  %v3739_v50 = vmul.f32 %v4444_v59, %v3733_v54  ;;  %v3740_v60 = vmul.f32 %v4444_v59, %v3734_v46  ;;  %v3741_v62 = vmul.f32 %v4444_v59, %v3735_v52 }
0x1967   :  { %3742 = vst [vmem:[#allocation2] sm:$0xff] %v3738_v41  ;;  %3743 = vst [vmem:[#allocation2 + $0x8] sm:$0xff] %v3739_v50 }
0x1968   :  { %3745 = vst [vmem:[#allocation2 + $0x10] sm:$0xff] %v3740_v60  ;;  %3746 = vst [vmem:[#allocation2 + $0x18] sm:$0xff] %v3741_v62 }
0x1969   :  { %4460 = shalt.err (!%p4457_p4)
}
0x196a   :  { %s4461_s11 = scalar_lea.hbm %s5289_s6, 512 }
0x196b   :  { %p4462_p5 = scmp.ne.s32.totalorder %s5289_s6, %s4461_s11  ;;  %p4465_p6 = scmp.lt.u32.totalorder %s4461_s11, %s5289_s6 }
0x196d   :  { %p4467_p7 = pnand %p4465_p6, %p4462_p5 }
0x196f   :  { %4470 = shalt.err (!%p4467_p7)
}
0x1970   :  { %s4499_s16 = smov 256  }
0x1971   :  { %3758 = dma.vmem_to_hbm [thread:$0]  %s3753_s7, 512, %s5289_s6, [#allocation3], %s4499_s16, %s4499_s16, %s4489_s1  }
0x1972   :  { %4471 = dma.done.wait [#allocation3], 512  }
0x1973   :  { %4472 = vsyncadd [#allocation3], 4294966784 }
0x1974   :  { %3762 = vsyncpa [#allocation3], 1 }

</bundles_post_ra>
